<compile_context>
chip_gen: v6e
topology: v6e:2x2x1
jax: 0.10.0
libtpu: 0.0.40
codegen_flags: <defaults>
</compile_context>

<pallas_src>
import functools

import jax
import jax.numpy as jnp
from jax import lax
from jax.experimental import pallas as pl
from jax.experimental.pallas import tpu as pltpu


def _sentence_encoder_kernel(
    # inputs
    x_ref,        # (T, tb, D)   time-major input block
    wih_ref,      # (D, 6H)      input weights, lane-concat [r_f,z_f,n_f,r_b,z_b,n_b]
    gxb_ref,      # (1, 6H)      folded input-side biases (b_ih+b_hh for r,z; b_ih for n)
    whh_ref,      # (2, H, 3H)   recurrent weights per direction, gates [r,z,n] lane-concat
    bhn_ref,      # (2, 1, H)    b_hh_n per direction (stays inside r * (Whn h + bhn))
    w1_ref,       # (2H, 2H)     attention layer1 weight (already transposed)
    b1_ref,       # (1, 2H)
    w2_ref,       # (2H, 2H)     attention layer2 weight (no bias)
    # outputs
    sent_ref,     # (tb, 2H)
    lasth_ref,    # (2, tb, H)
    alpha_ref,    # (tb, T, 2H)  batch-major attention weights
    # scratch
    gx_ref,       # VMEM (T, tb, 6H)  hoisted input projections
    hs_ref,       # VMEM (T, tb, 2H)  bidirectional hidden states (fwd | bwd)
    *,
    hidden_size: int,
):
    H = hidden_size
    H2, H3, H6 = 2 * H, 3 * H, 6 * H
    T, tb, D = x_ref.shape

    # ---- Hoisted input projections: ONE (T*tb, D) @ (D, 6H) matmul ----
    # tb is a multiple of 8, so this reshape is (8,128)-tile aligned (no copy).
    x_flat = x_ref[...].reshape(T * tb, D)
    gx = jnp.dot(x_flat, wih_ref[...],
                 preferred_element_type=jnp.float32) + gxb_ref[...]
    gx_ref[...] = gx.reshape(T, tb, H6)

    whh_f = whh_ref[0]                 # (H, 3H)
    whh_b = whh_ref[1]                 # (H, 3H)
    bhn_f = bhn_ref[0]                 # (1, H)
    bhn_b = bhn_ref[1]                 # (1, H)

    # ---- Fused bidirectional recurrence: 2 matmuls per step (gate-stacked) ----
    def step(i, carry):
        h_f, h_b = carry
        j = T - 1 - i

        gh_f = jnp.dot(h_f, whh_f, preferred_element_type=jnp.float32)   # (tb, 3H)
        gh_b = jnp.dot(h_b, whh_b, preferred_element_type=jnp.float32)   # (tb, 3H)

        gx_i = gx_ref[i]               # (tb, 6H) forward-gate pre-activations live in [:, :3H]
        gx_j = gx_ref[j]               # backward-gate pre-activations live in [:, 3H:]

        # forward direction at timestep i  (gate order r, z, n)
        rz_f = jax.nn.sigmoid(gx_i[:, 0:H2] + gh_f[:, 0:H2])
        n_f = jnp.tanh(gx_i[:, H2:H3] + rz_f[:, 0:H] * (gh_f[:, H2:H3] + bhn_f))
        z_f = rz_f[:, H:H2]
        h_f_new = z_f * (h_f - n_f) + n_f          # == (1-z)*n + z*h

        # backward direction at timestep j = T-1-i
        rz_b = jax.nn.sigmoid(gx_j[:, H3:H3 + H2] + gh_b[:, 0:H2])
        n_b = jnp.tanh(gx_j[:, H3 + H2:H6] + rz_b[:, 0:H] * (gh_b[:, H2:H3] + bhn_b))
        z_b = rz_b[:, H:H2]
        h_b_new = z_b * (h_b - n_b) + n_b

        hs_ref[i, :, 0:H] = h_f_new
        hs_ref[j, :, H:H2] = h_b_new
        return h_f_new, h_b_new

    h0 = jnp.zeros((tb, H), jnp.float32)
    # T is small here; cap the unroll if T is scaled up (vreg live-range pressure).
    h_f_last, h_b_last = lax.fori_loop(0, T, step, (h0, h0),
                                       unroll=True if T <= 8 else 4)

    lasth_ref[0] = h_f_last.astype(lasth_ref.dtype)
    lasth_ref[1] = h_b_last.astype(lasth_ref.dtype)

    # ---- Attention over the sequence axis (leading axis in time-major layout) ----
    h_seq = hs_ref[...]                                   # (T, tb, 2H), no concat copy
    h_flat = h_seq.reshape(T * tb, H2)                    # tile-aligned reshape
    u = jnp.tanh(jnp.dot(h_flat, w1_ref[...],
                         preferred_element_type=jnp.float32) + b1_ref[...])
    scores = jnp.dot(u, w2_ref[...],
                     preferred_element_type=jnp.float32).reshape(T, tb, H2)

    m = jnp.max(scores, axis=0, keepdims=True)
    e = jnp.exp(scores - m)
    denom = jnp.sum(e, axis=0, keepdims=True)             # (1, tb, 2H)
    alphas = e * pl.reciprocal(denom)                     # exact reciprocal (parity)
    sentence = jnp.sum(alphas * h_seq, axis=0)            # (tb, 2H)

    sent_ref[...] = sentence.astype(sent_ref.dtype)

    # Emit attention weights batch-major directly (no wrapper transpose / extra
    # HBM pass). T is small and static, so these are T cheap sublane stores.
    for t in range(T):
        alpha_ref[:, t, :] = alphas[t].astype(alpha_ref.dtype)


def init_params(key, word_hidden_size, hidden_size):
    """Deterministic PyTorch-style uniform init (synthetic weights)."""
    H, D = hidden_size, word_hidden_size
    keys = jax.random.split(key, 11)
    kg = 1.0 / jnp.sqrt(H)        # GRU default init bound
    ka = 1.0 / jnp.sqrt(2 * H)    # Linear(2H, .) init bound

    def u(k, shape, bound):
        return jax.random.uniform(k, shape, jnp.float32, -bound, bound)

    return {
        # forward direction GRU (rows ordered [r; z; n] like PyTorch)
        "w_ih_f": u(keys[0], (3 * H, D), kg),
        "w_hh_f": u(keys[1], (3 * H, H), kg),
        "b_ih_f": u(keys[2], (3 * H,), kg),
        "b_hh_f": u(keys[3], (3 * H,), kg),
        # backward direction GRU
        "w_ih_b": u(keys[4], (3 * H, D), kg),
        "w_hh_b": u(keys[5], (3 * H, H), kg),
        "b_ih_b": u(keys[6], (3 * H,), kg),
        "b_hh_b": u(keys[7], (3 * H,), kg),
        # attention
        "att_w1": u(keys[8], (2 * H, 2 * H), ka),
        "att_b1": u(keys[9], (2 * H,), ka),
        "att_w2": u(keys[10], (2 * H, 2 * H), ka),
    }


def sentence_encoder_forward(encoder_output, hid_state, params, hidden_size,
                             batch_block=None):
    """Mirrors sentence_encoder.forward.

    Returns (output_attention[1, B, 2H],
             [last_hidden_state[2, B, H], att_weights[B, T, 2H]]).
    `hid_state` is accepted but unused, exactly like the PyTorch module.
    """
    del hid_state  # unused by the reference forward
    B, T, D = encoder_output.shape
    H = hidden_size
    H2, H3, H6 = 2 * H, 3 * H, 6 * H

    # Batch tile: multiple of 8 so sublanes are filled and in-kernel reshapes are
    # tile-aligned. On v7x, pick batch_block so cdiv(B, tb) >= 2 to use both TCs.
    tb = 8 if batch_block is None else int(batch_block)
    tb = max(8, ((tb + 7) // 8) * 8)
    n_blocks = pl.cdiv(B, tb)
    B_p = n_blocks * tb

    x = encoder_output.astype(jnp.float32)
    if B_p != B:
        x = jnp.pad(x, ((0, B_p - B), (0, 0), (0, 0)))   # zero-pad batch (rows discarded later)
    x_tbd = jnp.transpose(x, (1, 0, 2))                  # (T, B_p, D) time-major

    # ---- Weight prep: per-gate split, pre-transpose for x @ W, lane-concat gates ----
    def split_gates_t(w):            # (3H, X) -> [(X, H)] * 3 in r, z, n order
        return [w[g * H:(g + 1) * H, :].T for g in range(3)]

    def split_bias(b):               # (3H,) -> [(H,)] * 3
        return [b[g * H:(g + 1) * H] for g in range(3)]

    wih = jnp.concatenate(split_gates_t(params["w_ih_f"]) +
                          split_gates_t(params["w_ih_b"]), axis=1)       # (D, 6H)
    whh = jnp.stack([jnp.concatenate(split_gates_t(params["w_hh_f"]), axis=1),
                     jnp.concatenate(split_gates_t(params["w_hh_b"]), axis=1)],
                    axis=0)                                              # (2, H, 3H)

    bif, bhf = split_bias(params["b_ih_f"]), split_bias(params["b_hh_f"])
    bib, bhb = split_bias(params["b_ih_b"]), split_bias(params["b_hh_b"])
    # r,z gates: fold b_ih + b_hh; n gate: only b_ih (b_hh_n stays inside r*(...)).
    gx_bias = jnp.concatenate([bif[0] + bhf[0], bif[1] + bhf[1], bif[2],
                               bib[0] + bhb[0], bib[1] + bhb[1], bib[2]]
                              ).reshape(1, H6)                           # (1, 6H)
    bhn = jnp.stack([bhf[2], bhb[2]], axis=0).reshape(2, 1, H)           # (2, 1, H)

    w1 = params["att_w1"].T                     # (2H, 2H)
    b1 = params["att_b1"].reshape(1, H2)        # (1, 2H)
    w2 = params["att_w2"].T                     # (2H, 2H)

    def full_spec(shape):
        n = len(shape)
        return pl.BlockSpec(shape, lambda i, _n=n: (0,) * _n)

    grid = (n_blocks,)
    in_specs = [
        pl.BlockSpec((T, tb, D), lambda i: (0, i, 0)),   # x (batch-tiled)
        full_spec((D, H6)),
        full_spec((1, H6)),
        full_spec((2, H, H3)),
        full_spec((2, 1, H)),
        full_spec((H2, H2)),
        full_spec((1, H2)),
        full_spec((H2, H2)),
    ]
    out_specs = (
        pl.BlockSpec((tb, H2), lambda i: (i, 0)),        # sentence vector
        pl.BlockSpec((2, tb, H), lambda i: (0, i, 0)),   # last GRU hidden state
        pl.BlockSpec((tb, T, H2), lambda i: (i, 0, 0)),  # attention weights (batch-major)
    )
    out_shapes = (
        jax.ShapeDtypeStruct((B_p, H2), jnp.float32),
        jax.ShapeDtypeStruct((2, B_p, H), jnp.float32),
        jax.ShapeDtypeStruct((B_p, T, H2), jnp.float32),
    )
    scratch_shapes = [
        pltpu.VMEM((T, tb, H6), jnp.float32),   # hoisted input projections
        pltpu.VMEM((T, tb, H2), jnp.float32),   # bidirectional hidden states
    ]

    sent, last_h, alphas = pl.pallas_call(
        functools.partial(_sentence_encoder_kernel, hidden_size=H),
        out_shape=out_shapes,
        grid=grid,
        in_specs=in_specs,
        out_specs=out_specs,
        scratch_shapes=scratch_shapes,
        compiler_params=pltpu.CompilerParams(
            dimension_semantics=("parallel",)),   # batch axis shards across TCs (v7x)
    )(x_tbd, wih, gx_bias, whh, bhn, w1, b1, w2)

    output_attention = sent[:B][None]             # (1, B, 2H)
    last_hidden = last_h[:, :B, :]                # (2, B, H)
    att_weights = alphas[:B]                      # (B, T, 2H), already batch-major
    return output_attention, [last_hidden, att_weights]


def sentence_encoder_reference(encoder_output, params, hidden_size):
    """Pure-JAX reference of the PyTorch module (for correctness checks)."""
    H = hidden_size
    x = encoder_output.astype(jnp.float32)
    B, T, D = x.shape
    xs = jnp.transpose(x, (1, 0, 2))              # (T, B, D)

    def gru_dir(wih, whh, bih, bhh, seq):
        def step(h, x_t):
            gi = x_t @ wih.T + bih
            gh = h @ whh.T + bhh
            r = jax.nn.sigmoid(gi[:, :H] + gh[:, :H])
            z = jax.nn.sigmoid(gi[:, H:2 * H] + gh[:, H:2 * H])
            n = jnp.tanh(gi[:, 2 * H:] + r * gh[:, 2 * H:])
            h_new = (1.0 - z) * n + z * h
            return h_new, h_new
        h0 = jnp.zeros((B, H), jnp.float32)
        h_last, hs = lax.scan(step, h0, seq)
        return h_last, hs

    hf_last, hf = gru_dir(params["w_ih_f"], params["w_hh_f"],
                          params["b_ih_f"], params["b_hh_f"], xs)
    hb_last, hb_rev = gru_dir(params["w_ih_b"], params["w_hh_b"],
                              params["b_ih_b"], params["b_hh_b"], xs[::-1])
    hb = hb_rev[::-1]
    out = jnp.transpose(jnp.concatenate([hf, hb], axis=-1), (1, 0, 2))   # (B, T, 2H)
    last_hidden = jnp.stack([hf_last, hb_last], axis=0)                  # (2, B, H)

    u = jnp.tanh(out @ params["att_w1"].T + params["att_b1"])
    scores = u @ params["att_w2"].T
    alphas = jax.nn.softmax(scores, axis=1)
    sentence = jnp.sum(alphas * out, axis=1)
    return sentence[None], last_hidden, alphas


if __name__ == "__main__":
    # Small shapes consistent with the module: a minibatch of documents where each
    # "word"-level vector has word_hidden_size features.
    B, T = 2, 8                  # batch of documents, sentences per document
    word_hidden_size = 32        # word-encoder hidden size (GRU input feature dim)
    hidden_size = 32             # sentence-encoder hidden size

    key = jax.random.PRNGKey(0)
    k_x, k_p = jax.random.split(key)
    encoder_output = jax.random.normal(k_x, (B, T, word_hidden_size), jnp.float32)
    hid_state = jnp.zeros((2, B, hidden_size), jnp.float32)  # unused, matches signature

    params = init_params(k_p, word_hidden_size, hidden_size)

    out_attention, (last_hidden, att_weights) = sentence_encoder_forward(
        encoder_output, hid_state, params, hidden_size)
    jax.block_until_ready((out_attention, last_hidden, att_weights))

    assert out_attention.shape == (1, B, 2 * hidden_size)
    assert last_hidden.shape == (2, B, hidden_size)
    assert att_weights.shape == (B, T, 2 * hidden_size)
    assert bool(jnp.all(jnp.isfinite(out_attention)))
    assert bool(jnp.all(jnp.isfinite(last_hidden)))
    assert bool(jnp.all(jnp.isfinite(att_weights)))
    # softmax over the sequence axis must sum to ~1 per (batch, feature)
    assert bool(jnp.allclose(jnp.sum(att_weights, axis=1), 1.0, atol=1e-3))

    # numerical check against a pure-JAX reference of the PyTorch module
    with jax.default_matmul_precision("highest"):
        ref_sent, ref_last, ref_alpha = sentence_encoder_reference(
            encoder_output, params, hidden_size)
        jax.block_until_ready((ref_sent, ref_last, ref_alpha))
    assert bool(jnp.allclose(out_attention, ref_sent, atol=2e-2, rtol=2e-2))
    assert bool(jnp.allclose(last_hidden, ref_last, atol=2e-2, rtol=2e-2))
    assert bool(jnp.allclose(att_weights, ref_alpha, atol=2e-2, rtol=2e-2))

    print("KERNEL_OK")
</pallas_src>

<mosaic_0001>
module attributes {stable_mosaic.version = 11 : i64} {
  func.func @_sentence_encoder_kernel(%arg0: i32, %arg1: memref<8x8x32xf32, #tpu.memory_space<vmem>>, %arg2: memref<32x192xf32, #tpu.memory_space<vmem>>, %arg3: memref<1x192xf32, #tpu.memory_space<vmem>>, %arg4: memref<2x32x96xf32, #tpu.memory_space<vmem>>, %arg5: memref<2x1x32xf32, #tpu.memory_space<vmem>>, %arg6: memref<64x64xf32, #tpu.memory_space<vmem>>, %arg7: memref<1x64xf32, #tpu.memory_space<vmem>>, %arg8: memref<64x64xf32, #tpu.memory_space<vmem>>, %arg9: memref<8x64xf32, #tpu.memory_space<vmem>>, %arg10: memref<2x8x32xf32, #tpu.memory_space<vmem>>, %arg11: memref<8x8x64xf32, #tpu.memory_space<vmem>>, %arg12: memref<8x8x192xf32, #tpu.memory_space<vmem>>, %arg13: memref<8x8x64xf32, #tpu.memory_space<vmem>>) attributes {dimension_semantics = [#tpu.dimension_semantics<parallel>], iteration_bounds = array<i64: 1>, scalar_prefetch = 0 : i64, scratch_operands = 2 : i64, tpu.core_type = #tpu.core_type<tc>, window_params = [{transform_indices = @transform_0, window_bounds = array<i64: 8, 8, 32>}, {pipeline_mode = #tpu.pipeline_mode<synchronous>, transform_indices = @transform_1, window_bounds = array<i64: 32, 192>}, {pipeline_mode = #tpu.pipeline_mode<synchronous>, transform_indices = @transform_2, window_bounds = array<i64: 1, 192>}, {pipeline_mode = #tpu.pipeline_mode<synchronous>, transform_indices = @transform_3, window_bounds = array<i64: 2, 32, 96>}, {pipeline_mode = #tpu.pipeline_mode<synchronous>, transform_indices = @transform_4, window_bounds = array<i64: 2, 1, 32>}, {pipeline_mode = #tpu.pipeline_mode<synchronous>, transform_indices = @transform_5, window_bounds = array<i64: 64, 64>}, {pipeline_mode = #tpu.pipeline_mode<synchronous>, transform_indices = @transform_6, window_bounds = array<i64: 1, 64>}, {pipeline_mode = #tpu.pipeline_mode<synchronous>, transform_indices = @transform_7, window_bounds = array<i64: 64, 64>}, {transform_indices = @transform_8, window_bounds = array<i64: 8, 64>}, {transform_indices = @transform_9, window_bounds = array<i64: 2, 8, 32>}, {transform_indices = @transform_10, window_bounds = array<i64: 8, 8, 64>}]} {
    %c0 = arith.constant 0 : index
    %c0_0 = arith.constant 0 : index
    %c0_1 = arith.constant 0 : index
    %0 = vector.load %arg1[%c0, %c0_0, %c0_1] : memref<8x8x32xf32, #tpu.memory_space<vmem>>, vector<8x8x32xf32>
    %1 = vector.shape_cast %0 : vector<8x8x32xf32> to vector<64x32xf32>
    %c0_2 = arith.constant 0 : index
    %c0_3 = arith.constant 0 : index
    %2 = vector.load %arg2[%c0_2, %c0_3] : memref<32x192xf32, #tpu.memory_space<vmem>>, vector<32x192xf32>
    %cst = arith.constant dense<0.000000e+00> : vector<64x192xf32>
    %3 = tpu.matmul %1, %2, %cst {dimension_numbers = #tpu.dot_dimension_numbers<[1], [0], [0], [1], [0, 0, 1, 1], [], []>} : vector<64x32xf32>, vector<32x192xf32>, vector<64x192xf32> -> vector<64x192xf32>
    %c0_4 = arith.constant 0 : index
    %c0_5 = arith.constant 0 : index
    %4 = vector.load %arg3[%c0_4, %c0_5] : memref<1x192xf32, #tpu.memory_space<vmem>>, vector<1x192xf32>
    %5 = vector.broadcast %4 : vector<1x192xf32> to vector<64x192xf32>
    %6 = arith.addf %3, %5 : vector<64x192xf32>
    %7 = vector.shape_cast %6 : vector<64x192xf32> to vector<8x8x192xf32>
    %c0_6 = arith.constant 0 : index
    %c0_7 = arith.constant 0 : index
    %c0_8 = arith.constant 0 : index
    %8 = vector.load %arg12[%c0_6, %c0_7, %c0_8] : memref<8x8x192xf32, #tpu.memory_space<vmem>>, vector<8x8x192xf32>
    tpu.vector_store %arg12[%c0_6, %c0_7, %c0_8], %7 {strides = array<i32>} : memref<8x8x192xf32, #tpu.memory_space<vmem>>, vector<8x8x192xf32>,
    %c0_9 = arith.constant 0 : index
    %c0_10 = arith.constant 0 : index
    %c0_11 = arith.constant 0 : index
    %9 = vector.load %arg4[%c0_9, %c0_10, %c0_11] : memref<2x32x96xf32, #tpu.memory_space<vmem>>, vector<1x32x96xf32>
    %10 = vector.shape_cast %9 : vector<1x32x96xf32> to vector<32x96xf32>
    %c1 = arith.constant 1 : index
    %c0_12 = arith.constant 0 : index
    %c0_13 = arith.constant 0 : index
    %11 = vector.load %arg4[%c1, %c0_12, %c0_13] : memref<2x32x96xf32, #tpu.memory_space<vmem>>, vector<1x32x96xf32>
    %12 = vector.shape_cast %11 : vector<1x32x96xf32> to vector<32x96xf32>
    %c0_14 = arith.constant 0 : index
    %c0_15 = arith.constant 0 : index
    %c0_16 = arith.constant 0 : index
    %13 = vector.load %arg5[%c0_14, %c0_15, %c0_16] : memref<2x1x32xf32, #tpu.memory_space<vmem>>, vector<1x1x32xf32>
    %14 = vector.shape_cast %13 : vector<1x1x32xf32> to vector<1x32xf32>
    %c1_17 = arith.constant 1 : index
    %c0_18 = arith.constant 0 : index
    %c0_19 = arith.constant 0 : index
    %15 = vector.load %arg5[%c1_17, %c0_18, %c0_19] : memref<2x1x32xf32, #tpu.memory_space<vmem>>, vector<1x1x32xf32>
    %16 = vector.shape_cast %15 : vector<1x1x32xf32> to vector<1x32xf32>
    %cst_20 = arith.constant 0.000000e+00 : f32
    %17 = vector.broadcast %cst_20 : f32 to vector<8x32xf32>
    %c0_i32 = arith.constant 0 : i32
    %c7_i32 = arith.constant 7 : i32
    %18 = arith.subi %c7_i32, %c0_i32 : i32
    %cst_21 = arith.constant dense<0.000000e+00> : vector<8x96xf32>
    %19 = tpu.matmul %17, %10, %cst_21 {dimension_numbers = #tpu.dot_dimension_numbers<[1], [0], [0], [1], [0, 0, 1, 1], [], []>} : vector<8x32xf32>, vector<32x96xf32>, vector<8x96xf32> -> vector<8x96xf32>
    %cst_22 = arith.constant dense<0.000000e+00> : vector<8x96xf32>
    %20 = tpu.matmul %17, %12, %cst_22 {dimension_numbers = #tpu.dot_dimension_numbers<[1], [0], [0], [1], [0, 0, 1, 1], [], []>} : vector<8x32xf32>, vector<32x96xf32>, vector<8x96xf32> -> vector<8x96xf32>
    %21 = arith.index_cast %c0_i32 : i32 to index
    %c0_23 = arith.constant 0 : index
    %c0_24 = arith.constant 0 : index
    %22 = vector.load %arg12[%21, %c0_23, %c0_24] : memref<8x8x192xf32, #tpu.memory_space<vmem>>, vector<1x8x192xf32>
    %23 = vector.shape_cast %22 : vector<1x8x192xf32> to vector<8x192xf32>
    %24 = arith.index_cast %18 : i32 to index
    %c0_25 = arith.constant 0 : index
    %c0_26 = arith.constant 0 : index
    %25 = vector.load %arg12[%24, %c0_25, %c0_26] : memref<8x8x192xf32, #tpu.memory_space<vmem>>, vector<1x8x192xf32>
    %26 = vector.shape_cast %25 : vector<1x8x192xf32> to vector<8x192xf32>
    %27 = vector.extract_strided_slice %23 {offsets = [0, 0], sizes = [8, 64], strides = [1, 1]} : vector<8x192xf32> to vector<8x64xf32>
    %28 = vector.extract_strided_slice %19 {offsets = [0, 0], sizes = [8, 64], strides = [1, 1]} : vector<8x96xf32> to vector<8x64xf32>
    %29 = arith.addf %27, %28 : vector<8x64xf32>
    %30 = arith.negf %29 : vector<8x64xf32>
    %31 = math.exp %30 : vector<8x64xf32>
    %cst_27 = arith.constant 1.000000e+00 : f32
    %32 = vector.broadcast %cst_27 : f32 to vector<8x64xf32>
    %33 = arith.addf %32, %31 : vector<8x64xf32>
    %34 = arith.divf %32, %33 : vector<8x64xf32>
    %35 = vector.extract_strided_slice %23 {offsets = [0, 64], sizes = [8, 32], strides = [1, 1]} : vector<8x192xf32> to vector<8x32xf32>
    %36 = vector.extract_strided_slice %34 {offsets = [0, 0], sizes = [8, 32], strides = [1, 1]} : vector<8x64xf32> to vector<8x32xf32>
    %37 = vector.extract_strided_slice %19 {offsets = [0, 64], sizes = [8, 32], strides = [1, 1]} : vector<8x96xf32> to vector<8x32xf32>
    %38 = vector.broadcast %14 : vector<1x32xf32> to vector<8x32xf32>
    %39 = arith.addf %37, %38 : vector<8x32xf32>
    %40 = arith.mulf %36, %39 : vector<8x32xf32>
    %41 = arith.addf %35, %40 : vector<8x32xf32>
    %42 = math.tanh %41 : vector<8x32xf32>
    %43 = vector.extract_strided_slice %34 {offsets = [0, 32], sizes = [8, 32], strides = [1, 1]} : vector<8x64xf32> to vector<8x32xf32>
    %44 = arith.subf %17, %42 : vector<8x32xf32>
    %45 = arith.mulf %43, %44 : vector<8x32xf32>
    %46 = arith.addf %45, %42 : vector<8x32xf32>
    %47 = vector.extract_strided_slice %26 {offsets = [0, 96], sizes = [8, 64], strides = [1, 1]} : vector<8x192xf32> to vector<8x64xf32>
    %48 = vector.extract_strided_slice %20 {offsets = [0, 0], sizes = [8, 64], strides = [1, 1]} : vector<8x96xf32> to vector<8x64xf32>
    %49 = arith.addf %47, %48 : vector<8x64xf32>
    %50 = arith.negf %49 : vector<8x64xf32>
    %51 = math.exp %50 : vector<8x64xf32>
    %cst_28 = arith.constant 1.000000e+00 : f32
    %52 = vector.broadcast %cst_28 : f32 to vector<8x64xf32>
    %53 = arith.addf %52, %51 : vector<8x64xf32>
    %54 = arith.divf %52, %53 : vector<8x64xf32>
    %55 = vector.extract_strided_slice %26 {offsets = [0, 160], sizes = [8, 32], strides = [1, 1]} : vector<8x192xf32> to vector<8x32xf32>
    %56 = vector.extract_strided_slice %54 {offsets = [0, 0], sizes = [8, 32], strides = [1, 1]} : vector<8x64xf32> to vector<8x32xf32>
    %57 = vector.extract_strided_slice %20 {offsets = [0, 64], sizes = [8, 32], strides = [1, 1]} : vector<8x96xf32> to vector<8x32xf32>
    %58 = vector.broadcast %16 : vector<1x32xf32> to vector<8x32xf32>
    %59 = arith.addf %57, %58 : vector<8x32xf32>
    %60 = arith.mulf %56, %59 : vector<8x32xf32>
    %61 = arith.addf %55, %60 : vector<8x32xf32>
    %62 = math.tanh %61 : vector<8x32xf32>
    %63 = vector.extract_strided_slice %54 {offsets = [0, 32], sizes = [8, 32], strides = [1, 1]} : vector<8x64xf32> to vector<8x32xf32>
    %64 = arith.subf %17, %62 : vector<8x32xf32>
    %65 = arith.mulf %63, %64 : vector<8x32xf32>
    %66 = arith.addf %65, %62 : vector<8x32xf32>
    %67 = arith.index_cast %c0_i32 : i32 to index
    %c0_29 = arith.constant 0 : index
    %c0_30 = arith.constant 0 : index
    %68 = vector.load %arg13[%67, %c0_29, %c0_30] : memref<8x8x64xf32, #tpu.memory_space<vmem>>, vector<1x8x32xf32>
    %69 = vector.shape_cast %68 : vector<1x8x32xf32> to vector<8x32xf32>
    %70 = vector.shape_cast %46 : vector<8x32xf32> to vector<1x8x32xf32>
    tpu.vector_store %arg13[%67, %c0_29, %c0_30], %70 {strides = array<i32>} : memref<8x8x64xf32, #tpu.memory_space<vmem>>, vector<1x8x32xf32>,
    %71 = arith.index_cast %18 : i32 to index
    %c0_31 = arith.constant 0 : index
    %c32 = arith.constant 32 : index
    %72 = vector.load %arg13[%71, %c0_31, %c32] : memref<8x8x64xf32, #tpu.memory_space<vmem>>, vector<1x8x32xf32>
    %73 = vector.shape_cast %72 : vector<1x8x32xf32> to vector<8x32xf32>
    %74 = vector.shape_cast %66 : vector<8x32xf32> to vector<1x8x32xf32>
    tpu.vector_store %arg13[%71, %c0_31, %c32], %74 {strides = array<i32>} : memref<8x8x64xf32, #tpu.memory_space<vmem>>, vector<1x8x32xf32>,
    %c1_i32 = arith.constant 1 : i32
    %c7_i32_32 = arith.constant 7 : i32
    %75 = arith.subi %c7_i32_32, %c1_i32 : i32
    %cst_33 = arith.constant dense<0.000000e+00> : vector<8x96xf32>
    %76 = tpu.matmul %46, %10, %cst_33 {dimension_numbers = #tpu.dot_dimension_numbers<[1], [0], [0], [1], [0, 0, 1, 1], [], []>} : vector<8x32xf32>, vector<32x96xf32>, vector<8x96xf32> -> vector<8x96xf32>
    %cst_34 = arith.constant dense<0.000000e+00> : vector<8x96xf32>
    %77 = tpu.matmul %66, %12, %cst_34 {dimension_numbers = #tpu.dot_dimension_numbers<[1], [0], [0], [1], [0, 0, 1, 1], [], []>} : vector<8x32xf32>, vector<32x96xf32>, vector<8x96xf32> -> vector<8x96xf32>
    %78 = arith.index_cast %c1_i32 : i32 to index
    %c0_35 = arith.constant 0 : index
    %c0_36 = arith.constant 0 : index
    %79 = vector.load %arg12[%78, %c0_35, %c0_36] : memref<8x8x192xf32, #tpu.memory_space<vmem>>, vector<1x8x192xf32>
    %80 = vector.shape_cast %79 : vector<1x8x192xf32> to vector<8x192xf32>
    %81 = arith.index_cast %75 : i32 to index
    %c0_37 = arith.constant 0 : index
    %c0_38 = arith.constant 0 : index
    %82 = vector.load %arg12[%81, %c0_37, %c0_38] : memref<8x8x192xf32, #tpu.memory_space<vmem>>, vector<1x8x192xf32>
    %83 = vector.shape_cast %82 : vector<1x8x192xf32> to vector<8x192xf32>
    %84 = vector.extract_strided_slice %80 {offsets = [0, 0], sizes = [8, 64], strides = [1, 1]} : vector<8x192xf32> to vector<8x64xf32>
    %85 = vector.extract_strided_slice %76 {offsets = [0, 0], sizes = [8, 64], strides = [1, 1]} : vector<8x96xf32> to vector<8x64xf32>
    %86 = arith.addf %84, %85 : vector<8x64xf32>
    %87 = arith.negf %86 : vector<8x64xf32>
    %88 = math.exp %87 : vector<8x64xf32>
    %cst_39 = arith.constant 1.000000e+00 : f32
    %89 = vector.broadcast %cst_39 : f32 to vector<8x64xf32>
    %90 = arith.addf %89, %88 : vector<8x64xf32>
    %91 = arith.divf %89, %90 : vector<8x64xf32>
    %92 = vector.extract_strided_slice %80 {offsets = [0, 64], sizes = [8, 32], strides = [1, 1]} : vector<8x192xf32> to vector<8x32xf32>
    %93 = vector.extract_strided_slice %91 {offsets = [0, 0], sizes = [8, 32], strides = [1, 1]} : vector<8x64xf32> to vector<8x32xf32>
    %94 = vector.extract_strided_slice %76 {offsets = [0, 64], sizes = [8, 32], strides = [1, 1]} : vector<8x96xf32> to vector<8x32xf32>
    %95 = vector.broadcast %14 : vector<1x32xf32> to vector<8x32xf32>
    %96 = arith.addf %94, %95 : vector<8x32xf32>
    %97 = arith.mulf %93, %96 : vector<8x32xf32>
    %98 = arith.addf %92, %97 : vector<8x32xf32>
    %99 = math.tanh %98 : vector<8x32xf32>
    %100 = vector.extract_strided_slice %91 {offsets = [0, 32], sizes = [8, 32], strides = [1, 1]} : vector<8x64xf32> to vector<8x32xf32>
    %101 = arith.subf %46, %99 : vector<8x32xf32>
    %102 = arith.mulf %100, %101 : vector<8x32xf32>
    %103 = arith.addf %102, %99 : vector<8x32xf32>
    %104 = vector.extract_strided_slice %83 {offsets = [0, 96], sizes = [8, 64], strides = [1, 1]} : vector<8x192xf32> to vector<8x64xf32>
    %105 = vector.extract_strided_slice %77 {offsets = [0, 0], sizes = [8, 64], strides = [1, 1]} : vector<8x96xf32> to vector<8x64xf32>
    %106 = arith.addf %104, %105 : vector<8x64xf32>
    %107 = arith.negf %106 : vector<8x64xf32>
    %108 = math.exp %107 : vector<8x64xf32>
    %cst_40 = arith.constant 1.000000e+00 : f32
    %109 = vector.broadcast %cst_40 : f32 to vector<8x64xf32>
    %110 = arith.addf %109, %108 : vector<8x64xf32>
    %111 = arith.divf %109, %110 : vector<8x64xf32>
    %112 = vector.extract_strided_slice %83 {offsets = [0, 160], sizes = [8, 32], strides = [1, 1]} : vector<8x192xf32> to vector<8x32xf32>
    %113 = vector.extract_strided_slice %111 {offsets = [0, 0], sizes = [8, 32], strides = [1, 1]} : vector<8x64xf32> to vector<8x32xf32>
    %114 = vector.extract_strided_slice %77 {offsets = [0, 64], sizes = [8, 32], strides = [1, 1]} : vector<8x96xf32> to vector<8x32xf32>
    %115 = vector.broadcast %16 : vector<1x32xf32> to vector<8x32xf32>
    %116 = arith.addf %114, %115 : vector<8x32xf32>
    %117 = arith.mulf %113, %116 : vector<8x32xf32>
    %118 = arith.addf %112, %117 : vector<8x32xf32>
    %119 = math.tanh %118 : vector<8x32xf32>
    %120 = vector.extract_strided_slice %111 {offsets = [0, 32], sizes = [8, 32], strides = [1, 1]} : vector<8x64xf32> to vector<8x32xf32>
    %121 = arith.subf %66, %119 : vector<8x32xf32>
    %122 = arith.mulf %120, %121 : vector<8x32xf32>
    %123 = arith.addf %122, %119 : vector<8x32xf32>
    %124 = arith.index_cast %c1_i32 : i32 to index
    %c0_41 = arith.constant 0 : index
    %c0_42 = arith.constant 0 : index
    %125 = vector.load %arg13[%124, %c0_41, %c0_42] : memref<8x8x64xf32, #tpu.memory_space<vmem>>, vector<1x8x32xf32>
    %126 = vector.shape_cast %125 : vector<1x8x32xf32> to vector<8x32xf32>
    %127 = vector.shape_cast %103 : vector<8x32xf32> to vector<1x8x32xf32>
    tpu.vector_store %arg13[%124, %c0_41, %c0_42], %127 {strides = array<i32>} : memref<8x8x64xf32, #tpu.memory_space<vmem>>, vector<1x8x32xf32>,
    %128 = arith.index_cast %75 : i32 to index
    %c0_43 = arith.constant 0 : index
    %c32_44 = arith.constant 32 : index
    %129 = vector.load %arg13[%128, %c0_43, %c32_44] : memref<8x8x64xf32, #tpu.memory_space<vmem>>, vector<1x8x32xf32>
    %130 = vector.shape_cast %129 : vector<1x8x32xf32> to vector<8x32xf32>
    %131 = vector.shape_cast %123 : vector<8x32xf32> to vector<1x8x32xf32>
    tpu.vector_store %arg13[%128, %c0_43, %c32_44], %131 {strides = array<i32>} : memref<8x8x64xf32, #tpu.memory_space<vmem>>, vector<1x8x32xf32>,
    %c2_i32 = arith.constant 2 : i32
    %c7_i32_45 = arith.constant 7 : i32
    %132 = arith.subi %c7_i32_45, %c2_i32 : i32
    %cst_46 = arith.constant dense<0.000000e+00> : vector<8x96xf32>
    %133 = tpu.matmul %103, %10, %cst_46 {dimension_numbers = #tpu.dot_dimension_numbers<[1], [0], [0], [1], [0, 0, 1, 1], [], []>} : vector<8x32xf32>, vector<32x96xf32>, vector<8x96xf32> -> vector<8x96xf32>
    %cst_47 = arith.constant dense<0.000000e+00> : vector<8x96xf32>
    %134 = tpu.matmul %123, %12, %cst_47 {dimension_numbers = #tpu.dot_dimension_numbers<[1], [0], [0], [1], [0, 0, 1, 1], [], []>} : vector<8x32xf32>, vector<32x96xf32>, vector<8x96xf32> -> vector<8x96xf32>
    %135 = arith.index_cast %c2_i32 : i32 to index
    %c0_48 = arith.constant 0 : index
    %c0_49 = arith.constant 0 : index
    %136 = vector.load %arg12[%135, %c0_48, %c0_49] : memref<8x8x192xf32, #tpu.memory_space<vmem>>, vector<1x8x192xf32>
    %137 = vector.shape_cast %136 : vector<1x8x192xf32> to vector<8x192xf32>
    %138 = arith.index_cast %132 : i32 to index
    %c0_50 = arith.constant 0 : index
    %c0_51 = arith.constant 0 : index
    %139 = vector.load %arg12[%138, %c0_50, %c0_51] : memref<8x8x192xf32, #tpu.memory_space<vmem>>, vector<1x8x192xf32>
    %140 = vector.shape_cast %139 : vector<1x8x192xf32> to vector<8x192xf32>
    %141 = vector.extract_strided_slice %137 {offsets = [0, 0], sizes = [8, 64], strides = [1, 1]} : vector<8x192xf32> to vector<8x64xf32>
    %142 = vector.extract_strided_slice %133 {offsets = [0, 0], sizes = [8, 64], strides = [1, 1]} : vector<8x96xf32> to vector<8x64xf32>
    %143 = arith.addf %141, %142 : vector<8x64xf32>
    %144 = arith.negf %143 : vector<8x64xf32>
    %145 = math.exp %144 : vector<8x64xf32>
    %cst_52 = arith.constant 1.000000e+00 : f32
    %146 = vector.broadcast %cst_52 : f32 to vector<8x64xf32>
    %147 = arith.addf %146, %145 : vector<8x64xf32>
    %148 = arith.divf %146, %147 : vector<8x64xf32>
    %149 = vector.extract_strided_slice %137 {offsets = [0, 64], sizes = [8, 32], strides = [1, 1]} : vector<8x192xf32> to vector<8x32xf32>
    %150 = vector.extract_strided_slice %148 {offsets = [0, 0], sizes = [8, 32], strides = [1, 1]} : vector<8x64xf32> to vector<8x32xf32>
    %151 = vector.extract_strided_slice %133 {offsets = [0, 64], sizes = [8, 32], strides = [1, 1]} : vector<8x96xf32> to vector<8x32xf32>
    %152 = vector.broadcast %14 : vector<1x32xf32> to vector<8x32xf32>
    %153 = arith.addf %151, %152 : vector<8x32xf32>
    %154 = arith.mulf %150, %153 : vector<8x32xf32>
    %155 = arith.addf %149, %154 : vector<8x32xf32>
    %156 = math.tanh %155 : vector<8x32xf32>
    %157 = vector.extract_strided_slice %148 {offsets = [0, 32], sizes = [8, 32], strides = [1, 1]} : vector<8x64xf32> to vector<8x32xf32>
    %158 = arith.subf %103, %156 : vector<8x32xf32>
    %159 = arith.mulf %157, %158 : vector<8x32xf32>
    %160 = arith.addf %159, %156 : vector<8x32xf32>
    %161 = vector.extract_strided_slice %140 {offsets = [0, 96], sizes = [8, 64], strides = [1, 1]} : vector<8x192xf32> to vector<8x64xf32>
    %162 = vector.extract_strided_slice %134 {offsets = [0, 0], sizes = [8, 64], strides = [1, 1]} : vector<8x96xf32> to vector<8x64xf32>
    %163 = arith.addf %161, %162 : vector<8x64xf32>
    %164 = arith.negf %163 : vector<8x64xf32>
    %165 = math.exp %164 : vector<8x64xf32>
    %cst_53 = arith.constant 1.000000e+00 : f32
    %166 = vector.broadcast %cst_53 : f32 to vector<8x64xf32>
    %167 = arith.addf %166, %165 : vector<8x64xf32>
    %168 = arith.divf %166, %167 : vector<8x64xf32>
    %169 = vector.extract_strided_slice %140 {offsets = [0, 160], sizes = [8, 32], strides = [1, 1]} : vector<8x192xf32> to vector<8x32xf32>
    %170 = vector.extract_strided_slice %168 {offsets = [0, 0], sizes = [8, 32], strides = [1, 1]} : vector<8x64xf32> to vector<8x32xf32>
    %171 = vector.extract_strided_slice %134 {offsets = [0, 64], sizes = [8, 32], strides = [1, 1]} : vector<8x96xf32> to vector<8x32xf32>
    %172 = vector.broadcast %16 : vector<1x32xf32> to vector<8x32xf32>
    %173 = arith.addf %171, %172 : vector<8x32xf32>
    %174 = arith.mulf %170, %173 : vector<8x32xf32>
    %175 = arith.addf %169, %174 : vector<8x32xf32>
    %176 = math.tanh %175 : vector<8x32xf32>
    %177 = vector.extract_strided_slice %168 {offsets = [0, 32], sizes = [8, 32], strides = [1, 1]} : vector<8x64xf32> to vector<8x32xf32>
    %178 = arith.subf %123, %176 : vector<8x32xf32>
    %179 = arith.mulf %177, %178 : vector<8x32xf32>
    %180 = arith.addf %179, %176 : vector<8x32xf32>
    %181 = arith.index_cast %c2_i32 : i32 to index
    %c0_54 = arith.constant 0 : index
    %c0_55 = arith.constant 0 : index
    %182 = vector.load %arg13[%181, %c0_54, %c0_55] : memref<8x8x64xf32, #tpu.memory_space<vmem>>, vector<1x8x32xf32>
    %183 = vector.shape_cast %182 : vector<1x8x32xf32> to vector<8x32xf32>
    %184 = vector.shape_cast %160 : vector<8x32xf32> to vector<1x8x32xf32>
    tpu.vector_store %arg13[%181, %c0_54, %c0_55], %184 {strides = array<i32>} : memref<8x8x64xf32, #tpu.memory_space<vmem>>, vector<1x8x32xf32>,
    %185 = arith.index_cast %132 : i32 to index
    %c0_56 = arith.constant 0 : index
    %c32_57 = arith.constant 32 : index
    %186 = vector.load %arg13[%185, %c0_56, %c32_57] : memref<8x8x64xf32, #tpu.memory_space<vmem>>, vector<1x8x32xf32>
    %187 = vector.shape_cast %186 : vector<1x8x32xf32> to vector<8x32xf32>
    %188 = vector.shape_cast %180 : vector<8x32xf32> to vector<1x8x32xf32>
    tpu.vector_store %arg13[%185, %c0_56, %c32_57], %188 {strides = array<i32>} : memref<8x8x64xf32, #tpu.memory_space<vmem>>, vector<1x8x32xf32>,
    %c3_i32 = arith.constant 3 : i32
    %c7_i32_58 = arith.constant 7 : i32
    %189 = arith.subi %c7_i32_58, %c3_i32 : i32
    %cst_59 = arith.constant dense<0.000000e+00> : vector<8x96xf32>
    %190 = tpu.matmul %160, %10, %cst_59 {dimension_numbers = #tpu.dot_dimension_numbers<[1], [0], [0], [1], [0, 0, 1, 1], [], []>} : vector<8x32xf32>, vector<32x96xf32>, vector<8x96xf32> -> vector<8x96xf32>
    %cst_60 = arith.constant dense<0.000000e+00> : vector<8x96xf32>
    %191 = tpu.matmul %180, %12, %cst_60 {dimension_numbers = #tpu.dot_dimension_numbers<[1], [0], [0], [1], [0, 0, 1, 1], [], []>} : vector<8x32xf32>, vector<32x96xf32>, vector<8x96xf32> -> vector<8x96xf32>
    %192 = arith.index_cast %c3_i32 : i32 to index
    %c0_61 = arith.constant 0 : index
    %c0_62 = arith.constant 0 : index
    %193 = vector.load %arg12[%192, %c0_61, %c0_62] : memref<8x8x192xf32, #tpu.memory_space<vmem>>, vector<1x8x192xf32>
    %194 = vector.shape_cast %193 : vector<1x8x192xf32> to vector<8x192xf32>
    %195 = arith.index_cast %189 : i32 to index
    %c0_63 = arith.constant 0 : index
    %c0_64 = arith.constant 0 : index
    %196 = vector.load %arg12[%195, %c0_63, %c0_64] : memref<8x8x192xf32, #tpu.memory_space<vmem>>, vector<1x8x192xf32>
    %197 = vector.shape_cast %196 : vector<1x8x192xf32> to vector<8x192xf32>
    %198 = vector.extract_strided_slice %194 {offsets = [0, 0], sizes = [8, 64], strides = [1, 1]} : vector<8x192xf32> to vector<8x64xf32>
    %199 = vector.extract_strided_slice %190 {offsets = [0, 0], sizes = [8, 64], strides = [1, 1]} : vector<8x96xf32> to vector<8x64xf32>
    %200 = arith.addf %198, %199 : vector<8x64xf32>
    %201 = arith.negf %200 : vector<8x64xf32>
    %202 = math.exp %201 : vector<8x64xf32>
    %cst_65 = arith.constant 1.000000e+00 : f32
    %203 = vector.broadcast %cst_65 : f32 to vector<8x64xf32>
    %204 = arith.addf %203, %202 : vector<8x64xf32>
    %205 = arith.divf %203, %204 : vector<8x64xf32>
    %206 = vector.extract_strided_slice %194 {offsets = [0, 64], sizes = [8, 32], strides = [1, 1]} : vector<8x192xf32> to vector<8x32xf32>
    %207 = vector.extract_strided_slice %205 {offsets = [0, 0], sizes = [8, 32], strides = [1, 1]} : vector<8x64xf32> to vector<8x32xf32>
    %208 = vector.extract_strided_slice %190 {offsets = [0, 64], sizes = [8, 32], strides = [1, 1]} : vector<8x96xf32> to vector<8x32xf32>
    %209 = vector.broadcast %14 : vector<1x32xf32> to vector<8x32xf32>
    %210 = arith.addf %208, %209 : vector<8x32xf32>
    %211 = arith.mulf %207, %210 : vector<8x32xf32>
    %212 = arith.addf %206, %211 : vector<8x32xf32>
    %213 = math.tanh %212 : vector<8x32xf32>
    %214 = vector.extract_strided_slice %205 {offsets = [0, 32], sizes = [8, 32], strides = [1, 1]} : vector<8x64xf32> to vector<8x32xf32>
    %215 = arith.subf %160, %213 : vector<8x32xf32>
    %216 = arith.mulf %214, %215 : vector<8x32xf32>
    %217 = arith.addf %216, %213 : vector<8x32xf32>
    %218 = vector.extract_strided_slice %197 {offsets = [0, 96], sizes = [8, 64], strides = [1, 1]} : vector<8x192xf32> to vector<8x64xf32>
    %219 = vector.extract_strided_slice %191 {offsets = [0, 0], sizes = [8, 64], strides = [1, 1]} : vector<8x96xf32> to vector<8x64xf32>
    %220 = arith.addf %218, %219 : vector<8x64xf32>
    %221 = arith.negf %220 : vector<8x64xf32>
    %222 = math.exp %221 : vector<8x64xf32>
    %cst_66 = arith.constant 1.000000e+00 : f32
    %223 = vector.broadcast %cst_66 : f32 to vector<8x64xf32>
    %224 = arith.addf %223, %222 : vector<8x64xf32>
    %225 = arith.divf %223, %224 : vector<8x64xf32>
    %226 = vector.extract_strided_slice %197 {offsets = [0, 160], sizes = [8, 32], strides = [1, 1]} : vector<8x192xf32> to vector<8x32xf32>
    %227 = vector.extract_strided_slice %225 {offsets = [0, 0], sizes = [8, 32], strides = [1, 1]} : vector<8x64xf32> to vector<8x32xf32>
    %228 = vector.extract_strided_slice %191 {offsets = [0, 64], sizes = [8, 32], strides = [1, 1]} : vector<8x96xf32> to vector<8x32xf32>
    %229 = vector.broadcast %16 : vector<1x32xf32> to vector<8x32xf32>
    %230 = arith.addf %228, %229 : vector<8x32xf32>
    %231 = arith.mulf %227, %230 : vector<8x32xf32>
    %232 = arith.addf %226, %231 : vector<8x32xf32>
    %233 = math.tanh %232 : vector<8x32xf32>
    %234 = vector.extract_strided_slice %225 {offsets = [0, 32], sizes = [8, 32], strides = [1, 1]} : vector<8x64xf32> to vector<8x32xf32>
    %235 = arith.subf %180, %233 : vector<8x32xf32>
    %236 = arith.mulf %234, %235 : vector<8x32xf32>
    %237 = arith.addf %236, %233 : vector<8x32xf32>
    %238 = arith.index_cast %c3_i32 : i32 to index
    %c0_67 = arith.constant 0 : index
    %c0_68 = arith.constant 0 : index
    %239 = vector.load %arg13[%238, %c0_67, %c0_68] : memref<8x8x64xf32, #tpu.memory_space<vmem>>, vector<1x8x32xf32>
    %240 = vector.shape_cast %239 : vector<1x8x32xf32> to vector<8x32xf32>
    %241 = vector.shape_cast %217 : vector<8x32xf32> to vector<1x8x32xf32>
    tpu.vector_store %arg13[%238, %c0_67, %c0_68], %241 {strides = array<i32>} : memref<8x8x64xf32, #tpu.memory_space<vmem>>, vector<1x8x32xf32>,
    %242 = arith.index_cast %189 : i32 to index
    %c0_69 = arith.constant 0 : index
    %c32_70 = arith.constant 32 : index
    %243 = vector.load %arg13[%242, %c0_69, %c32_70] : memref<8x8x64xf32, #tpu.memory_space<vmem>>, vector<1x8x32xf32>
    %244 = vector.shape_cast %243 : vector<1x8x32xf32> to vector<8x32xf32>
    %245 = vector.shape_cast %237 : vector<8x32xf32> to vector<1x8x32xf32>
    tpu.vector_store %arg13[%242, %c0_69, %c32_70], %245 {strides = array<i32>} : memref<8x8x64xf32, #tpu.memory_space<vmem>>, vector<1x8x32xf32>,
    %c4_i32 = arith.constant 4 : i32
    %c7_i32_71 = arith.constant 7 : i32
    %246 = arith.subi %c7_i32_71, %c4_i32 : i32
    %cst_72 = arith.constant dense<0.000000e+00> : vector<8x96xf32>
    %247 = tpu.matmul %217, %10, %cst_72 {dimension_numbers = #tpu.dot_dimension_numbers<[1], [0], [0], [1], [0, 0, 1, 1], [], []>} : vector<8x32xf32>, vector<32x96xf32>, vector<8x96xf32> -> vector<8x96xf32>
    %cst_73 = arith.constant dense<0.000000e+00> : vector<8x96xf32>
    %248 = tpu.matmul %237, %12, %cst_73 {dimension_numbers = #tpu.dot_dimension_numbers<[1], [0], [0], [1], [0, 0, 1, 1], [], []>} : vector<8x32xf32>, vector<32x96xf32>, vector<8x96xf32> -> vector<8x96xf32>
    %249 = arith.index_cast %c4_i32 : i32 to index
    %c0_74 = arith.constant 0 : index
    %c0_75 = arith.constant 0 : index
    %250 = vector.load %arg12[%249, %c0_74, %c0_75] : memref<8x8x192xf32, #tpu.memory_space<vmem>>, vector<1x8x192xf32>
    %251 = vector.shape_cast %250 : vector<1x8x192xf32> to vector<8x192xf32>
    %252 = arith.index_cast %246 : i32 to index
    %c0_76 = arith.constant 0 : index
    %c0_77 = arith.constant 0 : index
    %253 = vector.load %arg12[%252, %c0_76, %c0_77] : memref<8x8x192xf32, #tpu.memory_space<vmem>>, vector<1x8x192xf32>
    %254 = vector.shape_cast %253 : vector<1x8x192xf32> to vector<8x192xf32>
    %255 = vector.extract_strided_slice %251 {offsets = [0, 0], sizes = [8, 64], strides = [1, 1]} : vector<8x192xf32> to vector<8x64xf32>
    %256 = vector.extract_strided_slice %247 {offsets = [0, 0], sizes = [8, 64], strides = [1, 1]} : vector<8x96xf32> to vector<8x64xf32>
    %257 = arith.addf %255, %256 : vector<8x64xf32>
    %258 = arith.negf %257 : vector<8x64xf32>
    %259 = math.exp %258 : vector<8x64xf32>
    %cst_78 = arith.constant 1.000000e+00 : f32
    %260 = vector.broadcast %cst_78 : f32 to vector<8x64xf32>
    %261 = arith.addf %260, %259 : vector<8x64xf32>
    %262 = arith.divf %260, %261 : vector<8x64xf32>
    %263 = vector.extract_strided_slice %251 {offsets = [0, 64], sizes = [8, 32], strides = [1, 1]} : vector<8x192xf32> to vector<8x32xf32>
    %264 = vector.extract_strided_slice %262 {offsets = [0, 0], sizes = [8, 32], strides = [1, 1]} : vector<8x64xf32> to vector<8x32xf32>
    %265 = vector.extract_strided_slice %247 {offsets = [0, 64], sizes = [8, 32], strides = [1, 1]} : vector<8x96xf32> to vector<8x32xf32>
    %266 = vector.broadcast %14 : vector<1x32xf32> to vector<8x32xf32>
    %267 = arith.addf %265, %266 : vector<8x32xf32>
    %268 = arith.mulf %264, %267 : vector<8x32xf32>
    %269 = arith.addf %263, %268 : vector<8x32xf32>
    %270 = math.tanh %269 : vector<8x32xf32>
    %271 = vector.extract_strided_slice %262 {offsets = [0, 32], sizes = [8, 32], strides = [1, 1]} : vector<8x64xf32> to vector<8x32xf32>
    %272 = arith.subf %217, %270 : vector<8x32xf32>
    %273 = arith.mulf %271, %272 : vector<8x32xf32>
    %274 = arith.addf %273, %270 : vector<8x32xf32>
    %275 = vector.extract_strided_slice %254 {offsets = [0, 96], sizes = [8, 64], strides = [1, 1]} : vector<8x192xf32> to vector<8x64xf32>
    %276 = vector.extract_strided_slice %248 {offsets = [0, 0], sizes = [8, 64], strides = [1, 1]} : vector<8x96xf32> to vector<8x64xf32>
    %277 = arith.addf %275, %276 : vector<8x64xf32>
    %278 = arith.negf %277 : vector<8x64xf32>
    %279 = math.exp %278 : vector<8x64xf32>
    %cst_79 = arith.constant 1.000000e+00 : f32
    %280 = vector.broadcast %cst_79 : f32 to vector<8x64xf32>
    %281 = arith.addf %280, %279 : vector<8x64xf32>
    %282 = arith.divf %280, %281 : vector<8x64xf32>
    %283 = vector.extract_strided_slice %254 {offsets = [0, 160], sizes = [8, 32], strides = [1, 1]} : vector<8x192xf32> to vector<8x32xf32>
    %284 = vector.extract_strided_slice %282 {offsets = [0, 0], sizes = [8, 32], strides = [1, 1]} : vector<8x64xf32> to vector<8x32xf32>
    %285 = vector.extract_strided_slice %248 {offsets = [0, 64], sizes = [8, 32], strides = [1, 1]} : vector<8x96xf32> to vector<8x32xf32>
    %286 = vector.broadcast %16 : vector<1x32xf32> to vector<8x32xf32>
    %287 = arith.addf %285, %286 : vector<8x32xf32>
    %288 = arith.mulf %284, %287 : vector<8x32xf32>
    %289 = arith.addf %283, %288 : vector<8x32xf32>
    %290 = math.tanh %289 : vector<8x32xf32>
    %291 = vector.extract_strided_slice %282 {offsets = [0, 32], sizes = [8, 32], strides = [1, 1]} : vector<8x64xf32> to vector<8x32xf32>
    %292 = arith.subf %237, %290 : vector<8x32xf32>
    %293 = arith.mulf %291, %292 : vector<8x32xf32>
    %294 = arith.addf %293, %290 : vector<8x32xf32>
    %295 = arith.index_cast %c4_i32 : i32 to index
    %c0_80 = arith.constant 0 : index
    %c0_81 = arith.constant 0 : index
    %296 = vector.load %arg13[%295, %c0_80, %c0_81] : memref<8x8x64xf32, #tpu.memory_space<vmem>>, vector<1x8x32xf32>
    %297 = vector.shape_cast %296 : vector<1x8x32xf32> to vector<8x32xf32>
    %298 = vector.shape_cast %274 : vector<8x32xf32> to vector<1x8x32xf32>
    tpu.vector_store %arg13[%295, %c0_80, %c0_81], %298 {strides = array<i32>} : memref<8x8x64xf32, #tpu.memory_space<vmem>>, vector<1x8x32xf32>,
    %299 = arith.index_cast %246 : i32 to index
    %c0_82 = arith.constant 0 : index
    %c32_83 = arith.constant 32 : index
    %300 = vector.load %arg13[%299, %c0_82, %c32_83] : memref<8x8x64xf32, #tpu.memory_space<vmem>>, vector<1x8x32xf32>
    %301 = vector.shape_cast %300 : vector<1x8x32xf32> to vector<8x32xf32>
    %302 = vector.shape_cast %294 : vector<8x32xf32> to vector<1x8x32xf32>
    tpu.vector_store %arg13[%299, %c0_82, %c32_83], %302 {strides = array<i32>} : memref<8x8x64xf32, #tpu.memory_space<vmem>>, vector<1x8x32xf32>,
    %c5_i32 = arith.constant 5 : i32
    %c7_i32_84 = arith.constant 7 : i32
    %303 = arith.subi %c7_i32_84, %c5_i32 : i32
    %cst_85 = arith.constant dense<0.000000e+00> : vector<8x96xf32>
    %304 = tpu.matmul %274, %10, %cst_85 {dimension_numbers = #tpu.dot_dimension_numbers<[1], [0], [0], [1], [0, 0, 1, 1], [], []>} : vector<8x32xf32>, vector<32x96xf32>, vector<8x96xf32> -> vector<8x96xf32>
    %cst_86 = arith.constant dense<0.000000e+00> : vector<8x96xf32>
    %305 = tpu.matmul %294, %12, %cst_86 {dimension_numbers = #tpu.dot_dimension_numbers<[1], [0], [0], [1], [0, 0, 1, 1], [], []>} : vector<8x32xf32>, vector<32x96xf32>, vector<8x96xf32> -> vector<8x96xf32>
    %306 = arith.index_cast %c5_i32 : i32 to index
    %c0_87 = arith.constant 0 : index
    %c0_88 = arith.constant 0 : index
    %307 = vector.load %arg12[%306, %c0_87, %c0_88] : memref<8x8x192xf32, #tpu.memory_space<vmem>>, vector<1x8x192xf32>
    %308 = vector.shape_cast %307 : vector<1x8x192xf32> to vector<8x192xf32>
    %309 = arith.index_cast %303 : i32 to index
    %c0_89 = arith.constant 0 : index
    %c0_90 = arith.constant 0 : index
    %310 = vector.load %arg12[%309, %c0_89, %c0_90] : memref<8x8x192xf32, #tpu.memory_space<vmem>>, vector<1x8x192xf32>
    %311 = vector.shape_cast %310 : vector<1x8x192xf32> to vector<8x192xf32>
    %312 = vector.extract_strided_slice %308 {offsets = [0, 0], sizes = [8, 64], strides = [1, 1]} : vector<8x192xf32> to vector<8x64xf32>
    %313 = vector.extract_strided_slice %304 {offsets = [0, 0], sizes = [8, 64], strides = [1, 1]} : vector<8x96xf32> to vector<8x64xf32>
    %314 = arith.addf %312, %313 : vector<8x64xf32>
    %315 = arith.negf %314 : vector<8x64xf32>
    %316 = math.exp %315 : vector<8x64xf32>
    %cst_91 = arith.constant 1.000000e+00 : f32
    %317 = vector.broadcast %cst_91 : f32 to vector<8x64xf32>
    %318 = arith.addf %317, %316 : vector<8x64xf32>
    %319 = arith.divf %317, %318 : vector<8x64xf32>
    %320 = vector.extract_strided_slice %308 {offsets = [0, 64], sizes = [8, 32], strides = [1, 1]} : vector<8x192xf32> to vector<8x32xf32>
    %321 = vector.extract_strided_slice %319 {offsets = [0, 0], sizes = [8, 32], strides = [1, 1]} : vector<8x64xf32> to vector<8x32xf32>
    %322 = vector.extract_strided_slice %304 {offsets = [0, 64], sizes = [8, 32], strides = [1, 1]} : vector<8x96xf32> to vector<8x32xf32>
    %323 = vector.broadcast %14 : vector<1x32xf32> to vector<8x32xf32>
    %324 = arith.addf %322, %323 : vector<8x32xf32>
    %325 = arith.mulf %321, %324 : vector<8x32xf32>
    %326 = arith.addf %320, %325 : vector<8x32xf32>
    %327 = math.tanh %326 : vector<8x32xf32>
    %328 = vector.extract_strided_slice %319 {offsets = [0, 32], sizes = [8, 32], strides = [1, 1]} : vector<8x64xf32> to vector<8x32xf32>
    %329 = arith.subf %274, %327 : vector<8x32xf32>
    %330 = arith.mulf %328, %329 : vector<8x32xf32>
    %331 = arith.addf %330, %327 : vector<8x32xf32>
    %332 = vector.extract_strided_slice %311 {offsets = [0, 96], sizes = [8, 64], strides = [1, 1]} : vector<8x192xf32> to vector<8x64xf32>
    %333 = vector.extract_strided_slice %305 {offsets = [0, 0], sizes = [8, 64], strides = [1, 1]} : vector<8x96xf32> to vector<8x64xf32>
    %334 = arith.addf %332, %333 : vector<8x64xf32>
    %335 = arith.negf %334 : vector<8x64xf32>
    %336 = math.exp %335 : vector<8x64xf32>
    %cst_92 = arith.constant 1.000000e+00 : f32
    %337 = vector.broadcast %cst_92 : f32 to vector<8x64xf32>
    %338 = arith.addf %337, %336 : vector<8x64xf32>
    %339 = arith.divf %337, %338 : vector<8x64xf32>
    %340 = vector.extract_strided_slice %311 {offsets = [0, 160], sizes = [8, 32], strides = [1, 1]} : vector<8x192xf32> to vector<8x32xf32>
    %341 = vector.extract_strided_slice %339 {offsets = [0, 0], sizes = [8, 32], strides = [1, 1]} : vector<8x64xf32> to vector<8x32xf32>
    %342 = vector.extract_strided_slice %305 {offsets = [0, 64], sizes = [8, 32], strides = [1, 1]} : vector<8x96xf32> to vector<8x32xf32>
    %343 = vector.broadcast %16 : vector<1x32xf32> to vector<8x32xf32>
    %344 = arith.addf %342, %343 : vector<8x32xf32>
    %345 = arith.mulf %341, %344 : vector<8x32xf32>
    %346 = arith.addf %340, %345 : vector<8x32xf32>
    %347 = math.tanh %346 : vector<8x32xf32>
    %348 = vector.extract_strided_slice %339 {offsets = [0, 32], sizes = [8, 32], strides = [1, 1]} : vector<8x64xf32> to vector<8x32xf32>
    %349 = arith.subf %294, %347 : vector<8x32xf32>
    %350 = arith.mulf %348, %349 : vector<8x32xf32>
    %351 = arith.addf %350, %347 : vector<8x32xf32>
    %352 = arith.index_cast %c5_i32 : i32 to index
    %c0_93 = arith.constant 0 : index
    %c0_94 = arith.constant 0 : index
    %353 = vector.load %arg13[%352, %c0_93, %c0_94] : memref<8x8x64xf32, #tpu.memory_space<vmem>>, vector<1x8x32xf32>
    %354 = vector.shape_cast %353 : vector<1x8x32xf32> to vector<8x32xf32>
    %355 = vector.shape_cast %331 : vector<8x32xf32> to vector<1x8x32xf32>
    tpu.vector_store %arg13[%352, %c0_93, %c0_94], %355 {strides = array<i32>} : memref<8x8x64xf32, #tpu.memory_space<vmem>>, vector<1x8x32xf32>,
    %356 = arith.index_cast %303 : i32 to index
    %c0_95 = arith.constant 0 : index
    %c32_96 = arith.constant 32 : index
    %357 = vector.load %arg13[%356, %c0_95, %c32_96] : memref<8x8x64xf32, #tpu.memory_space<vmem>>, vector<1x8x32xf32>
    %358 = vector.shape_cast %357 : vector<1x8x32xf32> to vector<8x32xf32>
    %359 = vector.shape_cast %351 : vector<8x32xf32> to vector<1x8x32xf32>
    tpu.vector_store %arg13[%356, %c0_95, %c32_96], %359 {strides = array<i32>} : memref<8x8x64xf32, #tpu.memory_space<vmem>>, vector<1x8x32xf32>,
    %c6_i32 = arith.constant 6 : i32
    %c7_i32_97 = arith.constant 7 : i32
    %360 = arith.subi %c7_i32_97, %c6_i32 : i32
    %cst_98 = arith.constant dense<0.000000e+00> : vector<8x96xf32>
    %361 = tpu.matmul %331, %10, %cst_98 {dimension_numbers = #tpu.dot_dimension_numbers<[1], [0], [0], [1], [0, 0, 1, 1], [], []>} : vector<8x32xf32>, vector<32x96xf32>, vector<8x96xf32> -> vector<8x96xf32>
    %cst_99 = arith.constant dense<0.000000e+00> : vector<8x96xf32>
    %362 = tpu.matmul %351, %12, %cst_99 {dimension_numbers = #tpu.dot_dimension_numbers<[1], [0], [0], [1], [0, 0, 1, 1], [], []>} : vector<8x32xf32>, vector<32x96xf32>, vector<8x96xf32> -> vector<8x96xf32>
    %363 = arith.index_cast %c6_i32 : i32 to index
    %c0_100 = arith.constant 0 : index
    %c0_101 = arith.constant 0 : index
    %364 = vector.load %arg12[%363, %c0_100, %c0_101] : memref<8x8x192xf32, #tpu.memory_space<vmem>>, vector<1x8x192xf32>
    %365 = vector.shape_cast %364 : vector<1x8x192xf32> to vector<8x192xf32>
    %366 = arith.index_cast %360 : i32 to index
    %c0_102 = arith.constant 0 : index
    %c0_103 = arith.constant 0 : index
    %367 = vector.load %arg12[%366, %c0_102, %c0_103] : memref<8x8x192xf32, #tpu.memory_space<vmem>>, vector<1x8x192xf32>
    %368 = vector.shape_cast %367 : vector<1x8x192xf32> to vector<8x192xf32>
    %369 = vector.extract_strided_slice %365 {offsets = [0, 0], sizes = [8, 64], strides = [1, 1]} : vector<8x192xf32> to vector<8x64xf32>
    %370 = vector.extract_strided_slice %361 {offsets = [0, 0], sizes = [8, 64], strides = [1, 1]} : vector<8x96xf32> to vector<8x64xf32>
    %371 = arith.addf %369, %370 : vector<8x64xf32>
    %372 = arith.negf %371 : vector<8x64xf32>
    %373 = math.exp %372 : vector<8x64xf32>
    %cst_104 = arith.constant 1.000000e+00 : f32
    %374 = vector.broadcast %cst_104 : f32 to vector<8x64xf32>
    %375 = arith.addf %374, %373 : vector<8x64xf32>
    %376 = arith.divf %374, %375 : vector<8x64xf32>
    %377 = vector.extract_strided_slice %365 {offsets = [0, 64], sizes = [8, 32], strides = [1, 1]} : vector<8x192xf32> to vector<8x32xf32>
    %378 = vector.extract_strided_slice %376 {offsets = [0, 0], sizes = [8, 32], strides = [1, 1]} : vector<8x64xf32> to vector<8x32xf32>
    %379 = vector.extract_strided_slice %361 {offsets = [0, 64], sizes = [8, 32], strides = [1, 1]} : vector<8x96xf32> to vector<8x32xf32>
    %380 = vector.broadcast %14 : vector<1x32xf32> to vector<8x32xf32>
    %381 = arith.addf %379, %380 : vector<8x32xf32>
    %382 = arith.mulf %378, %381 : vector<8x32xf32>
    %383 = arith.addf %377, %382 : vector<8x32xf32>
    %384 = math.tanh %383 : vector<8x32xf32>
    %385 = vector.extract_strided_slice %376 {offsets = [0, 32], sizes = [8, 32], strides = [1, 1]} : vector<8x64xf32> to vector<8x32xf32>
    %386 = arith.subf %331, %384 : vector<8x32xf32>
    %387 = arith.mulf %385, %386 : vector<8x32xf32>
    %388 = arith.addf %387, %384 : vector<8x32xf32>
    %389 = vector.extract_strided_slice %368 {offsets = [0, 96], sizes = [8, 64], strides = [1, 1]} : vector<8x192xf32> to vector<8x64xf32>
    %390 = vector.extract_strided_slice %362 {offsets = [0, 0], sizes = [8, 64], strides = [1, 1]} : vector<8x96xf32> to vector<8x64xf32>
    %391 = arith.addf %389, %390 : vector<8x64xf32>
    %392 = arith.negf %391 : vector<8x64xf32>
    %393 = math.exp %392 : vector<8x64xf32>
    %cst_105 = arith.constant 1.000000e+00 : f32
    %394 = vector.broadcast %cst_105 : f32 to vector<8x64xf32>
    %395 = arith.addf %394, %393 : vector<8x64xf32>
    %396 = arith.divf %394, %395 : vector<8x64xf32>
    %397 = vector.extract_strided_slice %368 {offsets = [0, 160], sizes = [8, 32], strides = [1, 1]} : vector<8x192xf32> to vector<8x32xf32>
    %398 = vector.extract_strided_slice %396 {offsets = [0, 0], sizes = [8, 32], strides = [1, 1]} : vector<8x64xf32> to vector<8x32xf32>
    %399 = vector.extract_strided_slice %362 {offsets = [0, 64], sizes = [8, 32], strides = [1, 1]} : vector<8x96xf32> to vector<8x32xf32>
    %400 = vector.broadcast %16 : vector<1x32xf32> to vector<8x32xf32>
    %401 = arith.addf %399, %400 : vector<8x32xf32>
    %402 = arith.mulf %398, %401 : vector<8x32xf32>
    %403 = arith.addf %397, %402 : vector<8x32xf32>
    %404 = math.tanh %403 : vector<8x32xf32>
    %405 = vector.extract_strided_slice %396 {offsets = [0, 32], sizes = [8, 32], strides = [1, 1]} : vector<8x64xf32> to vector<8x32xf32>
    %406 = arith.subf %351, %404 : vector<8x32xf32>
    %407 = arith.mulf %405, %406 : vector<8x32xf32>
    %408 = arith.addf %407, %404 : vector<8x32xf32>
    %409 = arith.index_cast %c6_i32 : i32 to index
    %c0_106 = arith.constant 0 : index
    %c0_107 = arith.constant 0 : index
    %410 = vector.load %arg13[%409, %c0_106, %c0_107] : memref<8x8x64xf32, #tpu.memory_space<vmem>>, vector<1x8x32xf32>
    %411 = vector.shape_cast %410 : vector<1x8x32xf32> to vector<8x32xf32>
    %412 = vector.shape_cast %388 : vector<8x32xf32> to vector<1x8x32xf32>
    tpu.vector_store %arg13[%409, %c0_106, %c0_107], %412 {strides = array<i32>} : memref<8x8x64xf32, #tpu.memory_space<vmem>>, vector<1x8x32xf32>,
    %413 = arith.index_cast %360 : i32 to index
    %c0_108 = arith.constant 0 : index
    %c32_109 = arith.constant 32 : index
    %414 = vector.load %arg13[%413, %c0_108, %c32_109] : memref<8x8x64xf32, #tpu.memory_space<vmem>>, vector<1x8x32xf32>
    %415 = vector.shape_cast %414 : vector<1x8x32xf32> to vector<8x32xf32>
    %416 = vector.shape_cast %408 : vector<8x32xf32> to vector<1x8x32xf32>
    tpu.vector_store %arg13[%413, %c0_108, %c32_109], %416 {strides = array<i32>} : memref<8x8x64xf32, #tpu.memory_space<vmem>>, vector<1x8x32xf32>,
    %c7_i32_110 = arith.constant 7 : i32
    %c7_i32_111 = arith.constant 7 : i32
    %417 = arith.subi %c7_i32_111, %c7_i32_110 : i32
    %cst_112 = arith.constant dense<0.000000e+00> : vector<8x96xf32>
    %418 = tpu.matmul %388, %10, %cst_112 {dimension_numbers = #tpu.dot_dimension_numbers<[1], [0], [0], [1], [0, 0, 1, 1], [], []>} : vector<8x32xf32>, vector<32x96xf32>, vector<8x96xf32> -> vector<8x96xf32>
    %cst_113 = arith.constant dense<0.000000e+00> : vector<8x96xf32>
    %419 = tpu.matmul %408, %12, %cst_113 {dimension_numbers = #tpu.dot_dimension_numbers<[1], [0], [0], [1], [0, 0, 1, 1], [], []>} : vector<8x32xf32>, vector<32x96xf32>, vector<8x96xf32> -> vector<8x96xf32>
    %420 = arith.index_cast %c7_i32_110 : i32 to index
    %c0_114 = arith.constant 0 : index
    %c0_115 = arith.constant 0 : index
    %421 = vector.load %arg12[%420, %c0_114, %c0_115] : memref<8x8x192xf32, #tpu.memory_space<vmem>>, vector<1x8x192xf32>
    %422 = vector.shape_cast %421 : vector<1x8x192xf32> to vector<8x192xf32>
    %423 = arith.index_cast %417 : i32 to index
    %c0_116 = arith.constant 0 : index
    %c0_117 = arith.constant 0 : index
    %424 = vector.load %arg12[%423, %c0_116, %c0_117] : memref<8x8x192xf32, #tpu.memory_space<vmem>>, vector<1x8x192xf32>
    %425 = vector.shape_cast %424 : vector<1x8x192xf32> to vector<8x192xf32>
    %426 = vector.extract_strided_slice %422 {offsets = [0, 0], sizes = [8, 64], strides = [1, 1]} : vector<8x192xf32> to vector<8x64xf32>
    %427 = vector.extract_strided_slice %418 {offsets = [0, 0], sizes = [8, 64], strides = [1, 1]} : vector<8x96xf32> to vector<8x64xf32>
    %428 = arith.addf %426, %427 : vector<8x64xf32>
    %429 = arith.negf %428 : vector<8x64xf32>
    %430 = math.exp %429 : vector<8x64xf32>
    %cst_118 = arith.constant 1.000000e+00 : f32
    %431 = vector.broadcast %cst_118 : f32 to vector<8x64xf32>
    %432 = arith.addf %431, %430 : vector<8x64xf32>
    %433 = arith.divf %431, %432 : vector<8x64xf32>
    %434 = vector.extract_strided_slice %422 {offsets = [0, 64], sizes = [8, 32], strides = [1, 1]} : vector<8x192xf32> to vector<8x32xf32>
    %435 = vector.extract_strided_slice %433 {offsets = [0, 0], sizes = [8, 32], strides = [1, 1]} : vector<8x64xf32> to vector<8x32xf32>
    %436 = vector.extract_strided_slice %418 {offsets = [0, 64], sizes = [8, 32], strides = [1, 1]} : vector<8x96xf32> to vector<8x32xf32>
    %437 = vector.broadcast %14 : vector<1x32xf32> to vector<8x32xf32>
    %438 = arith.addf %436, %437 : vector<8x32xf32>
    %439 = arith.mulf %435, %438 : vector<8x32xf32>
    %440 = arith.addf %434, %439 : vector<8x32xf32>
    %441 = math.tanh %440 : vector<8x32xf32>
    %442 = vector.extract_strided_slice %433 {offsets = [0, 32], sizes = [8, 32], strides = [1, 1]} : vector<8x64xf32> to vector<8x32xf32>
    %443 = arith.subf %388, %441 : vector<8x32xf32>
    %444 = arith.mulf %442, %443 : vector<8x32xf32>
    %445 = arith.addf %444, %441 : vector<8x32xf32>
    %446 = vector.extract_strided_slice %425 {offsets = [0, 96], sizes = [8, 64], strides = [1, 1]} : vector<8x192xf32> to vector<8x64xf32>
    %447 = vector.extract_strided_slice %419 {offsets = [0, 0], sizes = [8, 64], strides = [1, 1]} : vector<8x96xf32> to vector<8x64xf32>
    %448 = arith.addf %446, %447 : vector<8x64xf32>
    %449 = arith.negf %448 : vector<8x64xf32>
    %450 = math.exp %449 : vector<8x64xf32>
    %cst_119 = arith.constant 1.000000e+00 : f32
    %451 = vector.broadcast %cst_119 : f32 to vector<8x64xf32>
    %452 = arith.addf %451, %450 : vector<8x64xf32>
    %453 = arith.divf %451, %452 : vector<8x64xf32>
    %454 = vector.extract_strided_slice %425 {offsets = [0, 160], sizes = [8, 32], strides = [1, 1]} : vector<8x192xf32> to vector<8x32xf32>
    %455 = vector.extract_strided_slice %453 {offsets = [0, 0], sizes = [8, 32], strides = [1, 1]} : vector<8x64xf32> to vector<8x32xf32>
    %456 = vector.extract_strided_slice %419 {offsets = [0, 64], sizes = [8, 32], strides = [1, 1]} : vector<8x96xf32> to vector<8x32xf32>
    %457 = vector.broadcast %16 : vector<1x32xf32> to vector<8x32xf32>
    %458 = arith.addf %456, %457 : vector<8x32xf32>
    %459 = arith.mulf %455, %458 : vector<8x32xf32>
    %460 = arith.addf %454, %459 : vector<8x32xf32>
    %461 = math.tanh %460 : vector<8x32xf32>
    %462 = vector.extract_strided_slice %453 {offsets = [0, 32], sizes = [8, 32], strides = [1, 1]} : vector<8x64xf32> to vector<8x32xf32>
    %463 = arith.subf %408, %461 : vector<8x32xf32>
    %464 = arith.mulf %462, %463 : vector<8x32xf32>
    %465 = arith.addf %464, %461 : vector<8x32xf32>
    %466 = arith.index_cast %c7_i32_110 : i32 to index
    %c0_120 = arith.constant 0 : index
    %c0_121 = arith.constant 0 : index
    %467 = vector.load %arg13[%466, %c0_120, %c0_121] : memref<8x8x64xf32, #tpu.memory_space<vmem>>, vector<1x8x32xf32>
    %468 = vector.shape_cast %467 : vector<1x8x32xf32> to vector<8x32xf32>
    %469 = vector.shape_cast %445 : vector<8x32xf32> to vector<1x8x32xf32>
    tpu.vector_store %arg13[%466, %c0_120, %c0_121], %469 {strides = array<i32>} : memref<8x8x64xf32, #tpu.memory_space<vmem>>, vector<1x8x32xf32>,
    %470 = arith.index_cast %417 : i32 to index
    %c0_122 = arith.constant 0 : index
    %c32_123 = arith.constant 32 : index
    %471 = vector.load %arg13[%470, %c0_122, %c32_123] : memref<8x8x64xf32, #tpu.memory_space<vmem>>, vector<1x8x32xf32>
    %472 = vector.shape_cast %471 : vector<1x8x32xf32> to vector<8x32xf32>
    %473 = vector.shape_cast %465 : vector<8x32xf32> to vector<1x8x32xf32>
    tpu.vector_store %arg13[%470, %c0_122, %c32_123], %473 {strides = array<i32>} : memref<8x8x64xf32, #tpu.memory_space<vmem>>, vector<1x8x32xf32>,
    %c8_i32 = arith.constant 8 : i32
    %c0_124 = arith.constant 0 : index
    %c0_125 = arith.constant 0 : index
    %c0_126 = arith.constant 0 : index
    %474 = vector.load %arg10[%c0_124, %c0_125, %c0_126] : memref<2x8x32xf32, #tpu.memory_space<vmem>>, vector<1x8x32xf32>
    %475 = vector.shape_cast %474 : vector<1x8x32xf32> to vector<8x32xf32>
    %476 = vector.shape_cast %445 : vector<8x32xf32> to vector<1x8x32xf32>
    tpu.vector_store %arg10[%c0_124, %c0_125, %c0_126], %476 {strides = array<i32>} : memref<2x8x32xf32, #tpu.memory_space<vmem>>, vector<1x8x32xf32>,
    %c1_127 = arith.constant 1 : index
    %c0_128 = arith.constant 0 : index
    %c0_129 = arith.constant 0 : index
    %477 = vector.load %arg10[%c1_127, %c0_128, %c0_129] : memref<2x8x32xf32, #tpu.memory_space<vmem>>, vector<1x8x32xf32>
    %478 = vector.shape_cast %477 : vector<1x8x32xf32> to vector<8x32xf32>
    %479 = vector.shape_cast %465 : vector<8x32xf32> to vector<1x8x32xf32>
    tpu.vector_store %arg10[%c1_127, %c0_128, %c0_129], %479 {strides = array<i32>} : memref<2x8x32xf32, #tpu.memory_space<vmem>>, vector<1x8x32xf32>,
    %c0_130 = arith.constant 0 : index
    %c0_131 = arith.constant 0 : index
    %c0_132 = arith.constant 0 : index
    %480 = vector.load %arg13[%c0_130, %c0_131, %c0_132] : memref<8x8x64xf32, #tpu.memory_space<vmem>>, vector<8x8x64xf32>
    %481 = vector.shape_cast %480 : vector<8x8x64xf32> to vector<64x64xf32>
    %c0_133 = arith.constant 0 : index
    %c0_134 = arith.constant 0 : index
    %482 = vector.load %arg6[%c0_133, %c0_134] : memref<64x64xf32, #tpu.memory_space<vmem>>, vector<64x64xf32>
    %cst_135 = arith.constant dense<0.000000e+00> : vector<64x64xf32>
    %483 = tpu.matmul %481, %482, %cst_135 {dimension_numbers = #tpu.dot_dimension_numbers<[1], [0], [0], [1], [0, 0, 1, 1], [], []>} : vector<64x64xf32>, vector<64x64xf32>, vector<64x64xf32> -> vector<64x64xf32>
    %c0_136 = arith.constant 0 : index
    %c0_137 = arith.constant 0 : index
    %484 = vector.load %arg7[%c0_136, %c0_137] : memref<1x64xf32, #tpu.memory_space<vmem>>, vector<1x64xf32>
    %485 = vector.broadcast %484 : vector<1x64xf32> to vector<64x64xf32>
    %486 = arith.addf %483, %485 : vector<64x64xf32>
    %487 = math.tanh %486 : vector<64x64xf32>
    %c0_138 = arith.constant 0 : index
    %c0_139 = arith.constant 0 : index
    %488 = vector.load %arg8[%c0_138, %c0_139] : memref<64x64xf32, #tpu.memory_space<vmem>>, vector<64x64xf32>
    %cst_140 = arith.constant dense<0.000000e+00> : vector<64x64xf32>
    %489 = tpu.matmul %487, %488, %cst_140 {dimension_numbers = #tpu.dot_dimension_numbers<[1], [0], [0], [1], [0, 0, 1, 1], [], []>} : vector<64x64xf32>, vector<64x64xf32>, vector<64x64xf32> -> vector<64x64xf32>
    %490 = vector.shape_cast %489 : vector<64x64xf32> to vector<8x8x64xf32>
    %cst_141 = arith.constant dense<0xFF800000> : vector<8x64xf32>
    %491 = vector.multi_reduction <maximumf>, %490, %cst_141 [0] : vector<8x8x64xf32> to vector<8x64xf32>
    %492 = vector.shape_cast %491 : vector<8x64xf32> to vector<1x8x64xf32>
    %493 = vector.broadcast %492 : vector<1x8x64xf32> to vector<8x8x64xf32>
    %494 = arith.subf %490, %493 : vector<8x8x64xf32>
    %495 = math.exp %494 : vector<8x8x64xf32>
    %cst_142 = arith.constant dense<0.000000e+00> : vector<8x64xf32>
    %496 = vector.multi_reduction <add>, %495, %cst_142 [0] : vector<8x8x64xf32> to vector<8x64xf32>
    %497 = vector.shape_cast %496 : vector<8x64xf32> to vector<1x8x64xf32>
    %498 = tpu.reciprocal %497 : vector<1x8x64xf32> -> vector<1x8x64xf32>
    %499 = vector.broadcast %498 : vector<1x8x64xf32> to vector<8x8x64xf32>
    %500 = arith.mulf %495, %499 : vector<8x8x64xf32>
    %501 = arith.mulf %500, %480 : vector<8x8x64xf32>
    %cst_143 = arith.constant dense<0.000000e+00> : vector<8x64xf32>
    %502 = vector.multi_reduction <add>, %501, %cst_143 [0] : vector<8x8x64xf32> to vector<8x64xf32>
    %c0_144 = arith.constant 0 : index
    %c0_145 = arith.constant 0 : index
    %503 = vector.load %arg9[%c0_144, %c0_145] : memref<8x64xf32, #tpu.memory_space<vmem>>, vector<8x64xf32>
    tpu.vector_store %arg9[%c0_144, %c0_145], %502 {strides = array<i32>} : memref<8x64xf32, #tpu.memory_space<vmem>>, vector<8x64xf32>,
    %504 = vector.extract_strided_slice %500 {offsets = [0, 0, 0], sizes = [1, 8, 64], strides = [1, 1, 1]} : vector<8x8x64xf32> to vector<1x8x64xf32>
    %505 = vector.shape_cast %504 : vector<1x8x64xf32> to vector<8x64xf32>
    %c0_146 = arith.constant 0 : index
    %c0_147 = arith.constant 0 : index
    %c0_148 = arith.constant 0 : index
    %506 = vector.load %arg11[%c0_146, %c0_147, %c0_148] : memref<8x8x64xf32, #tpu.memory_space<vmem>>, vector<8x1x64xf32>
    %507 = vector.shape_cast %506 : vector<8x1x64xf32> to vector<8x64xf32>
    %508 = vector.shape_cast %505 : vector<8x64xf32> to vector<8x1x64xf32>
    tpu.vector_store %arg11[%c0_146, %c0_147, %c0_148], %508 {strides = array<i32>} : memref<8x8x64xf32, #tpu.memory_space<vmem>>, vector<8x1x64xf32>,
    %509 = vector.extract_strided_slice %500 {offsets = [1, 0, 0], sizes = [1, 8, 64], strides = [1, 1, 1]} : vector<8x8x64xf32> to vector<1x8x64xf32>
    %510 = vector.shape_cast %509 : vector<1x8x64xf32> to vector<8x64xf32>
    %c0_149 = arith.constant 0 : index
    %c1_150 = arith.constant 1 : index
    %c0_151 = arith.constant 0 : index
    %511 = vector.load %arg11[%c0_149, %c1_150, %c0_151] : memref<8x8x64xf32, #tpu.memory_space<vmem>>, vector<8x1x64xf32>
    %512 = vector.shape_cast %511 : vector<8x1x64xf32> to vector<8x64xf32>
    %513 = vector.shape_cast %510 : vector<8x64xf32> to vector<8x1x64xf32>
    tpu.vector_store %arg11[%c0_149, %c1_150, %c0_151], %513 {strides = array<i32>} : memref<8x8x64xf32, #tpu.memory_space<vmem>>, vector<8x1x64xf32>,
    %514 = vector.extract_strided_slice %500 {offsets = [2, 0, 0], sizes = [1, 8, 64], strides = [1, 1, 1]} : vector<8x8x64xf32> to vector<1x8x64xf32>
    %515 = vector.shape_cast %514 : vector<1x8x64xf32> to vector<8x64xf32>
    %c0_152 = arith.constant 0 : index
    %c2 = arith.constant 2 : index
    %c0_153 = arith.constant 0 : index
    %516 = vector.load %arg11[%c0_152, %c2, %c0_153] : memref<8x8x64xf32, #tpu.memory_space<vmem>>, vector<8x1x64xf32>
    %517 = vector.shape_cast %516 : vector<8x1x64xf32> to vector<8x64xf32>
    %518 = vector.shape_cast %515 : vector<8x64xf32> to vector<8x1x64xf32>
    tpu.vector_store %arg11[%c0_152, %c2, %c0_153], %518 {strides = array<i32>} : memref<8x8x64xf32, #tpu.memory_space<vmem>>, vector<8x1x64xf32>,
    %519 = vector.extract_strided_slice %500 {offsets = [3, 0, 0], sizes = [1, 8, 64], strides = [1, 1, 1]} : vector<8x8x64xf32> to vector<1x8x64xf32>
    %520 = vector.shape_cast %519 : vector<1x8x64xf32> to vector<8x64xf32>
    %c0_154 = arith.constant 0 : index
    %c3 = arith.constant 3 : index
    %c0_155 = arith.constant 0 : index
    %521 = vector.load %arg11[%c0_154, %c3, %c0_155] : memref<8x8x64xf32, #tpu.memory_space<vmem>>, vector<8x1x64xf32>
    %522 = vector.shape_cast %521 : vector<8x1x64xf32> to vector<8x64xf32>
    %523 = vector.shape_cast %520 : vector<8x64xf32> to vector<8x1x64xf32>
    tpu.vector_store %arg11[%c0_154, %c3, %c0_155], %523 {strides = array<i32>} : memref<8x8x64xf32, #tpu.memory_space<vmem>>, vector<8x1x64xf32>,
    %524 = vector.extract_strided_slice %500 {offsets = [4, 0, 0], sizes = [1, 8, 64], strides = [1, 1, 1]} : vector<8x8x64xf32> to vector<1x8x64xf32>
    %525 = vector.shape_cast %524 : vector<1x8x64xf32> to vector<8x64xf32>
    %c0_156 = arith.constant 0 : index
    %c4 = arith.constant 4 : index
    %c0_157 = arith.constant 0 : index
    %526 = vector.load %arg11[%c0_156, %c4, %c0_157] : memref<8x8x64xf32, #tpu.memory_space<vmem>>, vector<8x1x64xf32>
    %527 = vector.shape_cast %526 : vector<8x1x64xf32> to vector<8x64xf32>
    %528 = vector.shape_cast %525 : vector<8x64xf32> to vector<8x1x64xf32>
    tpu.vector_store %arg11[%c0_156, %c4, %c0_157], %528 {strides = array<i32>} : memref<8x8x64xf32, #tpu.memory_space<vmem>>, vector<8x1x64xf32>,
    %529 = vector.extract_strided_slice %500 {offsets = [5, 0, 0], sizes = [1, 8, 64], strides = [1, 1, 1]} : vector<8x8x64xf32> to vector<1x8x64xf32>
    %530 = vector.shape_cast %529 : vector<1x8x64xf32> to vector<8x64xf32>
    %c0_158 = arith.constant 0 : index
    %c5 = arith.constant 5 : index
    %c0_159 = arith.constant 0 : index
    %531 = vector.load %arg11[%c0_158, %c5, %c0_159] : memref<8x8x64xf32, #tpu.memory_space<vmem>>, vector<8x1x64xf32>
    %532 = vector.shape_cast %531 : vector<8x1x64xf32> to vector<8x64xf32>
    %533 = vector.shape_cast %530 : vector<8x64xf32> to vector<8x1x64xf32>
    tpu.vector_store %arg11[%c0_158, %c5, %c0_159], %533 {strides = array<i32>} : memref<8x8x64xf32, #tpu.memory_space<vmem>>, vector<8x1x64xf32>,
    %534 = vector.extract_strided_slice %500 {offsets = [6, 0, 0], sizes = [1, 8, 64], strides = [1, 1, 1]} : vector<8x8x64xf32> to vector<1x8x64xf32>
    %535 = vector.shape_cast %534 : vector<1x8x64xf32> to vector<8x64xf32>
    %c0_160 = arith.constant 0 : index
    %c6 = arith.constant 6 : index
    %c0_161 = arith.constant 0 : index
    %536 = vector.load %arg11[%c0_160, %c6, %c0_161] : memref<8x8x64xf32, #tpu.memory_space<vmem>>, vector<8x1x64xf32>
    %537 = vector.shape_cast %536 : vector<8x1x64xf32> to vector<8x64xf32>
    %538 = vector.shape_cast %535 : vector<8x64xf32> to vector<8x1x64xf32>
    tpu.vector_store %arg11[%c0_160, %c6, %c0_161], %538 {strides = array<i32>} : memref<8x8x64xf32, #tpu.memory_space<vmem>>, vector<8x1x64xf32>,
    %539 = vector.extract_strided_slice %500 {offsets = [7, 0, 0], sizes = [1, 8, 64], strides = [1, 1, 1]} : vector<8x8x64xf32> to vector<1x8x64xf32>
    %540 = vector.shape_cast %539 : vector<1x8x64xf32> to vector<8x64xf32>
    %c0_162 = arith.constant 0 : index
    %c7 = arith.constant 7 : index
    %c0_163 = arith.constant 0 : index
    %541 = vector.load %arg11[%c0_162, %c7, %c0_163] : memref<8x8x64xf32, #tpu.memory_space<vmem>>, vector<8x1x64xf32>
    %542 = vector.shape_cast %541 : vector<8x1x64xf32> to vector<8x64xf32>
    %543 = vector.shape_cast %540 : vector<8x64xf32> to vector<8x1x64xf32>
    tpu.vector_store %arg11[%c0_162, %c7, %c0_163], %543 {strides = array<i32>} : memref<8x8x64xf32, #tpu.memory_space<vmem>>, vector<8x1x64xf32>,
    return
  }
  func.func @transform_0(%arg0: i32) -> (i32, i32, i32) {
    %c0_i32 = arith.constant 0 : i32
    %c0_i32_0 = arith.constant 0 : i32
    %c0_i32_1 = arith.constant 0 : i32
    return %c0_i32, %arg0, %c0_i32_0 : i32, i32, i32
  }
  func.func @transform_1(%arg0: i32) -> (i32, i32) {
    %c0_i32 = arith.constant 0 : i32
    %c0_i32_0 = arith.constant 0 : i32
    %c0_i32_1 = arith.constant 0 : i32
    return %c0_i32, %c0_i32_0 : i32, i32
  }
  func.func @transform_2(%arg0: i32) -> (i32, i32) {
    %c0_i32 = arith.constant 0 : i32
    %c0_i32_0 = arith.constant 0 : i32
    %c0_i32_1 = arith.constant 0 : i32
    return %c0_i32, %c0_i32_0 : i32, i32
  }
  func.func @transform_3(%arg0: i32) -> (i32, i32, i32) {
    %c0_i32 = arith.constant 0 : i32
    %c0_i32_0 = arith.constant 0 : i32
    %c0_i32_1 = arith.constant 0 : i32
    %c0_i32_2 = arith.constant 0 : i32
    return %c0_i32, %c0_i32_0, %c0_i32_1 : i32, i32, i32
  }
  func.func @transform_4(%arg0: i32) -> (i32, i32, i32) {
    %c0_i32 = arith.constant 0 : i32
    %c0_i32_0 = arith.constant 0 : i32
    %c0_i32_1 = arith.constant 0 : i32
    %c0_i32_2 = arith.constant 0 : i32
    return %c0_i32, %c0_i32_0, %c0_i32_1 : i32, i32, i32
  }
  func.func @transform_5(%arg0: i32) -> (i32, i32) {
    %c0_i32 = arith.constant 0 : i32
    %c0_i32_0 = arith.constant 0 : i32
    %c0_i32_1 = arith.constant 0 : i32
    return %c0_i32, %c0_i32_0 : i32, i32
  }
  func.func @transform_6(%arg0: i32) -> (i32, i32) {
    %c0_i32 = arith.constant 0 : i32
    %c0_i32_0 = arith.constant 0 : i32
    %c0_i32_1 = arith.constant 0 : i32
    return %c0_i32, %c0_i32_0 : i32, i32
  }
  func.func @transform_7(%arg0: i32) -> (i32, i32) {
    %c0_i32 = arith.constant 0 : i32
    %c0_i32_0 = arith.constant 0 : i32
    %c0_i32_1 = arith.constant 0 : i32
    return %c0_i32, %c0_i32_0 : i32, i32
  }
  func.func @transform_8(%arg0: i32) -> (i32, i32) {
    %c0_i32 = arith.constant 0 : i32
    %c0_i32_0 = arith.constant 0 : i32
    return %arg0, %c0_i32 : i32, i32
  }
  func.func @transform_9(%arg0: i32) -> (i32, i32, i32) {
    %c0_i32 = arith.constant 0 : i32
    %c0_i32_0 = arith.constant 0 : i32
    %c0_i32_1 = arith.constant 0 : i32
    return %c0_i32, %arg0, %c0_i32_0 : i32, i32, i32
  }
  func.func @transform_10(%arg0: i32) -> (i32, i32, i32) {
    %c0_i32 = arith.constant 0 : i32
    %c0_i32_0 = arith.constant 0 : i32
    %c0_i32_1 = arith.constant 0 : i32
    return %arg0, %c0_i32, %c0_i32_0 : i32, i32, i32
  }
}

</mosaic_0001>

<bundles_post_ra>
// kernel: tpu_custom_call.1
= control target key start
LH: loop header
LB: loop body
LE: loop exit
PB: predicated region body
PF: predicated region fallthrough
CT: control target
= control target key end

     0   :  { %16 = vsyncpa [#allocation5], 0  ;;  %s4645_s0 = inlined_call_operand.hbm [shape: f32[8,8,32], index: 0, kind: input, shape index: {}]   ;;  %s4646_s1 = inlined_call_operand.hbm [shape: f32[32,192], index: 1, kind: input, shape index: {}]   ;;  %s4647_s2 = inlined_call_operand.vmem [shape: f32[1,192], index: 2, kind: input, shape index: {}]   ;;  %s4648_s3 = inlined_call_operand.hbm [shape: f32[2,32,96], index: 3, kind: input, shape index: {}]   ;;  %s4649_s4 = inlined_call_operand.vmem [shape: f32[2,1,32], index: 4, kind: input, shape index: {}]   ;;  %s4650_s5 = inlined_call_operand.hbm [shape: f32[64,64], index: 5, kind: input, shape index: {}]   ;;  %s4651_s6 = inlined_call_operand.vmem [shape: f32[1,64], index: 6, kind: input, shape index: {}]   ;;  %s4652_s7 = inlined_call_operand.hbm [shape: f32[64,64], index: 7, kind: input, shape index: {}]   ;;  %s4653_s8 = inlined_call_operand.hbm [shape: f32[8,64], index: 8, kind: output, shape index: {0}]   ;;  %s4654_s9 = inlined_call_operand.hbm [shape: f32[2,8,32], index: 9, kind: output, shape index: {1}]   ;;  %s4655_s10 = inlined_call_operand.hbm [shape: f32[8,8,64], index: 10, kind: output, shape index: {2}]  }
   0x1   :  { %17 = vsyncpa [#allocation8], 0 }
   0x2   :  { %18 = vsyncpa [#allocation11], 0 }
   0x3   :  { %19 = vsyncpa [#allocation6], 0 }
   0x4   :  { %20 = vsyncpa [#allocation15], 0  ;;  %s3828_s13 = smov [#allocation7]  }
   0x5   :  { %s38_s14 = sshll.u32 %s3828_s13, 4  ;;  %s39_s14 = int_to_ptr.vmem [resolvable:$true] %s38_s14 }
   0x6   :  { %s3666_s15 = scalar_lea.vmem %s39_s14, 1024  ;;  %p3671_p1 = scmp.lt.s32.totalorder %s39_s14, %s39_s14 }
   0x7   :  { %p3667_p0 = scmp.ne.s32.totalorder %s39_s14, %s3666_s15  ;;  %p3672_p2 = scmp.lt.s32.totalorder %s3666_s15, %s3666_s15 }
   0x9   :  { %p3673_p3 = por %p3672_p2, %p3671_p1 }
   0xb   :  { %p3674_p4 = pnand %p3673_p3, %p3667_p0 }
   0xd   :  { %3677 = shalt.err (!%p3674_p4)
}
   0xe   :  { %s3829_s16 = smov 256   ;;  %s3830_s17 = smov 16  }
   0xf   :  { %44 = dma.hbm_to_vmem [thread:$0]  %s4646_s1, 1024, %s39_s14, [#allocation8], %s3829_s16, %s3829_s16, %s3830_s17  }
  0x10   :  { %s3831_s20 = smov [#allocation10]   ;;  %s3832_s22 = smov [#allocation4]  }
  0x11   :  { %s66_s21 = sshll.u32 %s3831_s20, 4  ;;  %s26_s23 = sshll.u32 %s3832_s22, 4  ;;  %s67_s21 = int_to_ptr.vmem [resolvable:$true] %s66_s21  ;;  %s27_s23 = int_to_ptr.vmem [resolvable:$true] %s26_s23 }
  0x12   :  { %s3686_s24 = scalar_lea.vmem %s67_s21, 1024  ;;  %p3691_p6 = scmp.lt.s32.totalorder %s67_s21, %s67_s21 }
  0x13   :  { %p3687_p5 = scmp.ne.s32.totalorder %s67_s21, %s3686_s24  ;;  %p3692_p7 = scmp.lt.s32.totalorder %s3686_s24, %s3686_s24 }
  0x15   :  { %p3693_p8 = por %p3692_p7, %p3691_p6 }
  0x17   :  { %p3694_p9 = pnand %p3693_p8, %p3687_p5 }
  0x19   :  { %3697 = shalt.err (!%p3694_p9)
}
  0x1a   :  { %s3833_s25 = smov 128   ;;  %s3834_s26 = smov 8  }
  0x1b   :  { %72 = dma.hbm_to_vmem [thread:$0]  %s4650_s5, 1024, %s67_s21, [#allocation11], %s3833_s25, %s3833_s25, %s3834_s26  }
  0x1c   :  { %s3706_s1 = scalar_lea.vmem %s27_s23, 1024  ;;  %p3711_p11 = scmp.lt.s32.totalorder %s27_s23, %s27_s23 }
  0x1d   :  { %p3707_p10 = scmp.ne.s32.totalorder %s27_s23, %s3706_s1  ;;  %p3712_p12 = scmp.lt.s32.totalorder %s3706_s1, %s3706_s1 }
  0x1f   :  { %p3713_p13 = por %p3712_p12, %p3711_p11 }
  0x21   :  { %p3714_p0 = pnand %p3713_p13, %p3707_p10 }
  0x23   :  { %3717 = shalt.err (!%p3714_p0)
}
  0x24   :  { %32 = dma.hbm_to_vmem [thread:$0]  %s4645_s0, 1024, %s27_s23, [#allocation5], %s3833_s25, %s3833_s25, %s3834_s26  }
  0x25   :  { %s3835_s11 = smov [#allocation9]   ;;  %s3836_s13 = smov [#allocation12]  }
  0x26   :  { %s52_s12 = sshll.u32 %s3835_s11, 4  ;;  %s80_s5 = sshll.u32 %s3836_s13, 4  ;;  %s53_s12 = int_to_ptr.vmem [resolvable:$true] %s52_s12  ;;  %s81_s5 = int_to_ptr.vmem [resolvable:$true] %s80_s5 }
  0x27   :  { %s3726_s14 = scalar_lea.vmem %s53_s12, 1024  ;;  %p3731_p2 = scmp.lt.s32.totalorder %s53_s12, %s53_s12 }
  0x28   :  { %p3727_p1 = scmp.ne.s32.totalorder %s53_s12, %s3726_s14  ;;  %p3732_p3 = scmp.lt.s32.totalorder %s3726_s14, %s3726_s14 }
  0x2a   :  { %p3733_p4 = por %p3732_p3, %p3731_p2 }
  0x2c   :  { %p3734_p5 = pnand %p3733_p4, %p3727_p1 }
  0x2e   :  { %3737 = shalt.err (!%p3734_p5)
}
  0x2f   :  { %58 = dma.hbm_to_vmem [thread:$0]  %s4648_s3, 1024, %s53_s12, [#allocation8], %s3833_s25, %s3833_s25, %s3834_s26  }
  0x30   :  { %s3746_s0 = scalar_lea.vmem %s81_s5, 1024  ;;  %p3751_p7 = scmp.lt.s32.totalorder %s81_s5, %s81_s5 }
  0x31   :  { %p3747_p6 = scmp.ne.s32.totalorder %s81_s5, %s3746_s0  ;;  %p3752_p8 = scmp.lt.s32.totalorder %s3746_s0, %s3746_s0 }
  0x33   :  { %p3753_p9 = por %p3752_p8, %p3751_p7 }
  0x35   :  { %p3754_p10 = pnand %p3753_p9, %p3747_p6 }
  0x37   :  { %3757 = shalt.err (!%p3754_p10)
}
  0x38   :  { %86 = dma.hbm_to_vmem [thread:$0]  %s4652_s7, 1024, %s81_s5, [#allocation11], %s3833_s25, %s3833_s25, %s3834_s26  }
  0x39   :  { %3818 = dma.done.wait [#allocation5], 1024  }
  0x3a   :  { %3819 = vsyncadd [#allocation5], 4294966272 }
  0x3b   :  { %3820 = dma.done.wait [#allocation8], 2048  }
  0x3c   :  { %3821 = vsyncadd [#allocation8], 4294965248 }
  0x3d   :  { %3822 = dma.done.wait [#allocation11], 2048  }
  0x3e   :  { %3823 = vsyncadd [#allocation11], 4294965248  ;;  %v3837_v0 = vmov 0.0   ;;  %vm3838_vm0 = vmmov 0   ;;  %v117_v1 = vld [vmem:[#allocation7 + $0x38] sm:$0xff]  ;;  %v116_v3 = vld [vmem:[#allocation7 + $0x30] sm:$0xff]  ;;  %v120_v21 = vlaneseq }
  0x3f   :  { %3237 = vmatprep.subr.mxu1 %v3837_v0  ;;  %3245 = vmatprep.mubr.msk.f32.mxu1 %vm3838_vm0, %v3837_v0  ;;  %v3932_v2 = vld [vmem:[#allocation9 + $0x18] sm:$0xff]  ;;  %v115_v4 = vld [vmem:[#allocation7 + $0x28] sm:$0xff]  ;;  %v3935_v5 = vld [vmem:[#allocation9 + $0x10] sm:$0xff]  ;;  %vm130_vm1 = vcmask 261120   ;;  %s3839_s19 = smov 64   ;;  %vm269_vm2 = vcmask 523264  }
  0x40   :  { %219 = vmatprep.mubr.f32.mxu0 %v3837_v0  ;;  %179 = vmatprep.subr.mxu0 %v117_v1  ;;  %v114_v6 = vld [vmem:[#allocation7 + $0x20] sm:$0xff]  ;;  %v113_v7 = vld [vmem:[#allocation7 + $0x18] sm:$0xff]  ;;  %v3938_v8 = vld [vmem:[#allocation9 + $0x8] sm:$0xff]  ;;  %v3997_v22 = vshrl.u32 %v120_v21, 7  ;;  %vm541_vm3 = vcmask 523520  }
  0x41   :  { %3238 = vmatpush3.msra.mxu1 %v3932_v2  ;;  %180 = vmatpush1.msra.mxu0 %v116_v3  ;;  %v112_v9 = vld [vmem:[#allocation7 + $0x10] sm:$0xff]  ;;  %v111_v10 = vld [vmem:[#allocation7 + $0x8] sm:$0xff]  ;;  %v3942_v11 = vld [vmem:[#allocation9] sm:$0xff] }
  0x42   :  { %3239 = vmatprep.subr.mxu1 %v3837_v0  ;;  %181 = vmatprep.subr.mxu0 %v115_v4  ;;  %v110_v12 = vld [vmem:[#allocation7] sm:$0xff]  ;;  %v3966_v15 = vld [vmem:[#allocation9 + $0x38] sm:$0xff]  ;;  %v3968_v16 = vld [vmem:[#allocation9 + $0x30] sm:$0xff]  ;;  %v122_v25 = vsub.s32 0, %v3997_v22  ;;  %v126_v27 = vsub.s32 1, %v3997_v22 }
  0x43   :  { %3240 = vmatpush3.msra.mxu1 %v3935_v5  ;;  %182 = vmatpush1.msra.mxu0 %v114_v6  ;;  %v102_v13 = vld [vmem:[#allocation4] sm:$0xff]  ;;  %v3972_v17 = vld [vmem:[#allocation9 + $0x28] sm:$0xff]  ;;  %v104_v20 = vld [vmem:[#allocation4 + $0x10] sm:$0xff] }
  0x44   :  { %3241 = vmatprep.subr.mxu1 %v3837_v0  ;;  %183 = vmatprep.subr.mxu0 %v113_v7  ;;  %v3069_v14 = vld [vmem:[%s4649_s4] ss:$0 sm:$0xff]  ;;  %v103_v18 = vld [vmem:[#allocation4 + $0x8] sm:$0xff]  ;;  %v105_v23 = vld [vmem:[#allocation4 + $0x18] sm:$0xff] }
  0x45   :  { %3242 = vmatpush3.msra.mxu1 %v3938_v8  ;;  %184 = vmatpush1.msra.mxu0 %v112_v9  ;;  %v3977_v19 = vld [vmem:[#allocation9 + $0x20] sm:$0xff]  ;;  %v107_v28 = vld [vmem:[#allocation4 + $0x28] sm:$0xff]  ;;  %v108_v33 = vld [vmem:[#allocation4 + $0x30] sm:$0xff] }
  0x46   :  { %3243 = vmatprep.subr.mxu1 %v3837_v0  ;;  %185 = vmatprep.subr.mxu0 %v111_v10  ;;  %v106_v24 = vld [vmem:[#allocation4 + $0x20] sm:$0xff]  ;;  %v109_v40 = vld [vmem:[#allocation4 + $0x38] sm:$0xff] }
  0x47   :  { %3244 = vmatpush3.msra.mxu1 %v3942_v11  ;;  %186 = vmatpush1.msra.mxu0 %v110_v12  ;;  %v118_v26 = vld [vmem:[%s4647_s2] sm:$0x3]  ;;  %s3840_s2 = smov 96  }
  0x48   :  { %3246 = vmatmul.mubr.f32.vlgmr.msra.gmra.mxu1 %v3837_v0  ;;  %3059 = vmatmul.mubr.msk.f32.vlgmr.msra.gmra.mxu0 %vm130_vm1, %v102_v13  ;;  %v4010_v30 = vrot.slane %v118_v26, %v122_v25  ;;  %v4013_v32 = vrot.slane %v118_v26, %v126_v27  ;;  %v3072_v50 = vld [vmem:[%s4649_s4 + $0x1] ss:$0 sm:$0xff]  ;;  %s3841_s4 = smov 32  }
  0x49   :  { %456 = vrot.lane.b32.xlu0 %v3069_v14, %s3839_s19  ;;  %3248 = vmatprep.subr.mxu1 %v3837_v0 }
  0x4a   :  { %3256 = vmatprep.mubr.msk.f32.mxu1 %vm3838_vm0, %v3837_v0  ;;  %225 = vmatprep.mubr.f32.mxu0 %v3837_v0 }
  0x4b   :  { %3281 = vmatprep.subr.mxu0 %v3837_v0  ;;  %3249 = vmatpush3.msra.mxu1 %v3966_v15 }
  0x4c   :  { %3282 = vmatpush3.msra.mxu0 %v3932_v2  ;;  %3250 = vmatprep.subr.mxu1 %v3837_v0 }
  0x4d   :  { %3283 = vmatprep.subr.mxu0 %v3837_v0  ;;  %3251 = vmatpush3.msra.mxu1 %v3968_v16 }
  0x4e   :  { %3284 = vmatpush3.msra.mxu0 %v3935_v5  ;;  %3252 = vmatprep.subr.mxu1 %v3837_v0 }
  0x4f   :  { %3285 = vmatprep.subr.mxu0 %v3837_v0  ;;  %3060 = vmatmul.mubr.msk.f32.gmra.mxu0 %vm130_vm1, %v103_v18 }
  0x50   :  { %3286 = vmatpush3.msra.mxu0 %v3938_v8  ;;  %231 = vmatprep.mubr.f32.mxu0 %v3837_v0 }
  0x51   :  { %3287 = vmatprep.subr.mxu0 %v3837_v0  ;;  %3253 = vmatpush3.msra.mxu1 %v3972_v17 }
  0x52   :  { %3288 = vmatpush3.msra.mxu0 %v3942_v11  ;;  %3254 = vmatprep.subr.mxu1 %v3837_v0 }
  0x53   :  { %3303 = vmatprep.subr.mxu0 %v3837_v0  ;;  %3255 = vmatpush3.msra.mxu1 %v3977_v19 }
  0x54   :  { %3061 = vmatmul.mubr.msk.f32.gmra.mxu0 %vm130_vm1, %v104_v20  ;;  %3257 = vmatmul.mubr.f32.vlgmr.msra.gmra.mxu1 %v3837_v0 }
  0x55   :  { %237 = vmatprep.mubr.f32.mxu0 %v3837_v0  ;;  %3259 = vmatprep.subr.mxu1 %v3837_v0 }
  0x56   :  { %3267 = vmatprep.mubr.msk.f32.mxu1 %vm3838_vm0, %v3837_v0  ;;  %3260 = vmatpush3.msra.mxu1 %v3932_v2 }
  0x57   :  { %3261 = vmatprep.subr.mxu1 %v3837_v0 }
  0x58   :  { %3262 = vmatpush3.msra.mxu1 %v3935_v5  ;;  %3062 = vmatmul.mubr.msk.f32.gmra.mxu0 %vm130_vm1, %v105_v23 }
  0x59   :  { %3263 = vmatprep.subr.mxu1 %v3837_v0  ;;  %243 = vmatprep.mubr.f32.mxu0 %v3837_v0 }
  0x5a   :  { %3264 = vmatpush3.msra.mxu1 %v3938_v8 }
  0x5b   :  { %3265 = vmatprep.subr.mxu1 %v3837_v0 }
  0x5c   :  { %3266 = vmatpush3.msra.mxu1 %v3942_v11  ;;  %3063 = vmatmul.mubr.msk.f32.gmra.mxu0 %vm130_vm1, %v106_v24 }
  0x5d   :  { %3270 = vmatprep.subr.mxu1 %v3837_v0  ;;  %249 = vmatprep.mubr.f32.mxu0 %v3837_v0 }
  0x60   :  { %3064 = vmatmul.mubr.msk.f32.gmra.mxu0 %vm130_vm1, %v107_v28 }
  0x61   :  { %255 = vmatprep.mubr.f32.mxu0 %v3837_v0 }
  0x64   :  { %3065 = vmatmul.mubr.msk.f32.gmra.mxu0 %vm130_vm1, %v108_v33 }
  0x65   :  { %261 = vmatprep.mubr.f32.mxu0 %v3837_v0 }
  0x68   :  { %3066 = vmatmul.mubr.msk.f32.gmra.mxu0 %vm130_vm1, %v109_v40 }
  0x69   :  { %3289 = vmatprep.mubr.msk.f32.mxu0 %vm3838_vm0, %v3837_v0 }
  0xbb   :  { %v4008_v29 = vpop.permute.xlu0 %456 }
 0x108   :  { %v366_v31 = vpop.f32.mrf.mxu1  ;;  %v221_v35 = vpop.f32.mrf.mxu0 }
 0x109   :  { %v459_v34 = vadd.f32 %v4008_v29, %v366_v31  ;;  %v4018_v36 = vadd.f32 %v221_v35, %v4010_v30 }
 0x10a   :  { %v3247_v37 = vpop.f32.mrf.mxu1  ;;  %v223_v38 = vpop.f32.mrf.mxu0 }
 0x10b   :  { %461 = vrot.lane.b32.xlu0 %v459_v34, %s3839_s19  ;;  %268 = vst [vmem:[#allocation2] sm:$0xff] %v4018_v36  ;;  %v224_v39 = vadd.f32 %v223_v38, %v4013_v32  ;;  %v444_v41 = vadd.f32 %v366_v31, %v4018_v36 }
 0x10d   :  { %270 = vst.msk [vmem:[#allocation2 + $0x8] sm:$0xff] %vm269_vm2, %v224_v39  ;;  %v3068_v44 = vmul.f32 -1.442695, %v444_v41 }
 0x10f   :  { %3487 = vpow2.f32 %v3068_v44  ;;  %v227_v51 = vpop.f32.mrf.mxu0 }
 0x110   :  { %v4037_v52 = vadd.f32 %v227_v51, %v4010_v30 }
 0x111   :  { %v229_v53 = vpop.f32.mrf.mxu0 }
 0x112   :  { %v230_v54 = vadd.f32 %v229_v53, %v4013_v32 }
 0x114   :  { %v436_v42 = vpop.f32.mrf.mxu1  ;;  %v233_v55 = vpop.f32.mrf.mxu0  ;;  %272 = vst.msk [vmem:[#allocation2 + $0x18] sm:$0xff] %vm269_vm2, %v230_v54 }
 0x115   :  { %483 = vrot.lane.b32.xlu0 %v436_v42, %s3840_s2  ;;  %v4042_v56 = vadd.f32 %v233_v55, %v4010_v30 }
 0x116   :  { %v3258_v43 = vpop.f32.mrf.mxu1  ;;  %v235_v57 = vpop.f32.mrf.mxu0 }
 0x117   :  { %v236_v58 = vadd.f32 %v235_v57, %v4013_v32 }
 0x118   :  { %v239_v59 = vpop.f32.mrf.mxu0 }
 0x119   :  { %274 = vst.msk [vmem:[#allocation2 + $0x28] sm:$0xff] %vm269_vm2, %v236_v58  ;;  %v4047_v60 = vadd.f32 %v239_v59, %v4010_v30 }
 0x11a   :  { %v241_v61 = vpop.f32.mrf.mxu0 }
 0x11b   :  { %v242_v62 = vadd.f32 %v241_v61, %v4013_v32 }
 0x11c   :  { %v3488_v45 = vpop.eup %3487  ;;  %v245_v63 = vpop.f32.mrf.mxu0 }
 0x11d   :  { %v448_v46 = vadd.f32 1.0, %v3488_v45  ;;  %276 = vst.msk [vmem:[#allocation2 + $0x38] sm:$0xff] %vm269_vm2, %v242_v62  ;;  %v4052_v1 = vadd.f32 %v245_v63, %v4010_v30 }
 0x11e   :  { %v247_v3 = vpop.f32.mrf.mxu0 }
 0x11f   :  { %3489 = vrcp.f32 %v448_v46  ;;  %v248_v4 = vadd.f32 %v247_v3, %v4013_v32 }
 0x120   :  { %v251_v6 = vpop.f32.mrf.mxu0 }
 0x121   :  { %278 = vst.msk [vmem:[#allocation2 + $0x48] sm:$0xff] %vm269_vm2, %v248_v4  ;;  %v4057_v7 = vadd.f32 %v251_v6, %v4010_v30 }
 0x122   :  { %v253_v9 = vpop.f32.mrf.mxu0 }
 0x123   :  { %v254_v10 = vadd.f32 %v253_v9, %v4013_v32 }
 0x124   :  { %v257_v12 = vpop.f32.mrf.mxu0 }
 0x125   :  { %280 = vst.msk [vmem:[#allocation2 + $0x58] sm:$0xff] %vm269_vm2, %v254_v10  ;;  %v4062_v13 = vadd.f32 %v257_v12, %v4010_v30 }
 0x126   :  { %v259_v14 = vpop.f32.mrf.mxu0 }
 0x127   :  { %v260_v18 = vadd.f32 %v259_v14, %v4013_v32 }
 0x128   :  { %v263_v20 = vpop.f32.mrf.mxu0 }
 0x129   :  { %282 = vst.msk [vmem:[#allocation2 + $0x68] sm:$0xff] %vm269_vm2, %v260_v18  ;;  %v264_v21 = vadd.f32 %v263_v20, %v4010_v30 }
 0x12a   :  { %v265_v23 = vpop.f32.mrf.mxu0 }
 0x12b   :  { %283 = vst [vmem:[#allocation2 + $0x70] sm:$0xff] %v264_v21  ;;  %v266_v24 = vadd.f32 %v265_v23, %v4013_v32 }
 0x12c   :  { %v3490_v47 = vpop.eup %3489 }
 0x12d   :  { %284 = vst.msk [vmem:[#allocation2 + $0x78] sm:$0xff] %vm269_vm2, %v266_v24 }
 0x134   :  { %v443_v45 = vld [vmem:[#allocation2 + $0x78] sm:$0xff] }
 0x17d   :  { %v462_v48 = vpop.permute.xlu0 %461 }
 0x17e   :  { %v464_v49 = vmul.f32 %v3490_v47, %v462_v48 }
 0x180   :  { %466 = vrot.lane.b32.xlu1 %v464_v49, %s3839_s19 }
 0x184   :  { %505 = vrot.lane.b32.xlu1 %v3072_v50, %s3839_s19 }
 0x187   :  { %v484_v32 = vpop.permute.xlu0 %483 }
 0x188   :  { %v486_v33 = vadd.f32 %v484_v32, %v264_v21  ;;  %v487_v50 = vadd.f32 %v484_v32, %v443_v45 }
 0x18a   :  { %v3070_v34 = vmul.f32 -1.442695, %v486_v33  ;;  %v3071_v51 = vmul.f32 -1.442695, %v487_v50 }
 0x1f2   :  { %v467_v25 = vpop.permute.xlu1 %466 }
 0x1f3   :  { %v469_v26 = vadd.f32 %v467_v25, %v4018_v36 }
 0x1f5   :  { %3491 = vtanh.f32 %v469_v26 }
 0x1f6   :  { %v4071_v31 = vpop.permute.xlu1 %505  ;;  %3493 = vpow2.f32 %v3070_v34 }
 0x1f7   :  { %v508_v30 = vadd.f32 %v4071_v31, %v436_v42 }
 0x202   :  { %v3492_v27 = vpop.eup %3491 }
 0x203   :  { %478 = vrot.lane.b32.xlu0 %v3492_v27, %s3840_s2  ;;  %v471_v28 = vsub.f32 0.0, %v3492_v27  ;;  %v3494_v35 = vpop.eup %3493 }
 0x204   :  { %v494_v36 = vadd.f32 1.0, %v3494_v35 }
 0x205   :  { %473 = vrot.lane.b32.xlu1 %v471_v28, %s3840_s2 }
 0x206   :  { %3495 = vrcp.f32 %v494_v36 }
 0x209   :  { %510 = vrot.lane.b32.xlu1 %v508_v30, %s3841_s4 }
 0x213   :  { %v3496_v39 = vpop.eup %3495 }
 0x275   :  { %v479_v40 = vpop.permute.xlu0 %478 }
 0x277   :  { %v474_v37 = vpop.permute.xlu1 %473 }
 0x278   :  { %v476_v38 = vmul.f32 %v3490_v47, %v474_v37 }
 0x27a   :  { %v4076_v41 = vadd.f32 %v479_v40, %v476_v38 }
 0x27b   :  { %v511_v43 = vpop.permute.xlu1 %510 }
 0x27c   :  { %v513_v44 = vmul.f32 %v3496_v39, %v511_v43  ;;  %532 = vrot.lane.b32.xlu0 %v4076_v41, %s3840_s2  ;;  %v691_v43 = vld [vmem:[#allocation2 + $0x68] sm:$0xff] }
 0x27e   :  { %515 = vrot.lane.b32.xlu1 %v513_v44, %s3839_s19 }
 0x2ee   :  { %v533_v42 = vpop.permute.xlu0 %532 }
 0x2ef   :  { %535 = vst.msk [vmem:[#allocation3] sm:$0xff] %vm130_vm1, %v533_v42  ;;  %3268 = vmatmul.mubr.msk.f32.vlgmr.msra.gmra.mxu1 %vm130_vm1, %v533_v42 }
 0x2f0   :  { %v516_v46 = vpop.permute.xlu1 %515  ;;  %3271 = vmatpush3.msra.mxu1 %v3966_v15  ;;  %3278 = vmatprep.mubr.msk.f32.mxu1 %vm3838_vm0, %v3837_v0 }
 0x2f1   :  { %v518_v47 = vadd.f32 %v516_v46, %v443_v45  ;;  %3272 = vmatprep.subr.mxu1 %v3837_v0 }
 0x2f2   :  { %3273 = vmatpush3.msra.mxu1 %v3968_v16 }
 0x2f3   :  { %3497 = vtanh.f32 %v518_v47  ;;  %3274 = vmatprep.subr.mxu1 %v3837_v0 }
 0x2f4   :  { %3275 = vmatpush3.msra.mxu1 %v3972_v17  ;;  %3499 = vpow2.f32 %v3071_v51 }
 0x2f5   :  { %3276 = vmatprep.subr.mxu1 %v3837_v0 }
 0x2f6   :  { %3277 = vmatpush3.msra.mxu1 %v3977_v19 }
 0x2f7   :  { %3292 = vmatprep.subr.mxu1 %v3837_v0 }
 0x300   :  { %v3498_v48 = vpop.eup %3497 }
 0x301   :  { %527 = vrot.lane.b32.xlu1 %v3498_v48, %s3840_s2  ;;  %v520_v49 = vsub.f32 0.0, %v3498_v48  ;;  %v3500_v53 = vpop.eup %3499 }
 0x302   :  { %v495_v54 = vadd.f32 1.0, %v3500_v53 }
 0x303   :  { %522 = vrot.lane.b32.xlu0 %v520_v49, %s3840_s2 }
 0x304   :  { %3501 = vrcp.f32 %v495_v54 }
 0x311   :  { %v3502_v55 = vpop.eup %3501 }
 0x373   :  { %v528_v59 = vpop.permute.xlu1 %527 }
 0x375   :  { %v523_v57 = vpop.permute.xlu0 %522 }
 0x376   :  { %v525_v58 = vmul.f32 %v3502_v55, %v523_v57 }
 0x378   :  { %v4095_v61 = vadd.f32 %v528_v59, %v525_v58 }
 0x37a   :  { %3279 = vmatmul.mubr.msk.f32.vlgmr.msra.gmra.mxu1 %vm130_vm1, %v4095_v61 }
 0x37b   :  { %3293 = vmatpush3.msra.mxu1 %v3966_v15  ;;  %3300 = vmatprep.mubr.msk.f32.mxu1 %vm3838_vm0, %v3837_v0 }
 0x37c   :  { %3294 = vmatprep.subr.mxu1 %v3837_v0 }
 0x37d   :  { %3295 = vmatpush3.msra.mxu1 %v3968_v16 }
 0x37e   :  { %3296 = vmatprep.subr.mxu1 %v3837_v0 }
 0x37f   :  { %3297 = vmatpush3.msra.mxu1 %v3972_v17 }
 0x380   :  { %3298 = vmatprep.subr.mxu1 %v3837_v0 }
 0x381   :  { %3299 = vmatpush3.msra.mxu1 %v3977_v19 }
 0x382   :  { %3314 = vmatprep.subr.mxu1 %v3837_v0 }
 0x3af   :  { %v611_v62 = vpop.f32.mrf.mxu1 }
 0x3b0   :  { %v699_v63 = vadd.f32 %v611_v62, %v4008_v29  ;;  %v692_v4 = vadd.f32 %v611_v62, %v4037_v52 }
 0x3b1   :  { %v3269_v3 = vpop.f32.mrf.mxu1 }
 0x3b2   :  { %701 = vrot.lane.b32.xlu0 %v699_v63, %s3839_s19  ;;  %v3075_v6 = vmul.f32 -1.442695, %v692_v4 }
 0x3b4   :  { %3503 = vpow2.f32 %v3075_v6 }
 0x3c1   :  { %v3504_v9 = vpop.eup %3503 }
 0x3c2   :  { %v696_v10 = vadd.f32 1.0, %v3504_v9 }
 0x3c4   :  { %3505 = vrcp.f32 %v696_v10 }
 0x3d1   :  { %v3506_v12 = vpop.eup %3505 }
 0x424   :  { %v702_v14 = vpop.permute.xlu0 %701 }
 0x425   :  { %v704_v18 = vmul.f32 %v3506_v12, %v702_v14 }
 0x427   :  { %706 = vrot.lane.b32.xlu1 %v704_v18, %s3839_s19 }
 0x43a   :  { %v683_v20 = vpop.f32.mrf.mxu1 }
 0x43b   :  { %719 = vrot.lane.b32.xlu0 %v683_v20, %s3840_s2  ;;  %v736_v23 = vadd.f32 %v683_v20, %v4071_v31 }
 0x43c   :  { %v3280_v21 = vpop.f32.mrf.mxu1 }
 0x43f   :  { %738 = vrot.lane.b32.xlu0 %v736_v23, %s3841_s4 }
 0x499   :  { %v707_v24 = vpop.permute.xlu1 %706 }
 0x49a   :  { %v709_v25 = vadd.f32 %v707_v24, %v4037_v52 }
 0x49c   :  { %3507 = vtanh.f32 %v709_v25 }
 0x4a9   :  { %v3508_v26 = vpop.eup %3507 }
 0x4aa   :  { %712 = vrot.lane.b32.xlu1 %v3508_v26, %s3840_s2 }
 0x4ad   :  { %v720_v27 = vpop.permute.xlu0 %719 }
 0x4ae   :  { %v722_v28 = vadd.f32 %v720_v27, %v4062_v13 }
 0x4b0   :  { %v3076_v30 = vmul.f32 -1.442695, %v722_v28 }
 0x4b1   :  { %v739_v35 = vpop.permute.xlu0 %738 }
 0x4b2   :  { %3509 = vpow2.f32 %v3076_v30 }
 0x4bf   :  { %v3510_v32 = vpop.eup %3509 }
 0x4c0   :  { %v730_v33 = vadd.f32 1.0, %v3510_v32 }
 0x4c2   :  { %3511 = vrcp.f32 %v730_v33 }
 0x4cf   :  { %v3512_v34 = vpop.eup %3511 }
 0x4d0   :  { %v741_v36 = vmul.f32 %v3512_v34, %v739_v35  ;;  %v915_v34 = vld [vmem:[#allocation2 + $0x58] sm:$0xff] }
 0x4d2   :  { %743 = vrot.lane.b32.xlu0 %v741_v36, %s3839_s19 }
 0x51c   :  { %v713_v37 = vpop.permute.xlu1 %712 }
 0x51d   :  { %v715_v38 = vsub.f32 %v4076_v41, %v713_v37  ;;  %v723_v41 = vadd.f32 %v720_v27, %v691_v43 }
 0x51f   :  { %v716_v39 = vmul.f32 %v3506_v12, %v715_v38  ;;  %v3077_v47 = vmul.f32 -1.442695, %v723_v41 }
 0x521   :  { %v4121_v40 = vadd.f32 %v716_v39, %v713_v37 }
 0x523   :  { %756 = vrot.lane.b32.xlu1 %v4121_v40, %s3840_s2 }
 0x544   :  { %v744_v44 = vpop.permute.xlu0 %743 }
 0x545   :  { %v746_v42 = vadd.f32 %v744_v44, %v691_v43 }
 0x547   :  { %3513 = vtanh.f32 %v746_v42 }
 0x548   :  { %3515 = vpow2.f32 %v3077_v47 }
 0x554   :  { %v3514_v45 = vpop.eup %3513 }
 0x555   :  { %749 = vrot.lane.b32.xlu1 %v3514_v45, %s3840_s2  ;;  %v3516_v48 = vpop.eup %3515 }
 0x556   :  { %v731_v49 = vadd.f32 1.0, %v3516_v48 }
 0x558   :  { %3517 = vrcp.f32 %v731_v49 }
 0x565   :  { %v3518_v53 = vpop.eup %3517 }
 0x595   :  { %v757_v46 = vpop.permute.xlu1 %756 }
 0x596   :  { %760 = vst.msk [vmem:[#allocation3 + $0x8] sm:$0xff] %vm130_vm1, %v757_v46  ;;  %3290 = vmatmul.mubr.msk.f32.vlgmr.msra.gmra.mxu0 %vm130_vm1, %v757_v46 }
 0x597   :  { %3304 = vmatpush3.msra.mxu0 %v3932_v2  ;;  %3311 = vmatprep.mubr.msk.f32.mxu0 %vm3838_vm0, %v3837_v0 }
 0x598   :  { %3305 = vmatprep.subr.mxu0 %v3837_v0 }
 0x599   :  { %3306 = vmatpush3.msra.mxu0 %v3935_v5 }
 0x59a   :  { %3307 = vmatprep.subr.mxu0 %v3837_v0 }
 0x59b   :  { %3308 = vmatpush3.msra.mxu0 %v3938_v8 }
 0x59c   :  { %3309 = vmatprep.subr.mxu0 %v3837_v0 }
 0x59d   :  { %3310 = vmatpush3.msra.mxu0 %v3942_v11 }
 0x59e   :  { %3325 = vmatprep.subr.mxu0 %v3837_v0 }
 0x5c7   :  { %v750_v50 = vpop.permute.xlu1 %749 }
 0x5c8   :  { %v752_v51 = vsub.f32 %v4095_v61, %v750_v50 }
 0x5ca   :  { %v753_v54 = vmul.f32 %v3518_v53, %v752_v51 }
 0x5cc   :  { %v4139_v55 = vadd.f32 %v753_v54, %v750_v50 }
 0x5ce   :  { %3301 = vmatmul.mubr.msk.f32.vlgmr.msra.gmra.mxu1 %vm130_vm1, %v4139_v55 }
 0x5cf   :  { %3315 = vmatpush3.msra.mxu1 %v3966_v15  ;;  %3322 = vmatprep.mubr.msk.f32.mxu1 %vm3838_vm0, %v3837_v0 }
 0x5d0   :  { %3316 = vmatprep.subr.mxu1 %v3837_v0 }
 0x5d1   :  { %3317 = vmatpush3.msra.mxu1 %v3968_v16 }
 0x5d2   :  { %3318 = vmatprep.subr.mxu1 %v3837_v0 }
 0x5d3   :  { %3319 = vmatpush3.msra.mxu1 %v3972_v17 }
 0x5d4   :  { %3320 = vmatprep.subr.mxu1 %v3837_v0 }
 0x5d5   :  { %3321 = vmatpush3.msra.mxu1 %v3977_v19 }
 0x5d6   :  { %3336 = vmatprep.subr.mxu1 %v3837_v0 }
 0x656   :  { %v835_v57 = vpop.f32.mrf.mxu0 }
 0x657   :  { %v923_v58 = vadd.f32 %v835_v57, %v4008_v29  ;;  %v916_v3 = vadd.f32 %v835_v57, %v4042_v56 }
 0x658   :  { %v3291_v59 = vpop.f32.mrf.mxu0 }
 0x659   :  { %925 = vrot.lane.b32.xlu0 %v923_v58, %s3839_s19  ;;  %v3080_v4 = vmul.f32 -1.442695, %v916_v3 }
 0x65b   :  { %3519 = vpow2.f32 %v3080_v4 }
 0x668   :  { %v3520_v6 = vpop.eup %3519 }
 0x669   :  { %v920_v9 = vadd.f32 1.0, %v3520_v6 }
 0x66b   :  { %3521 = vrcp.f32 %v920_v9 }
 0x678   :  { %v3522_v10 = vpop.eup %3521 }
 0x68e   :  { %v907_v62 = vpop.f32.mrf.mxu1 }
 0x68f   :  { %943 = vrot.lane.b32.xlu0 %v907_v62, %s3840_s2  ;;  %v960_v18 = vadd.f32 %v907_v62, %v4071_v31 }
 0x690   :  { %v3302_v63 = vpop.f32.mrf.mxu1 }
 0x6cb   :  { %v926_v12 = vpop.permute.xlu0 %925 }
 0x6cc   :  { %v928_v14 = vmul.f32 %v3522_v10, %v926_v12 }
 0x6ce   :  { %930 = vrot.lane.b32.xlu1 %v928_v14, %s3839_s19 }
 0x6d2   :  { %962 = vrot.lane.b32.xlu1 %v960_v18, %s3841_s4 }
 0x701   :  { %v944_v20 = vpop.permute.xlu0 %943 }
 0x702   :  { %v946_v21 = vadd.f32 %v944_v20, %v4057_v7  ;;  %v947_v42 = vadd.f32 %v944_v20, %v915_v34 }
 0x704   :  { %v3081_v23 = vmul.f32 -1.442695, %v946_v21  ;;  %v3082_v45 = vmul.f32 -1.442695, %v947_v42 }
 0x706   :  { %3523 = vpow2.f32 %v3081_v23 }
 0x713   :  { %v3524_v24 = vpop.eup %3523 }
 0x714   :  { %v954_v25 = vadd.f32 1.0, %v3524_v24 }
 0x716   :  { %3525 = vrcp.f32 %v954_v25 }
 0x723   :  { %v3526_v28 = vpop.eup %3525 }
 0x740   :  { %v931_v26 = vpop.permute.xlu1 %930 }
 0x741   :  { %v933_v27 = vadd.f32 %v931_v26, %v4042_v56 }
 0x743   :  { %3527 = vtanh.f32 %v933_v27 }
 0x744   :  { %v963_v30 = vpop.permute.xlu1 %962 }
 0x745   :  { %v965_v32 = vmul.f32 %v3526_v28, %v963_v30 }
 0x747   :  { %967 = vrot.lane.b32.xlu1 %v965_v32, %s3839_s19  ;;  %v1139_v32 = vld [vmem:[#allocation2 + $0x48] sm:$0xff] }
 0x750   :  { %v3528_v33 = vpop.eup %3527 }
 0x751   :  { %936 = vrot.lane.b32.xlu0 %v3528_v33, %s3840_s2 }
 0x7b9   :  { %v968_v35 = vpop.permute.xlu1 %967 }
 0x7ba   :  { %v970_v36 = vadd.f32 %v968_v35, %v915_v34 }
 0x7bc   :  { %3529 = vtanh.f32 %v970_v36 }
 0x7bd   :  { %3531 = vpow2.f32 %v3082_v45 }
 0x7c3   :  { %v937_v37 = vpop.permute.xlu0 %936 }
 0x7c4   :  { %v939_v38 = vsub.f32 %v4121_v40, %v937_v37 }
 0x7c6   :  { %v940_v39 = vmul.f32 %v3522_v10, %v939_v38 }
 0x7c8   :  { %v4165_v43 = vadd.f32 %v940_v39, %v937_v37 }
 0x7c9   :  { %v3530_v44 = vpop.eup %3529 }
 0x7ca   :  { %973 = vrot.lane.b32.xlu1 %v3530_v44, %s3840_s2  ;;  %980 = vrot.lane.b32.xlu0 %v4165_v43, %s3840_s2  ;;  %v3532_v46 = vpop.eup %3531 }
 0x7cb   :  { %v955_v41 = vadd.f32 1.0, %v3532_v46 }
 0x7cd   :  { %3533 = vrcp.f32 %v955_v41 }
 0x7da   :  { %v3534_v40 = vpop.eup %3533 }
 0x83c   :  { %v974_v47 = vpop.permute.xlu1 %973  ;;  %v981_v48 = vpop.permute.xlu0 %980 }
 0x83d   :  { %v976_v49 = vsub.f32 %v4139_v55, %v974_v47  ;;  %984 = vst.msk [vmem:[#allocation3 + $0x10] sm:$0xff] %vm130_vm1, %v981_v48  ;;  %3312 = vmatmul.mubr.msk.f32.vlgmr.msra.gmra.mxu0 %vm130_vm1, %v981_v48 }
 0x83e   :  { %3326 = vmatpush3.msra.mxu0 %v3932_v2  ;;  %3333 = vmatprep.mubr.msk.f32.mxu0 %vm3838_vm0, %v3837_v0 }
 0x83f   :  { %v977_v50 = vmul.f32 %v3534_v40, %v976_v49  ;;  %3327 = vmatprep.subr.mxu0 %v3837_v0 }
 0x840   :  { %3328 = vmatpush3.msra.mxu0 %v3935_v5 }
 0x841   :  { %v4178_v51 = vadd.f32 %v977_v50, %v974_v47  ;;  %3329 = vmatprep.subr.mxu0 %v3837_v0 }
 0x842   :  { %3330 = vmatpush3.msra.mxu0 %v3938_v8 }
 0x843   :  { %3323 = vmatmul.mubr.msk.f32.vlgmr.msra.gmra.mxu1 %vm130_vm1, %v4178_v51  ;;  %3331 = vmatprep.subr.mxu0 %v3837_v0 }
 0x844   :  { %3337 = vmatpush3.msra.mxu1 %v3966_v15  ;;  %3344 = vmatprep.mubr.msk.f32.mxu1 %vm3838_vm0, %v3837_v0 }
 0x845   :  { %3338 = vmatprep.subr.mxu1 %v3837_v0  ;;  %3332 = vmatpush3.msra.mxu0 %v3942_v11 }
 0x846   :  { %3339 = vmatpush3.msra.mxu1 %v3968_v16  ;;  %3347 = vmatprep.subr.mxu0 %v3837_v0 }
 0x847   :  { %3340 = vmatprep.subr.mxu1 %v3837_v0 }
 0x848   :  { %3341 = vmatpush3.msra.mxu1 %v3972_v17 }
 0x849   :  { %3342 = vmatprep.subr.mxu1 %v3837_v0 }
 0x84a   :  { %3343 = vmatpush3.msra.mxu1 %v3977_v19 }
 0x84b   :  { %3358 = vmatprep.subr.mxu1 %v3837_v0 }
 0x8fd   :  { %v1059_v53 = vpop.f32.mrf.mxu0 }
 0x8fe   :  { %v1147_v54 = vadd.f32 %v1059_v53, %v4008_v29  ;;  %v1140_v63 = vadd.f32 %v1059_v53, %v4047_v60 }
 0x8ff   :  { %v3313_v57 = vpop.f32.mrf.mxu0 }
 0x900   :  { %1149 = vrot.lane.b32.xlu0 %v1147_v54, %s3839_s19  ;;  %v3085_v3 = vmul.f32 -1.442695, %v1140_v63 }
 0x902   :  { %3535 = vpow2.f32 %v3085_v3 }
 0x903   :  { %v1131_v58 = vpop.f32.mrf.mxu1 }
 0x904   :  { %1167 = vrot.lane.b32.xlu1 %v1131_v58, %s3840_s2  ;;  %v1184_v62 = vadd.f32 %v1131_v58, %v4071_v31 }
 0x905   :  { %v3324_v59 = vpop.f32.mrf.mxu1 }
 0x908   :  { %1186 = vrot.lane.b32.xlu1 %v1184_v62, %s3841_s4 }
 0x90f   :  { %v3536_v4 = vpop.eup %3535 }
 0x910   :  { %v1144_v6 = vadd.f32 1.0, %v3536_v4 }
 0x912   :  { %3537 = vrcp.f32 %v1144_v6 }
 0x91f   :  { %v3538_v9 = vpop.eup %3537 }
 0x972   :  { %v1150_v10 = vpop.permute.xlu0 %1149 }
 0x973   :  { %v1152_v12 = vmul.f32 %v3538_v9, %v1150_v10 }
 0x975   :  { %1154 = vrot.lane.b32.xlu0 %v1152_v12, %s3839_s19 }
 0x976   :  { %v1168_v14 = vpop.permute.xlu1 %1167 }
 0x977   :  { %v1170_v18 = vadd.f32 %v1168_v14, %v4052_v1  ;;  %v1171_v36 = vadd.f32 %v1168_v14, %v1139_v32 }
 0x979   :  { %v3086_v20 = vmul.f32 -1.442695, %v1170_v18  ;;  %v3087_v39 = vmul.f32 -1.442695, %v1171_v36 }
 0x97a   :  { %v1187_v25 = vpop.permute.xlu1 %1186 }
 0x97b   :  { %3539 = vpow2.f32 %v3086_v20 }
 0x988   :  { %v3540_v21 = vpop.eup %3539 }
 0x989   :  { %v1178_v23 = vadd.f32 1.0, %v3540_v21 }
 0x98b   :  { %3541 = vrcp.f32 %v1178_v23  ;;  %v1361_v23 = vld [vmem:[#allocation2 + $0x38] sm:$0xff] }
 0x998   :  { %v3542_v24 = vpop.eup %3541 }
 0x999   :  { %v1189_v26 = vmul.f32 %v3542_v24, %v1187_v25 }
 0x99b   :  { %1191 = vrot.lane.b32.xlu1 %v1189_v26, %s3839_s19 }
 0x9e7   :  { %v1155_v27 = vpop.permute.xlu0 %1154 }
 0x9e8   :  { %v1157_v28 = vadd.f32 %v1155_v27, %v4047_v60 }
 0x9ea   :  { %3543 = vtanh.f32 %v1157_v28 }
 0x9f7   :  { %v3544_v30 = vpop.eup %3543 }
 0x9f8   :  { %1160 = vrot.lane.b32.xlu0 %v3544_v30, %s3840_s2 }
 0xa0d   :  { %v1192_v33 = vpop.permute.xlu1 %1191 }
 0xa0e   :  { %v1194_v34 = vadd.f32 %v1192_v33, %v1139_v32 }
 0xa10   :  { %3545 = vtanh.f32 %v1194_v34 }
 0xa11   :  { %3547 = vpow2.f32 %v3087_v39 }
 0xa1d   :  { %v3546_v35 = vpop.eup %3545 }
 0xa1e   :  { %1197 = vrot.lane.b32.xlu1 %v3546_v35, %s3840_s2  ;;  %v3548_v45 = vpop.eup %3547 }
 0xa1f   :  { %v1179_v46 = vadd.f32 1.0, %v3548_v45 }
 0xa21   :  { %3549 = vrcp.f32 %v1179_v46 }
 0xa2e   :  { %v3550_v48 = vpop.eup %3549 }
 0xa6a   :  { %v1161_v37 = vpop.permute.xlu0 %1160 }
 0xa6b   :  { %v1163_v38 = vsub.f32 %v4165_v43, %v1161_v37 }
 0xa6d   :  { %v1164_v44 = vmul.f32 %v3538_v9, %v1163_v38 }
 0xa6f   :  { %v4210_v42 = vadd.f32 %v1164_v44, %v1161_v37 }
 0xa71   :  { %1204 = vrot.lane.b32.xlu0 %v4210_v42, %s3840_s2 }
 0xa90   :  { %v1198_v41 = vpop.permute.xlu1 %1197 }
 0xa91   :  { %v1200_v47 = vsub.f32 %v4178_v51, %v1198_v41 }
 0xa93   :  { %v1201_v49 = vmul.f32 %v3550_v48, %v1200_v47 }
 0xa95   :  { %v4215_v40 = vadd.f32 %v1201_v49, %v1198_v41 }
 0xa97   :  { %3345 = vmatmul.mubr.msk.f32.vlgmr.msra.gmra.mxu1 %vm130_vm1, %v4215_v40 }
 0xa98   :  { %3359 = vmatpush3.msra.mxu1 %v3966_v15  ;;  %3366 = vmatprep.mubr.msk.f32.mxu1 %vm3838_vm0, %v3837_v0 }
 0xa99   :  { %3360 = vmatprep.subr.mxu1 %v3837_v0 }
 0xa9a   :  { %3361 = vmatpush3.msra.mxu1 %v3968_v16 }
 0xa9b   :  { %3362 = vmatprep.subr.mxu1 %v3837_v0 }
 0xa9c   :  { %3363 = vmatpush3.msra.mxu1 %v3972_v17 }
 0xa9d   :  { %3364 = vmatprep.subr.mxu1 %v3837_v0 }
 0xa9e   :  { %3365 = vmatpush3.msra.mxu1 %v3977_v19 }
 0xa9f   :  { %3380 = vmatprep.subr.mxu1 %v3837_v0 }
 0xae3   :  { %v1205_v43 = vpop.permute.xlu0 %1204 }
 0xae4   :  { %1208 = vst.msk [vmem:[#allocation3 + $0x18] sm:$0xff] %vm130_vm1, %v1205_v43  ;;  %3334 = vmatmul.mubr.msk.f32.vlgmr.msra.gmra.mxu0 %vm130_vm1, %v1205_v43 }
 0xae5   :  { %3348 = vmatpush3.msra.mxu0 %v3932_v2  ;;  %3355 = vmatprep.mubr.msk.f32.mxu0 %vm3838_vm0, %v3837_v0 }
 0xae6   :  { %3349 = vmatprep.subr.mxu0 %v3837_v0 }
 0xae7   :  { %3350 = vmatpush3.msra.mxu0 %v3935_v5 }
 0xae8   :  { %3351 = vmatprep.subr.mxu0 %v3837_v0 }
 0xae9   :  { %3352 = vmatpush3.msra.mxu0 %v3938_v8 }
 0xaea   :  { %3353 = vmatprep.subr.mxu0 %v3837_v0 }
 0xaeb   :  { %3354 = vmatpush3.msra.mxu0 %v3942_v11 }
 0xaec   :  { %3369 = vmatprep.subr.mxu0 %v3837_v0 }
 0xb57   :  { %v1355_v50 = vpop.f32.mrf.mxu1 }
 0xb58   :  { %1389 = vrot.lane.b32.xlu1 %v1355_v50, %s3840_s2  ;;  %v1406_v53 = vadd.f32 %v1355_v50, %v4071_v31 }
 0xb59   :  { %v3346_v2 = vpop.f32.mrf.mxu1 }
 0xb5c   :  { %1408 = vrot.lane.b32.xlu1 %v1406_v53, %s3841_s4 }
 0xba4   :  { %v1283_v54 = vpop.f32.mrf.mxu0 }
 0xba5   :  { %v1369_v5 = vadd.f32 %v1283_v54, %v4008_v29  ;;  %v1362_v58 = vadd.f32 %v1283_v54, %v4052_v1 }
 0xba6   :  { %v3335_v57 = vpop.f32.mrf.mxu0 }
 0xba7   :  { %1371 = vrot.lane.b32.xlu0 %v1369_v5, %s3839_s19  ;;  %v3090_v59 = vmul.f32 -1.442695, %v1362_v58 }
 0xba9   :  { %3551 = vpow2.f32 %v3090_v59 }
 0xbb6   :  { %v3552_v63 = vpop.eup %3551 }
 0xbb7   :  { %v1366_v4 = vadd.f32 1.0, %v3552_v63 }
 0xbca   :  { %v1390_v8 = vpop.permute.xlu1 %1389 }
 0xbcb   :  { %v1392_v11 = vadd.f32 %v1390_v8, %v4047_v60  ;;  %v1393_v28 = vadd.f32 %v1390_v8, %v1361_v23 }
 0xbcd   :  { %v3091_v62 = vmul.f32 -1.442695, %v1392_v11  ;;  %v3092_v30 = vmul.f32 -1.442695, %v1393_v28 }
 0xbce   :  { %v1409_v18 = vpop.permute.xlu1 %1408 }
 0xbcf   :  { %3553 = vpow2.f32 %v3091_v62 }
 0xbd0   :  { %3555 = vrcp.f32 %v1366_v4 }
 0xbdc   :  { %v3554_v3 = vpop.eup %3553 }
 0xbdd   :  { %v1400_v6 = vadd.f32 1.0, %v3554_v3  ;;  %v3556_v9 = vpop.eup %3555 }
 0xbdf   :  { %3557 = vrcp.f32 %v1400_v6 }
 0xbec   :  { %v3558_v14 = vpop.eup %3557 }
 0xbed   :  { %v1411_v20 = vmul.f32 %v3558_v14, %v1409_v18 }
 0xc19   :  { %v1372_v10 = vpop.permute.xlu0 %1371 }
 0xc1a   :  { %v1374_v12 = vmul.f32 %v3556_v9, %v1372_v10  ;;  %v1581_v10 = vld [vmem:[#allocation2 + $0x28] sm:$0xff] }
 0xc1c   :  { %1376 = vrot.lane.b32.xlu0 %v1374_v12, %s3839_s19 }
 0xc20   :  { %1413 = vrot.lane.b32.xlu0 %v1411_v20, %s3839_s19 }
 0xc8e   :  { %v1377_v60 = vpop.permute.xlu0 %1376 }
 0xc8f   :  { %v1379_v21 = vadd.f32 %v1377_v60, %v4052_v1 }
 0xc91   :  { %3559 = vtanh.f32 %v1379_v21 }
 0xc92   :  { %v1414_v24 = vpop.permute.xlu0 %1413 }
 0xc93   :  { %v1416_v25 = vadd.f32 %v1414_v24, %v1361_v23 }
 0xc95   :  { %3561 = vtanh.f32 %v1416_v25 }
 0xc96   :  { %3563 = vpow2.f32 %v3092_v30 }
 0xc9e   :  { %v3560_v26 = vpop.eup %3559 }
 0xc9f   :  { %1382 = vrot.lane.b32.xlu1 %v3560_v26, %s3840_s2 }
 0xca2   :  { %v3562_v27 = vpop.eup %3561 }
 0xca3   :  { %1419 = vrot.lane.b32.xlu1 %v3562_v27, %s3840_s2  ;;  %v3564_v32 = vpop.eup %3563 }
 0xca4   :  { %v1401_v33 = vadd.f32 1.0, %v3564_v32 }
 0xca6   :  { %3565 = vrcp.f32 %v1401_v33 }
 0xcb3   :  { %v3566_v39 = vpop.eup %3565 }
 0xd11   :  { %v1383_v34 = vpop.permute.xlu1 %1382 }
 0xd12   :  { %v1385_v1 = vsub.f32 %v4210_v42, %v1383_v34 }
 0xd14   :  { %v1386_v35 = vmul.f32 %v3556_v9, %v1385_v1  ;;  %v3653_v1 = vld [vmem:[#allocation9 + $0x38] sm:$0xff] }
 0xd15   :  { %v1420_v36 = vpop.permute.xlu1 %1419 }
 0xd16   :  { %v4254_v37 = vadd.f32 %v1386_v35, %v1383_v34  ;;  %v1422_v38 = vsub.f32 %v4215_v40, %v1420_v36  ;;  %v3654_v35 = vld [vmem:[#allocation9 + $0x30] sm:$0xff] }
 0xd18   :  { %v1423_v44 = vmul.f32 %v3566_v39, %v1422_v38  ;;  %1426 = vrot.lane.b32.xlu0 %v4254_v37, %s3840_s2 }
 0xd1a   :  { %v4259_v45 = vadd.f32 %v1423_v44, %v1420_v36  ;;  %v3655_v36 = vld [vmem:[#allocation9 + $0x28] sm:$0xff] }
 0xd1c   :  { %3367 = vmatmul.mubr.msk.f32.vlgmr.msra.gmra.mxu1 %vm130_vm1, %v4259_v45 }
 0xd1d   :  { %3381 = vmatpush3.msra.mxu1 %v3966_v15  ;;  %3388 = vmatprep.mubr.msk.f32.mxu1 %vm3838_vm0, %v3837_v0  ;;  %v4277_v15 = vld [vmem:[#allocation9 + $0x18] sm:$0xff] }
 0xd1e   :  { %3382 = vmatprep.subr.mxu1 %v3837_v0 }
 0xd1f   :  { %3383 = vmatpush3.msra.mxu1 %v3968_v16  ;;  %v4283_v16 = vld [vmem:[#allocation9 + $0x10] sm:$0xff] }
 0xd20   :  { %3384 = vmatprep.subr.mxu1 %v3837_v0 }
 0xd21   :  { %3385 = vmatpush3.msra.mxu1 %v3972_v17  ;;  %v4287_v17 = vld [vmem:[#allocation9 + $0x8] sm:$0xff] }
 0xd22   :  { %3386 = vmatprep.subr.mxu1 %v3837_v0 }
 0xd23   :  { %3387 = vmatpush3.msra.mxu1 %v3977_v19  ;;  %v4291_v19 = vld [vmem:[#allocation9] sm:$0xff] }
 0xd24   :  { %3402 = vmatprep.subr.mxu1 %v3837_v0 }
 0xd8a   :  { %v4273_v42 = vpop.permute.xlu0 %1426 }
 0xd8b   :  { %3356 = vmatmul.mubr.msk.f32.vlgmr.msra.gmra.mxu0 %vm130_vm1, %v4273_v42 }
 0xd8c   :  { %3370 = vmatpush3.msra.mxu0 %v4277_v15  ;;  %3377 = vmatprep.mubr.msk.f32.mxu0 %vm3838_vm0, %v3837_v0 }
 0xd8d   :  { %3371 = vmatprep.subr.mxu0 %v3837_v0 }
 0xd8e   :  { %3372 = vmatpush3.msra.mxu0 %v4283_v16 }
 0xd8f   :  { %3373 = vmatprep.subr.mxu0 %v3837_v0 }
 0xd90   :  { %3374 = vmatpush3.msra.mxu0 %v4287_v17 }
 0xd91   :  { %3375 = vmatprep.subr.mxu0 %v3837_v0 }
 0xd92   :  { %3376 = vmatpush3.msra.mxu0 %v4291_v19 }
 0xd93   :  { %3391 = vmatprep.subr.mxu0 %v3837_v0 }
 0xddc   :  { %v1575_v46 = vpop.f32.mrf.mxu1 }
 0xddd   :  { %1609 = vrot.lane.b32.xlu1 %v1575_v46, %s3840_s2  ;;  %v1626_v43 = vadd.f32 %v1575_v46, %v4071_v31 }
 0xdde   :  { %v3368_v41 = vpop.f32.mrf.mxu1 }
 0xe4b   :  { %v1503_v47 = vpop.f32.mrf.mxu0 }
 0xe4c   :  { %v1589_v48 = vadd.f32 %v1503_v47, %v4008_v29  ;;  %v1582_v50 = vadd.f32 %v1503_v47, %v4057_v7 }
 0xe4d   :  { %v3357_v49 = vpop.f32.mrf.mxu0 }
 0xe4e   :  { %1591 = vrot.lane.b32.xlu0 %v1589_v48, %s3839_s19  ;;  %v3095_v53 = vmul.f32 -1.442695, %v1582_v50 }
 0xe4f   :  { %v1610_v2 = vpop.permute.xlu1 %1609 }
 0xe50   :  { %v1612_v54 = vadd.f32 %v1610_v2, %v4042_v56  ;;  %3567 = vpow2.f32 %v3095_v53  ;;  %v1613_v60 = vadd.f32 %v1610_v2, %v1581_v10 }
 0xe52   :  { %1628 = vrot.lane.b32.xlu0 %v1626_v43, %s3841_s4  ;;  %v3096_v5 = vmul.f32 -1.442695, %v1612_v54  ;;  %v3097_v21 = vmul.f32 -1.442695, %v1613_v60 }
 0xe54   :  { %3569 = vpow2.f32 %v3096_v5 }
 0xe5d   :  { %v3568_v57 = vpop.eup %3567 }
 0xe5e   :  { %v1586_v8 = vadd.f32 1.0, %v3568_v57 }
 0xe60   :  { %3571 = vrcp.f32 %v1586_v8 }
 0xe61   :  { %v3570_v58 = vpop.eup %3569 }
 0xe62   :  { %v1620_v11 = vadd.f32 1.0, %v3570_v58  ;;  %v1801_v58 = vld [vmem:[#allocation2 + $0x18] sm:$0xff] }
 0xe64   :  { %3573 = vrcp.f32 %v1620_v11 }
 0xe6d   :  { %v3572_v59 = vpop.eup %3571 }
 0xe71   :  { %v3574_v3 = vpop.eup %3573 }
 0xec0   :  { %v1592_v62 = vpop.permute.xlu0 %1591 }
 0xec1   :  { %v1594_v63 = vmul.f32 %v3572_v59, %v1592_v62 }
 0xec3   :  { %1596 = vrot.lane.b32.xlu1 %v1594_v63, %s3839_s19 }
 0xec4   :  { %v1629_v4 = vpop.permute.xlu0 %1628 }
 0xec5   :  { %v1631_v6 = vmul.f32 %v3574_v3, %v1629_v4 }
 0xec7   :  { %1633 = vrot.lane.b32.xlu0 %v1631_v6, %s3839_s19 }
 0xf35   :  { %v1597_v56 = vpop.permute.xlu1 %1596 }
 0xf36   :  { %v1599_v9 = vadd.f32 %v1597_v56, %v4057_v7 }
 0xf38   :  { %3575 = vtanh.f32 %v1599_v9 }
 0xf39   :  { %v1634_v12 = vpop.permute.xlu0 %1633 }
 0xf3a   :  { %v1636_v14 = vadd.f32 %v1634_v12, %v1581_v10 }
 0xf3c   :  { %3577 = vtanh.f32 %v1636_v14 }
 0xf3d   :  { %3579 = vpow2.f32 %v3097_v21 }
 0xf45   :  { %v3576_v18 = vpop.eup %3575 }
 0xf46   :  { %1602 = vrot.lane.b32.xlu1 %v3576_v18, %s3840_s2 }
 0xf49   :  { %v3578_v20 = vpop.eup %3577 }
 0xf4a   :  { %1639 = vrot.lane.b32.xlu0 %v3578_v20, %s3840_s2  ;;  %v3580_v23 = vpop.eup %3579 }
 0xf4b   :  { %v1621_v24 = vadd.f32 1.0, %v3580_v23 }
 0xf4d   :  { %3581 = vrcp.f32 %v1621_v24 }
 0xf5a   :  { %v3582_v32 = vpop.eup %3581 }
 0xfb8   :  { %v1603_v25 = vpop.permute.xlu1 %1602 }
 0xfb9   :  { %v1605_v7 = vsub.f32 %v4254_v37, %v1603_v25  ;;  %v3656_v37 = vld [vmem:[#allocation9 + $0x20] sm:$0xff] }
 0xfbb   :  { %v1606_v26 = vmul.f32 %v3572_v59, %v1605_v7 }
 0xfbc   :  { %v1640_v27 = vpop.permute.xlu0 %1639 }
 0xfbd   :  { %v4308_v28 = vadd.f32 %v1606_v26, %v1603_v25  ;;  %v1642_v30 = vsub.f32 %v4259_v45, %v1640_v27 }
 0xfbf   :  { %v1643_v33 = vmul.f32 %v3582_v32, %v1642_v30  ;;  %1646 = vrot.lane.b32.xlu1 %v4308_v28, %s3840_s2 }
 0xfc1   :  { %v4313_v34 = vadd.f32 %v1643_v33, %v1640_v27 }
 0xfc3   :  { %3389 = vmatmul.mubr.msk.f32.vlgmr.msra.gmra.mxu1 %vm130_vm1, %v4313_v34 }
 0xfc4   :  { %3403 = vmatpush3.msra.mxu1 %v3653_v1  ;;  %3410 = vmatprep.mubr.msk.f32.mxu1 %vm3838_vm0, %v3837_v0 }
 0xfc5   :  { %3404 = vmatprep.subr.mxu1 %v3837_v0 }
 0xfc6   :  { %3405 = vmatpush3.msra.mxu1 %v3654_v35 }
 0xfc7   :  { %3406 = vmatprep.subr.mxu1 %v3837_v0 }
 0xfc8   :  { %3407 = vmatpush3.msra.mxu1 %v3655_v36 }
 0xfc9   :  { %3408 = vmatprep.subr.mxu1 %v3837_v0 }
 0xfca   :  { %3409 = vmatpush3.msra.mxu1 %v3656_v37 }
0x1031   :  { %v4322_v38 = vpop.permute.xlu1 %1646 }
0x1032   :  { %3378 = vmatmul.mubr.msk.f32.vlgmr.msra.gmra.mxu0 %vm130_vm1, %v4322_v38 }
0x1033   :  { %3392 = vmatpush3.msra.mxu0 %v4277_v15  ;;  %3399 = vmatprep.mubr.msk.f32.mxu0 %vm3838_vm0, %v3837_v0 }
0x1034   :  { %3393 = vmatprep.subr.mxu0 %v3837_v0 }
0x1035   :  { %3394 = vmatpush3.msra.mxu0 %v4283_v16 }
0x1036   :  { %3395 = vmatprep.subr.mxu0 %v3837_v0 }
0x1037   :  { %3396 = vmatpush3.msra.mxu0 %v4287_v17 }
0x1038   :  { %3397 = vmatprep.subr.mxu0 %v3837_v0 }
0x1039   :  { %3398 = vmatpush3.msra.mxu0 %v4291_v19 }
0x1083   :  { %v1795_v39 = vpop.f32.mrf.mxu1 }
0x1084   :  { %1829 = vrot.lane.b32.xlu0 %v1795_v39, %s3840_s2  ;;  %v1846_v15 = vadd.f32 %v1795_v39, %v4071_v31 }
0x1085   :  { %v3390_v44 = vpop.f32.mrf.mxu1 }
0x1088   :  { %1848 = vrot.lane.b32.xlu0 %v1846_v15, %s3841_s4 }
0x10f2   :  { %v1723_v46 = vpop.f32.mrf.mxu0 }
0x10f3   :  { %v1809_v41 = vadd.f32 %v1723_v46, %v4008_v29  ;;  %v1802_v2 = vadd.f32 %v1723_v46, %v4062_v13  ;;  %v2021_v46 = vld [vmem:[#allocation2 + $0x8] sm:$0xff] }
0x10f4   :  { %v3379_v16 = vpop.f32.mrf.mxu0 }
0x10f5   :  { %1811 = vrot.lane.b32.xlu1 %v1809_v41, %s3839_s19  ;;  %v3100_v53 = vmul.f32 -1.442695, %v1802_v2 }
0x10f6   :  { %v1830_v47 = vpop.permute.xlu0 %1829 }
0x10f7   :  { %v1832_v17 = vadd.f32 %v1830_v47, %v4037_v52  ;;  %v1833_v4 = vadd.f32 %v1830_v47, %v1801_v58  ;;  %v3657_v47 = vld [vmem:[#allocation2 + $0x70] sm:$0xff] }
0x10f9   :  { %v3101_v0 = vmul.f32 -1.442695, %v1832_v17  ;;  %v3102_v56 = vmul.f32 -1.442695, %v1833_v4  ;;  %v2111_v4 = vld [vmem:[#allocation10 + $0x28] sm:$0xff] }
0x10fa   :  { %v1849_v43 = vpop.permute.xlu0 %1848 }
0x10fb   :  { %3583 = vpow2.f32 %v3101_v0 }
0x1108   :  { %v3584_v19 = vpop.eup %3583 }
0x1109   :  { %v1840_v48 = vadd.f32 1.0, %v3584_v19 }
0x110b   :  { %3585 = vrcp.f32 %v1840_v48 }
0x110c   :  { %3587 = vpow2.f32 %v3100_v53 }
0x1118   :  { %v3586_v49 = vpop.eup %3585 }
0x1119   :  { %v1851_v50 = vmul.f32 %v3586_v49, %v1849_v43  ;;  %v3588_v54 = vpop.eup %3587 }
0x111a   :  { %v1806_v5 = vadd.f32 1.0, %v3588_v54 }
0x111b   :  { %1853 = vrot.lane.b32.xlu0 %v1851_v50, %s3839_s19 }
0x111c   :  { %3589 = vrcp.f32 %v1806_v5 }
0x1129   :  { %v3590_v57 = vpop.eup %3589 }
0x1167   :  { %v1812_v8 = vpop.permute.xlu1 %1811 }
0x1168   :  { %v1814_v52 = vmul.f32 %v3590_v57, %v1812_v8 }
0x116a   :  { %1816 = vrot.lane.b32.xlu1 %v1814_v52, %s3839_s19 }
0x118d   :  { %v1854_v11 = vpop.permute.xlu0 %1853 }
0x118e   :  { %v1856_v59 = vadd.f32 %v1854_v11, %v1801_v58 }
0x1190   :  { %3591 = vtanh.f32 %v1856_v59  ;;  %v2113_v59 = vld [vmem:[#allocation10 + $0x38] sm:$0xff] }
0x1191   :  { %3413 = vmatprep.subr.mxu0 %v2113_v59 }
0x119d   :  { %v3592_v62 = vpop.eup %3591 }
0x119e   :  { %1859 = vrot.lane.b32.xlu0 %v3592_v62, %s3840_s2  ;;  %v2112_v62 = vld [vmem:[#allocation10 + $0x30] sm:$0xff] }
0x11dc   :  { %v1817_v63 = vpop.permute.xlu1 %1816 }
0x11dd   :  { %v1819_v3 = vadd.f32 %v1817_v63, %v4062_v13 }
0x11df   :  { %3593 = vtanh.f32 %v1819_v3 }
0x11e0   :  { %3595 = vpow2.f32 %v3102_v56  ;;  %v2109_v56 = vld [vmem:[#allocation10 + $0x18] sm:$0xff] }
0x11ec   :  { %v3594_v6 = vpop.eup %3593 }
0x11ed   :  { %1822 = vrot.lane.b32.xlu1 %v3594_v6, %s3840_s2  ;;  %v3596_v9 = vpop.eup %3595  ;;  %v2110_v6 = vld [vmem:[#allocation10 + $0x20] sm:$0xff] }
0x11ee   :  { %v1841_v10 = vadd.f32 1.0, %v3596_v9  ;;  %v2108_v9 = vld [vmem:[#allocation10 + $0x10] sm:$0xff] }
0x11f0   :  { %3597 = vrcp.f32 %v1841_v10 }
0x11fd   :  { %v3598_v18 = vpop.eup %3597 }
0x1210   :  { %v1860_v12 = vpop.permute.xlu0 %1859 }
0x1211   :  { %v1862_v14 = vsub.f32 %v4313_v34, %v1860_v12 }
0x1213   :  { %v1863_v20 = vmul.f32 %v3598_v18, %v1862_v14 }
0x1215   :  { %v4348_v60 = vadd.f32 %v1863_v20, %v1860_v12 }
0x1217   :  { %3411 = vmatmul.mubr.msk.f32.vlgmr.msra.gmra.mxu1 %vm130_vm1, %v4348_v60 }
0x125f   :  { %v1823_v13 = vpop.permute.xlu1 %1822 }
0x1260   :  { %v1825_v21 = vsub.f32 %v4308_v28, %v1823_v13  ;;  %v2020_v28 = vld [vmem:[#allocation2] sm:$0xff] }
0x1262   :  { %v1826_v23 = vmul.f32 %v3590_v57, %v1825_v21 }
0x1264   :  { %v4353_v24 = vadd.f32 %v1826_v23, %v1823_v13 }
0x1266   :  { %1866 = vrot.lane.b32.xlu1 %v4353_v24, %s3840_s2 }
0x12d7   :  { %v2015_v25 = vpop.f32.mrf.mxu1 }
0x12d8   :  { %v2066_v7 = vadd.f32 %v2015_v25, %v4071_v31  ;;  %2049 = vrot.lane.b32.xlu0 %v2015_v25, %s3840_s2  ;;  %v4359_v26 = vpop.permute.xlu1 %1866 }
0x12d9   :  { %3400 = vmatmul.mubr.msk.f32.vlgmr.msra.gmra.mxu0 %vm130_vm1, %v4359_v26  ;;  %v3412_v27 = vpop.f32.mrf.mxu1 }
0x12da   :  { %2068 = vrot.lane.b32.xlu1 %v2066_v7, %s3841_s4  ;;  %3414 = vmatpush3.msra.mxu0 %v2113_v59 }
0x12db   :  { %3415 = vmatprep.subr.mxu0 %v2112_v62 }
0x12dc   :  { %3416 = vmatpush3.msra.mxu0 %v2112_v62 }
0x12dd   :  { %3417 = vmatprep.subr.mxu0 %v2111_v4 }
0x12de   :  { %3418 = vmatpush3.msra.mxu0 %v2111_v4 }
0x12df   :  { %3419 = vmatprep.subr.mxu0 %v2110_v6 }
0x12e0   :  { %3420 = vmatpush3.msra.mxu0 %v2110_v6 }
0x12e1   :  { %3421 = vmatprep.subr.mxu0 %v2109_v56 }
0x12e2   :  { %3422 = vmatpush3.msra.mxu0 %v2109_v56 }
0x12e3   :  { %3423 = vmatprep.subr.mxu0 %v2108_v9 }
0x12e4   :  { %3424 = vmatpush3.msra.mxu0 %v2108_v9 }
0x134a   :  { %v2050_v30 = vpop.permute.xlu0 %2049 }
0x134b   :  { %v2052_v32 = vadd.f32 %v2050_v30, %v2020_v28  ;;  %v2053_v2 = vadd.f32 %v2050_v30, %v2021_v46  ;;  %v2265_v28 = vld [vmem:[#allocation12 + $0x38] sm:$0xff]  ;;  %v2264_v30 = vld [vmem:[#allocation12 + $0x30] sm:$0xff] }
0x134c   :  { %v2069_v31 = vpop.permute.xlu1 %2068  ;;  %3441 = vmatprep.subr.mxu1 %v2265_v28 }
0x134d   :  { %v3106_v33 = vmul.f32 -1.442695, %v2052_v32  ;;  %v3107_v53 = vmul.f32 -1.442695, %v2053_v2  ;;  %3442 = vmatpush3.msra.mxu1 %v2265_v28  ;;  %v2263_v32 = vld [vmem:[#allocation12 + $0x28] sm:$0xff] }
0x134e   :  { %3443 = vmatprep.subr.mxu1 %v2264_v30 }
0x134f   :  { %3599 = vpow2.f32 %v3106_v33  ;;  %3444 = vmatpush3.msra.mxu1 %v2264_v30  ;;  %v2262_v33 = vld [vmem:[#allocation12 + $0x20] sm:$0xff] }
0x1350   :  { %3445 = vmatprep.subr.mxu1 %v2263_v32 }
0x1351   :  { %3446 = vmatpush3.msra.mxu1 %v2263_v32 }
0x1352   :  { %3447 = vmatprep.subr.mxu1 %v2262_v33 }
0x1353   :  { %3448 = vmatpush3.msra.mxu1 %v2262_v33 }
0x135c   :  { %v3600_v1 = vpop.eup %3599 }
0x135d   :  { %v2060_v35 = vadd.f32 1.0, %v3600_v1  ;;  %v2261_v1 = vld [vmem:[#allocation12 + $0x18] sm:$0xff] }
0x135e   :  { %3449 = vmatprep.subr.mxu1 %v2261_v1 }
0x135f   :  { %3601 = vrcp.f32 %v2060_v35  ;;  %3450 = vmatpush3.msra.mxu1 %v2261_v1  ;;  %v2260_v35 = vld [vmem:[#allocation12 + $0x10] sm:$0xff] }
0x1360   :  { %3451 = vmatprep.subr.mxu1 %v2260_v35 }
0x1361   :  { %3452 = vmatpush3.msra.mxu1 %v2260_v35 }
0x136c   :  { %v3602_v36 = vpop.eup %3601 }
0x136d   :  { %v2071_v37 = vmul.f32 %v3602_v36, %v2069_v31  ;;  %v2259_v36 = vld [vmem:[#allocation12 + $0x8] sm:$0xff]  ;;  %v2258_v31 = vld [vmem:[#allocation12] sm:$0xff] }
0x136e   :  { %3453 = vmatprep.subr.mxu1 %v2259_v36 }
0x136f   :  { %2073 = vrot.lane.b32.xlu1 %v2071_v37, %s3839_s19  ;;  %3454 = vmatpush3.msra.mxu1 %v2259_v36 }
0x1370   :  { %3455 = vmatprep.subr.mxu1 %v2258_v31 }
0x1371   :  { %3456 = vmatpush3.msra.mxu1 %v2258_v31 }
0x1399   :  { %v1943_v39 = vpop.f32.mrf.mxu0 }
0x139a   :  { %v2029_v44 = vadd.f32 %v1943_v39, %v4008_v29  ;;  %v2022_v17 = vadd.f32 %v3657_v47, %v1943_v39 }
0x139b   :  { %v3401_v15 = vpop.f32.mrf.mxu0 }
0x139c   :  { %2031 = vrot.lane.b32.xlu0 %v2029_v44, %s3839_s19  ;;  %v3105_v0 = vmul.f32 -1.442695, %v2022_v17  ;;  %v3108_v44 = vld [vmem:[%s4651_s6] ss:$0 sm:$0xff]  ;;  %s3842_s6 = smov [#allocation14]  }
0x139d   :  { %s3026_s28 = sshll.u32 %s3842_s6, 4  ;;  %s3027_s28 = int_to_ptr.vmem [resolvable:$true] %s3026_s28 }
0x139e   :  { %s3758_s1 = scalar_lea.vmem %s3027_s28, 256  ;;  %p3763_p12 = scmp.lt.s32.totalorder %s3027_s28, %s3027_s28 }
0x139f   :  { %p3759_p11 = scmp.ne.s32.totalorder %s3027_s28, %s3758_s1  ;;  %p3764_p13 = scmp.lt.s32.totalorder %s3758_s1, %s3758_s1 }
0x13a1   :  { %p3765_p0 = por %p3764_p13, %p3763_p12 }
0x13a3   :  { %p3766_p1 = pnand %p3765_p0, %p3759_p11 }
0x13e1   :  { %v2074_v41 = vpop.permute.xlu1 %2073 }
0x13e2   :  { %v2076_v16 = vadd.f32 %v2074_v41, %v2021_v46 }
0x13e4   :  { %3603 = vtanh.f32 %v2076_v16 }
0x13e5   :  { %3605 = vpow2.f32 %v3105_v0 }
0x13f1   :  { %v3604_v19 = vpop.eup %3603 }
0x13f2   :  { %2079 = vrot.lane.b32.xlu1 %v3604_v19, %s3840_s2  ;;  %v3606_v48 = vpop.eup %3605 }
0x13f3   :  { %v2026_v49 = vadd.f32 1.0, %v3606_v48 }
0x13f5   :  { %3607 = vrcp.f32 %v2026_v49 }
0x13f6   :  { %3609 = vpow2.f32 %v3107_v53 }
0x1402   :  { %v4368_v43 = vpop.eup %3607 }
0x1403   :  { %v3610_v54 = vpop.eup %3609 }
0x1404   :  { %v2061_v5 = vadd.f32 1.0, %v3610_v54 }
0x1406   :  { %3611 = vrcp.f32 %v2061_v5 }
0x140e   :  { %v2032_v29 = vpop.permute.xlu0 %2031 }
0x140f   :  { %v2034_v50 = vmul.f32 %v4368_v43, %v2032_v29 }
0x1411   :  { %2036 = vrot.lane.b32.xlu0 %v2034_v50, %s3839_s19 }
0x1413   :  { %v3612_v52 = vpop.eup %3611 }
0x1464   :  { %v2080_v57 = vpop.permute.xlu1 %2079 }
0x1465   :  { %v2082_v8 = vsub.f32 %v4348_v60, %v2080_v57 }
0x1467   :  { %v2083_v58 = vmul.f32 %v3612_v52, %v2082_v8 }
0x1469   :  { %v2084_v11 = vadd.f32 %v2083_v58, %v2080_v57 }
0x146b   :  { %2097 = vst.msk [vmem:[#allocation14 + $0x8] sm:$0xff] %vm130_vm1, %v2084_v11  ;;  %2091 = vrot.lane.b32.xlu1 %v2084_v11, %s3841_s4 }
0x146f   :  { %1651 = vrot.lane.b32.xlu1 %v4313_v34, %s3841_s4  ;;  %v2107_v34 = vld [vmem:[#allocation10 + $0x8] sm:$0xff] }
0x1470   :  { %3425 = vmatprep.subr.mxu0 %v2107_v34 }
0x1471   :  { %3426 = vmatpush3.msra.mxu0 %v2107_v34 }
0x1473   :  { %1210 = vrot.lane.b32.xlu1 %v4215_v40, %s3841_s4  ;;  %v2106_v40 = vld [vmem:[#allocation10] sm:$0xff] }
0x1474   :  { %3427 = vmatprep.subr.mxu0 %v2106_v40 }
0x1475   :  { %3428 = vmatpush3.msra.mxu0 %v2106_v40 }
0x1477   :  { %762 = vrot.lane.b32.xlu1 %v4139_v55, %s3841_s4 }
0x1483   :  { %v2037_v63 = vpop.permute.xlu0 %2036 }
0x1484   :  { %v2039_v3 = vadd.f32 %v3657_v47, %v2037_v63 }
0x1486   :  { %3613 = vtanh.f32 %v2039_v3 }
0x1493   :  { %v3614_v55 = vpop.eup %3613 }
0x1494   :  { %2042 = vrot.lane.b32.xlu0 %v3614_v55, %s3840_s2 }
0x1498   :  { %1871 = vrot.lane.b32.xlu0 %v4348_v60, %s3841_s4 }
0x149c   :  { %1431 = vrot.lane.b32.xlu0 %v4259_v45, %s3841_s4 }
0x14a0   :  { %986 = vrot.lane.b32.xlu0 %v4178_v51, %s3841_s4 }
0x14a4   :  { %537 = vrot.lane.b32.xlu0 %v4095_v61, %s3841_s4 }
0x14dd   :  { %v2092_v10 = vpop.permute.xlu1 %2091 }
0x14de   :  { %2094 = vst.msk [vmem:[#allocation3] sm:$0xff] %vm541_vm3, %v2092_v10 }
0x14e1   :  { %v1652_v12 = vpop.permute.xlu1 %1651 }
0x14e2   :  { %1654 = vst.msk [vmem:[#allocation3 + $0x10] sm:$0xff] %vm541_vm3, %v1652_v12 }
0x14e5   :  { %v1211_v14 = vpop.permute.xlu1 %1210  ;;  %v4392_v18 = vld [vmem:[#allocation3] sm:$0xff] }
0x14e6   :  { %1214 = vst.msk [vmem:[#allocation3 + $0x20] sm:$0xff] %vm541_vm3, %v1211_v14  ;;  %3429 = vmatprep.mubr.msk.f32.mxu0 %vm269_vm2, %v4392_v18 }
0x14e7   :  { %1429 = vst.msk [vmem:[#allocation3 + $0x20] sm:$0xff] %vm130_vm1, %v4273_v42 }
0x14e9   :  { %v763_v51 = vpop.permute.xlu1 %762 }
0x14ea   :  { %766 = vst.msk [vmem:[#allocation3 + $0x30] sm:$0xff] %vm541_vm3, %v763_v51 }
0x14eb   :  { %1869 = vst.msk [vmem:[#allocation3 + $0x30] sm:$0xff] %vm130_vm1, %v4359_v26 }
0x14ee   :  { %v4423_v26 = vld [vmem:[#allocation3 + $0x20] sm:$0xff] }
0x1506   :  { %v2043_v61 = vpop.permute.xlu0 %2042 }
0x1507   :  { %v2045_v45 = vsub.f32 %v4353_v24, %v2043_v61  ;;  %v4412_v24 = vld [vmem:[#allocation3 + $0x10] sm:$0xff] }
0x1509   :  { %v2046_v20 = vmul.f32 %v4368_v43, %v2045_v45 }
0x150a   :  { %v1872_v60 = vpop.permute.xlu0 %1871 }
0x150b   :  { %v2047_v13 = vadd.f32 %v2046_v20, %v2043_v61  ;;  %1874 = vst.msk [vmem:[#allocation3 + $0x8] sm:$0xff] %vm541_vm3, %v1872_v60 }
0x150d   :  { %2086 = vrot.lane.b32.xlu1 %v2047_v13, %s3840_s2 }
0x150e   :  { %v1432_v21 = vpop.permute.xlu0 %1431 }
0x150f   :  { %1434 = vst.msk [vmem:[#allocation3 + $0x18] sm:$0xff] %vm541_vm3, %v1432_v21 }
0x1512   :  { %v987_v42 = vpop.permute.xlu0 %986  ;;  %v4407_v23 = vld [vmem:[#allocation3 + $0x8] sm:$0xff] }
0x1513   :  { %990 = vst.msk [vmem:[#allocation3 + $0x28] sm:$0xff] %vm541_vm3, %v987_v42  ;;  %3430 = vmatmul.mubr.msk.f32.vlgmr.msra.gmra.mxu0 %vm269_vm2, %v4407_v23 }
0x1514   :  { %1649 = vst.msk [vmem:[#allocation3 + $0x28] sm:$0xff] %vm130_vm1, %v4322_v38  ;;  %3432 = vmatprep.mubr.msk.f32.mxu0 %vm269_vm2, %v4412_v24  ;;  %v4431_v38 = vld [vmem:[#allocation3 + $0x30] sm:$0xff] }
0x1516   :  { %v538_v25 = vpop.permute.xlu0 %537  ;;  %v4418_v7 = vld [vmem:[#allocation3 + $0x18] sm:$0xff] }
0x1517   :  { %542 = vst.msk [vmem:[#allocation3 + $0x38] sm:$0xff] %vm541_vm3, %v538_v25  ;;  %3433 = vmatmul.mubr.msk.f32.gmra.mxu0 %vm269_vm2, %v4418_v7 }
0x1518   :  { %3435 = vmatprep.mubr.msk.f32.mxu0 %vm269_vm2, %v4423_v26 }
0x151b   :  { %v4427_v27 = vld [vmem:[#allocation3 + $0x28] sm:$0xff] }
0x151c   :  { %3436 = vmatmul.mubr.msk.f32.gmra.mxu0 %vm269_vm2, %v4427_v27 }
0x151d   :  { %3438 = vmatprep.mubr.msk.f32.mxu0 %vm269_vm2, %v4431_v38 }
0x157f   :  { %v2087_v37 = vpop.permute.xlu1 %2086 }
0x1580   :  { %2089 = vst.msk [vmem:[#allocation3 + $0x38] sm:$0xff] %vm130_vm1, %v2087_v37  ;;  %2095 = vst.msk [vmem:[#allocation14] sm:$0xff] %vm130_vm1, %v2087_v37 }
0x1587   :  { %v4437_v39 = vld [vmem:[#allocation3 + $0x38] sm:$0xff] }
0x1588   :  { %3439 = vmatmul.mubr.msk.f32.gmra.mxu0 %vm269_vm2, %v4437_v39 }
0x15d3   :  { %v3431_v15 = vpop.f32.mrf.mxu0 }
0x15d4   :  { %v2217_v46 = vadd.f32 %v3431_v15, %v3108_v44 }
0x15d5   :  { %v2211_v41 = vpop.f32.mrf.mxu0 }
0x15d6   :  { %v2212_v16 = vadd.f32 %v3108_v44, %v2211_v41 }
0x15d7   :  { %v3434_v47 = vpop.f32.mrf.mxu0 }
0x15d8   :  { %3615 = vtanh.f32 %v2212_v16  ;;  %v2227_v17 = vadd.f32 %v3434_v47, %v3108_v44 }
0x15d9   :  { %3617 = vtanh.f32 %v2217_v46  ;;  %v2221_v0 = vpop.f32.mrf.mxu0 }
0x15da   :  { %v2222_v19 = vadd.f32 %v3108_v44, %v2221_v0 }
0x15dc   :  { %3619 = vtanh.f32 %v2222_v19  ;;  %v3437_v48 = vpop.f32.mrf.mxu0 }
0x15dd   :  { %3621 = vtanh.f32 %v2227_v17  ;;  %v2237_v49 = vadd.f32 %v3437_v48, %v3108_v44 }
0x15de   :  { %v2231_v43 = vpop.f32.mrf.mxu0 }
0x15df   :  { %v2232_v29 = vadd.f32 %v3108_v44, %v2231_v43 }
0x15e1   :  { %3623 = vtanh.f32 %v2232_v29 }
0x15e2   :  { %3625 = vtanh.f32 %v2237_v49 }
0x15e5   :  { %v3616_v50 = vpop.eup %3615 }
0x15e6   :  { %v3618_v2 = vpop.eup %3617  ;;  %3457 = vmatprep.mubr.msk.f32.mxu1 %vm269_vm2, %v3616_v50 }
0x15e7   :  { %3458 = vmatmul.mubr.msk.f32.vlgmr.msra.gmra.mxu1 %vm269_vm2, %v3618_v2 }
0x15e9   :  { %v3620_v53 = vpop.eup %3619 }
0x15ea   :  { %v3622_v54 = vpop.eup %3621  ;;  %3460 = vmatprep.mubr.msk.f32.mxu1 %vm269_vm2, %v3620_v53 }
0x15eb   :  { %3461 = vmatmul.mubr.msk.f32.gmra.mxu1 %vm269_vm2, %v3622_v54 }
0x15ee   :  { %v3624_v5 = vpop.eup %3623 }
0x15ef   :  { %v3626_v57 = vpop.eup %3625  ;;  %3463 = vmatprep.mubr.msk.f32.mxu1 %vm269_vm2, %v3624_v5 }
0x15f0   :  { %3464 = vmatmul.mubr.msk.f32.gmra.mxu1 %vm269_vm2, %v3626_v57 }
0x1648   :  { %v3440_v8 = vpop.f32.mrf.mxu0 }
0x1649   :  { %v2247_v52 = vadd.f32 %v3440_v8, %v3108_v44 }
0x164a   :  { %v2241_v58 = vpop.f32.mrf.mxu0 }
0x164b   :  { %v2242_v11 = vadd.f32 %v3108_v44, %v2241_v58 }
0x164d   :  { %3627 = vtanh.f32 %v2242_v11 }
0x164e   :  { %3629 = vtanh.f32 %v2247_v52 }
0x165a   :  { %v3628_v59 = vpop.eup %3627 }
0x165b   :  { %v3630_v62 = vpop.eup %3629  ;;  %3466 = vmatprep.mubr.msk.f32.mxu1 %vm269_vm2, %v3628_v59 }
0x165c   :  { %3467 = vmatmul.mubr.msk.f32.gmra.mxu1 %vm269_vm2, %v3630_v62 }
0x165d   :  { %3769 = shalt.err (!%p3766_p1)
}
0x165e   :  { %3032 = dma.vmem_to_hbm [thread:$0]  %s3027_s28, 256, %s4654_s9, [#allocation15], %s3833_s25, %s3833_s25, %s3834_s26   ;;  %vm2540_vm4 = vcmask 516096  }
0x165f   :  { %s3844_s9 = smov [#allocation13]  }
0x1660   :  { %s3017_s11 = sshll.u32 %s3844_s9, 4  ;;  %s3018_s11 = int_to_ptr.vmem [resolvable:$true] %s3017_s11 }
0x1661   :  { %s3778_s12 = scalar_lea.vmem %s3018_s11, 128  ;;  %p3783_p3 = scmp.lt.s32.totalorder %s3018_s11, %s3018_s11 }
0x1662   :  { %p3779_p2 = scmp.ne.s32.totalorder %s3018_s11, %s3778_s12  ;;  %p3784_p4 = scmp.lt.s32.totalorder %s3778_s12, %s3778_s12 }
0x1664   :  { %p3785_p5 = por %p3784_p4, %p3783_p3 }
0x1666   :  { %p3786_p6 = pnand %p3785_p5, %p3779_p2 }
0x16a7   :  { %v3459_v63 = vpop.f32.mrf.mxu1 }
0x16a8   :  { %v2396_v61 = vsel %vm269_vm2, %v3459_v63, -inf }
0x16a9   :  { %v2356_v3 = vpop.f32.mrf.mxu1 }
0x16aa   :  { %v2395_v55 = vsel %vm269_vm2, %v2356_v3, -inf }
0x16ab   :  { %v3462_v4 = vpop.f32.mrf.mxu1 }
0x16ac   :  { %v2398_v45 = vsel %vm269_vm2, %v3462_v4, -inf }
0x16ad   :  { %v2366_v6 = vpop.f32.mrf.mxu1 }
0x16ae   :  { %v2397_v20 = vsel %vm269_vm2, %v2366_v6, -inf }
0x16b0   :  { %v3465_v56 = vpop.f32.mrf.mxu1 }
0x16b1   :  { %v2401_v10 = vsel %vm269_vm2, %v3465_v56, -inf }
0x16b2   :  { %v2376_v9 = vpop.f32.mrf.mxu1  ;;  %v2402_v13 = vmax.f32 %v2396_v61, %v2401_v10 }
0x16b3   :  { %v2399_v34 = vsel %vm269_vm2, %v2376_v9, -inf }
0x16b4   :  { %v2400_v14 = vmax.f32 %v2395_v55, %v2399_v34 }
0x16b6   :  { %v2407_v25 = vmax.f32 %v2400_v14, %v2402_v13 }
0x171c   :  { %v3468_v40 = vpop.f32.mrf.mxu1 }
0x171d   :  { %v2405_v12 = vsel %vm269_vm2, %v3468_v40, -inf }
0x171e   :  { %v2386_v51 = vpop.f32.mrf.mxu1  ;;  %v2406_v21 = vmax.f32 %v2398_v45, %v2405_v12 }
0x171f   :  { %v2403_v60 = vsel %vm269_vm2, %v2386_v51, -inf }
0x1720   :  { %v2404_v42 = vmax.f32 %v2397_v20, %v2403_v60 }
0x1722   :  { %v2408_v28 = vmax.f32 %v2404_v42, %v2406_v21 }
0x1724   :  { %v2409_v30 = vmax.f32 %v2407_v25, %v2408_v28 }
0x1726   :  { %v2410_v32 = vsub.f32 %v2356_v3, %v2409_v30  ;;  %v2411_v33 = vsub.f32 %v3459_v63, %v2409_v30  ;;  %v2412_v1 = vsub.f32 %v2366_v6, %v2409_v30  ;;  %v2413_v35 = vsub.f32 %v3462_v4, %v2409_v30 }
0x1727   :  { %v2414_v36 = vsub.f32 %v2376_v9, %v2409_v30  ;;  %v2415_v15 = vsub.f32 %v3465_v56, %v2409_v30  ;;  %v2416_v41 = vsub.f32 %v2386_v51, %v2409_v30  ;;  %v2417_v47 = vsub.f32 %v3468_v40, %v2409_v30 }
0x1728   :  { %v2418_v31 = vmul.f32 1.442695, %v2410_v32  ;;  %v2420_v37 = vmul.f32 1.442695, %v2411_v33  ;;  %v2422_v44 = vmul.f32 1.442695, %v2412_v1 }
0x1729   :  { %v2424_v46 = vmul.f32 1.442695, %v2413_v35  ;;  %v2426_v16 = vmul.f32 1.442695, %v2414_v36  ;;  %v2428_v17 = vmul.f32 1.442695, %v2415_v15 }
0x172a   :  { %3631 = vpow2.f32 %v2418_v31  ;;  %v2430_v0 = vmul.f32 1.442695, %v2416_v41  ;;  %v2432_v19 = vmul.f32 1.442695, %v2417_v47  ;;  %v3843_v40 = vmov 1966171168  }
0x172b   :  { %3633 = vpow2.f32 %v2420_v37  ;;  %v2485_v55 = vunpack.c.l.s4 %v3843_v40 }
0x172c   :  { %3635 = vpow2.f32 %v2422_v44 }
0x172d   :  { %3637 = vpow2.f32 %v2424_v46  ;;  %v2486_v10 = vunpack.c.0.s8 %v2485_v55 }
0x172e   :  { %3639 = vpow2.f32 %v2426_v16 }
0x172f   :  { %3641 = vpow2.f32 %v2428_v17  ;;  %v4475_v12 = vsub.s32 %v2486_v10, %v3997_v22 }
0x1730   :  { %3643 = vpow2.f32 %v2430_v0 }
0x1731   :  { %3645 = vpow2.f32 %v2432_v19 }
0x1737   :  { %v3632_v48 = vpop.eup %3631 }
0x1738   :  { %v3634_v49 = vpop.eup %3633  ;;  %v2434_v43 = vsel %vm269_vm2, %v3632_v48, 0.0 }
0x1739   :  { %v3636_v29 = vpop.eup %3635  ;;  %v2435_v50 = vsel %vm269_vm2, %v3634_v49, 0.0 }
0x173a   :  { %v3638_v2 = vpop.eup %3637  ;;  %v2436_v53 = vadd.f32 %v2435_v50, %v2434_v43  ;;  %v2437_v54 = vsel %vm269_vm2, %v3636_v29, 0.0 }
0x173b   :  { %v3640_v5 = vpop.eup %3639  ;;  %v2439_v8 = vsel %vm269_vm2, %v3638_v2, 0.0 }
0x173c   :  { %v2438_v57 = vadd.f32 %v2437_v54, %v2436_v53  ;;  %v3642_v52 = vpop.eup %3641  ;;  %v2441_v11 = vsel %vm269_vm2, %v3640_v5, 0.0 }
0x173d   :  { %v3644_v59 = vpop.eup %3643  ;;  %v2443_v63 = vsel %vm269_vm2, %v3642_v52, 0.0 }
0x173e   :  { %v2440_v58 = vadd.f32 %v2439_v8, %v2438_v57  ;;  %v3646_v3 = vpop.eup %3645  ;;  %v2445_v6 = vsel %vm269_vm2, %v3644_v59, 0.0 }
0x173f   :  { %v2447_v9 = vsel %vm269_vm2, %v3646_v3, 0.0 }
0x1740   :  { %v2442_v62 = vadd.f32 %v2441_v11, %v2440_v58 }
0x1742   :  { %v2444_v4 = vadd.f32 %v2443_v63, %v2442_v62 }
0x1744   :  { %v2446_v56 = vadd.f32 %v2445_v6, %v2444_v4 }
0x1746   :  { %v2448_v34 = vadd.f32 %v2447_v9, %v2446_v56 }
0x1748   :  { %3647 = vrcp.f32 %v2448_v34 }
0x1755   :  { %v3648_v14 = vpop.eup %3647 }
0x1756   :  { %v2456_v51 = vmul.f32 %v3648_v14, %v3644_v59  ;;  %v2450_v61 = vmul.f32 %v3648_v14, %v3632_v48  ;;  %v2451_v45 = vmul.f32 %v3648_v14, %v3634_v49  ;;  %v4477_v20 = vmul.f32 %v3648_v14, %v3636_v29 }
0x1757   :  { %v4479_v60 = vmul.f32 %v3648_v14, %v3638_v2  ;;  %v4481_v13 = vmul.f32 %v3648_v14, %v3640_v5  ;;  %v4483_v21 = vmul.f32 %v3648_v14, %v3642_v52  ;;  %v4485_v42 = vmul.f32 %v3648_v14, %v3646_v3 }
0x1758   :  { %v2880_v25 = vcombine.high %v2456_v51, %v2456_v51  ;;  %v2887_v28 = vrot.slane %v2456_v51, %v4475_v12  ;;  %v2458_v22 = vmul.f32 %v2450_v61, %v4392_v18  ;;  %v2459_v30 = vmul.f32 %v2451_v45, %v4407_v23 }
0x1759   :  { %v2460_v32 = vmul.f32 %v4477_v20, %v4412_v24  ;;  %v2461_v33 = vmul.f32 %v4479_v60, %v4418_v7  ;;  %v2462_v1 = vmul.f32 %v4481_v13, %v4423_v26  ;;  %v2463_v35 = vmul.f32 %v4483_v21, %v4427_v27 }
0x175a   :  { %v2894_v36 = vrot.slane %v2880_v25, %v4475_v12  ;;  %v2895_v31 = vcombine.high %v2887_v28, %v2887_v28  ;;  %v2903_v37 = vrot.slane %v2887_v28, %v4475_v12  ;;  %v2464_v18 = vmul.f32 %v2456_v51, %v4431_v38 }
0x175b   :  { %v2465_v23 = vmul.f32 %v4485_v42, %v4437_v39  ;;  %v2466_v24 = vsel %vm269_vm2, %v2458_v22, 0.0  ;;  %v2467_v7 = vsel %vm269_vm2, %v2459_v30, 0.0  ;;  %v2469_v44 = vsel %vm269_vm2, %v2460_v32, 0.0 }
0x175c   :  { %v2896_v26 = vcombine.high %v2894_v36, %v2894_v36  ;;  %v2910_v15 = vrot.slane %v2894_v36, %v4475_v12  ;;  %v2917_v27 = vrot.slane %v2895_v31, %v4475_v12  ;;  %v2925_v46 = vcombine.high %v2903_v37, %v2903_v37  ;;  %2937 = vst.msk [vmem:[#allocation16 + $0x6] sm:$0x1] %vm2540_vm4, %v2903_v37 }
0x175d   :  { %v2468_v41 = vadd.f32 %v2467_v7, %v2466_v24  ;;  %v2471_v38 = vsel %vm269_vm2, %v2461_v33, 0.0  ;;  %v2473_v16 = vsel %vm269_vm2, %v2462_v1, 0.0  ;;  %v2475_v39 = vsel %vm269_vm2, %v2463_v35, 0.0 }
0x175e   :  { %v2924_v47 = vrot.slane %v2896_v26, %v4475_v12  ;;  %v2926_v17 = vcombine.high %v2910_v15, %v2910_v15  ;;  %v2927_v0 = vcombine.high %v2917_v27, %v2917_v27  ;;  %2938 = vst.msk [vmem:[#allocation16 + $0xe] sm:$0x1] %vm2540_vm4, %v2917_v27  ;;  %2939 = vst.msk [vmem:[#allocation16 + $0x16] sm:$0x1] %vm2540_vm4, %v2925_v46  ;;  %v2477_v19 = vsel %vm269_vm2, %v2464_v18, 0.0 }
0x175f   :  { %2941 = vst.msk [vmem:[#allocation16 + $0x26] sm:$0x1] %vm2540_vm4, %v2910_v15  ;;  %v2470_v48 = vadd.f32 %v2469_v44, %v2468_v41  ;;  %v2479_v49 = vsel %vm269_vm2, %v2465_v23, 0.0  ;;  %v2483_v43 = vcombine.high %v2450_v61, %v2450_v61  ;;  %v2490_v29 = vrot.slane %v2450_v61, %v4475_v12 }
0x1760   :  { %v2928_v50 = vcombine.high %v2924_v47, %v2924_v47  ;;  %2940 = vst.msk [vmem:[#allocation16 + $0x1e] sm:$0x1] %vm2540_vm4, %v2927_v0  ;;  %2942 = vst.msk [vmem:[#allocation16 + $0x2e] sm:$0x1] %vm2540_vm4, %v2924_v47  ;;  %v2550_v2 = vcombine.high %v2451_v45, %v2451_v45  ;;  %v2557_v53 = vrot.slane %v2451_v45, %v4475_v12 }
0x1761   :  { %2943 = vst.msk [vmem:[#allocation16 + $0x36] sm:$0x1] %vm2540_vm4, %v2926_v17  ;;  %v2616_v54 = vcombine.high %v4477_v20, %v4477_v20  ;;  %v2472_v5 = vadd.f32 %v2471_v38, %v2470_v48  ;;  %v2497_v57 = vrot.slane %v2483_v43, %v4475_v12  ;;  %v2498_v8 = vcombine.high %v2490_v29, %v2490_v29 }
0x1762   :  { %v2506_v52 = vrot.slane %v2490_v29, %v4475_v12  ;;  %2944 = vst.msk [vmem:[#allocation16 + $0x3e] sm:$0x1] %vm2540_vm4, %v2928_v50  ;;  %v2564_v58 = vrot.slane %v2550_v2, %v4475_v12  ;;  %v2565_v11 = vcombine.high %v2557_v53, %v2557_v53  ;;  %v2573_v59 = vrot.slane %v2557_v53, %v4475_v12 }
0x1763   :  { %v2623_v62 = vrot.slane %v4477_v20, %v4475_v12  ;;  %v2474_v63 = vadd.f32 %v2473_v16, %v2472_v5  ;;  %v2499_v3 = vcombine.high %v2497_v57, %v2497_v57  ;;  %v2513_v4 = vrot.slane %v2497_v57, %v4475_v12 }
0x1764   :  { %v2520_v6 = vrot.slane %v2498_v8, %v4475_v12  ;;  %2541 = vst.msk [vmem:[#allocation16] sm:$0x1] %vm2540_vm4, %v2506_v52  ;;  %v2528_v56 = vcombine.high %v2506_v52, %v2506_v52  ;;  %v2566_v9 = vcombine.high %v2564_v58, %v2564_v58  ;;  %v2580_v34 = vrot.slane %v2564_v58, %v4475_v12 }
0x1765   :  { %v2587_v40 = vrot.slane %v2565_v11, %v4475_v12  ;;  %2607 = vst.msk [vmem:[#allocation16 + $0x1] sm:$0x1] %vm2540_vm4, %v2573_v59  ;;  %v2476_v55 = vadd.f32 %v2475_v39, %v2474_v63  ;;  %v2527_v10 = vrot.slane %v2499_v3, %v4475_v12  ;;  %v2529_v14 = vcombine.high %v2513_v4, %v2513_v4 }
0x1766   :  { %v2530_v51 = vcombine.high %v2520_v6, %v2520_v6  ;;  %2542 = vst.msk [vmem:[#allocation16 + $0x8] sm:$0x1] %vm2540_vm4, %v2520_v6  ;;  %2545 = vst.msk [vmem:[#allocation16 + $0x20] sm:$0x1] %vm2540_vm4, %v2513_v4  ;;  %v2594_v61 = vrot.slane %v2566_v9, %v4475_v12  ;;  %v2595_v45 = vcombine.high %v2573_v59, %v2573_v59 }
0x1767   :  { %2543 = vst.msk [vmem:[#allocation16 + $0x10] sm:$0x1] %vm2540_vm4, %v2528_v56  ;;  %v2596_v20 = vcombine.high %v2580_v34, %v2580_v34  ;;  %v2597_v25 = vcombine.high %v2587_v40, %v2587_v40  ;;  %2608 = vst.msk [vmem:[#allocation16 + $0x9] sm:$0x1] %vm2540_vm4, %v2587_v40  ;;  %v2478_v28 = vadd.f32 %v2477_v19, %v2476_v55 }
0x1768   :  { %2611 = vst.msk [vmem:[#allocation16 + $0x21] sm:$0x1] %vm2540_vm4, %v2580_v34  ;;  %v2531_v22 = vcombine.high %v2527_v10, %v2527_v10  ;;  %2544 = vst.msk [vmem:[#allocation16 + $0x18] sm:$0x1] %vm2540_vm4, %v2530_v51  ;;  %v2630_v30 = vrot.slane %v2616_v54, %v4475_v12  ;;  %v2631_v32 = vcombine.high %v2623_v62, %v2623_v62 }
0x1769   :  { %2546 = vst.msk [vmem:[#allocation16 + $0x28] sm:$0x1] %vm2540_vm4, %v2527_v10  ;;  %2547 = vst.msk [vmem:[#allocation16 + $0x30] sm:$0x1] %vm2540_vm4, %v2529_v14  ;;  %v2598_v33 = vcombine.high %v2594_v61, %v2594_v61  ;;  %v2639_v1 = vrot.slane %v2623_v62, %v4475_v12  ;;  %v2682_v35 = vcombine.high %v4479_v60, %v4479_v60 }
0x176a   :  { %2609 = vst.msk [vmem:[#allocation16 + $0x11] sm:$0x1] %vm2540_vm4, %v2595_v45  ;;  %2610 = vst.msk [vmem:[#allocation16 + $0x19] sm:$0x1] %vm2540_vm4, %v2597_v25  ;;  %v2689_v36 = vrot.slane %v4479_v60, %v4475_v12  ;;  %v2480_v31 = vadd.f32 %v2479_v49, %v2478_v28  ;;  %v2632_v37 = vcombine.high %v2630_v30, %v2630_v30 }
0x176b   :  { %2612 = vst.msk [vmem:[#allocation16 + $0x29] sm:$0x1] %vm2540_vm4, %v2594_v61  ;;  %2613 = vst.msk [vmem:[#allocation16 + $0x31] sm:$0x1] %vm2540_vm4, %v2596_v20  ;;  %v2646_v18 = vrot.slane %v2630_v30, %v4475_v12  ;;  %v2653_v23 = vrot.slane %v2631_v32, %v4475_v12  ;;  %v2661_v24 = vcombine.high %v2639_v1, %v2639_v1 }
0x176c   :  { %2548 = vst.msk [vmem:[#allocation16 + $0x38] sm:$0x1] %vm2540_vm4, %v2531_v22  ;;  %2614 = vst.msk [vmem:[#allocation16 + $0x39] sm:$0x1] %vm2540_vm4, %v2598_v33  ;;  %v2696_v7 = vrot.slane %v2682_v35, %v4475_v12  ;;  %v2697_v44 = vcombine.high %v2689_v36, %v2689_v36  ;;  %v2705_v26 = vrot.slane %v2689_v36, %v4475_v12 }
0x176d   :  { %2673 = vst.msk [vmem:[#allocation16 + $0x2] sm:$0x1] %vm2540_vm4, %v2639_v1  ;;  %v2660_v60 = vrot.slane %v2632_v37, %v4475_v12  ;;  %v2662_v15 = vcombine.high %v2646_v18, %v2646_v18  ;;  %v2663_v27 = vcombine.high %v2653_v23, %v2653_v23  ;;  %2674 = vst.msk [vmem:[#allocation16 + $0xa] sm:$0x1] %vm2540_vm4, %v2653_v23 }
0x176e   :  { %2481 = vst.msk [vmem:[#allocation13] sm:$0xff] %vm269_vm2, %v2480_v31  ;;  %v2748_v46 = vcombine.high %v4481_v13, %v4481_v13  ;;  %v2698_v41 = vcombine.high %v2696_v7, %v2696_v7  ;;  %v2712_v38 = vrot.slane %v2696_v7, %v4475_v12  ;;  %v2719_v16 = vrot.slane %v2697_v44, %v4475_v12 }
0x176f   :  { %2677 = vst.msk [vmem:[#allocation16 + $0x22] sm:$0x1] %vm2540_vm4, %v2646_v18  ;;  %2675 = vst.msk [vmem:[#allocation16 + $0x12] sm:$0x1] %vm2540_vm4, %v2661_v24  ;;  %v2727_v39 = vcombine.high %v2705_v26, %v2705_v26 }
0x1770   :  { %2739 = vst.msk [vmem:[#allocation16 + $0x3] sm:$0x1] %vm2540_vm4, %v2705_v26 }
0x1771   :  { %3789 = shalt.err (!%p3786_p6)
}
0x1772   :  { %3020 = dma.vmem_to_hbm [thread:$0]  %s3018_s11, 128, %s4653_s8, [#allocation6]   ;;  %v2664_v47 = vcombine.high %v2660_v60, %v2660_v60  ;;  %2676 = vst.msk [vmem:[#allocation16 + $0x1a] sm:$0x1] %vm2540_vm4, %v2663_v27  ;;  %2678 = vst.msk [vmem:[#allocation16 + $0x2a] sm:$0x1] %vm2540_vm4, %v2660_v60  ;;  %v2755_v17 = vrot.slane %v4481_v13, %v4475_v12  ;;  %v2762_v0 = vrot.slane %v2748_v46, %v4475_v12 }
0x1773   :  { %2679 = vst.msk [vmem:[#allocation16 + $0x32] sm:$0x1] %vm2540_vm4, %v2662_v15  ;;  %v2814_v19 = vcombine.high %v4483_v21, %v4483_v21  ;;  %v2726_v48 = vrot.slane %v2698_v41, %v4475_v12  ;;  %v2728_v49 = vcombine.high %v2712_v38, %v2712_v38  ;;  %v2729_v43 = vcombine.high %v2719_v16, %v2719_v16  ;;  %s3845_s8 = smov [#allocation16]  }
0x1774   :  { %2740 = vst.msk [vmem:[#allocation16 + $0xb] sm:$0x1] %vm2540_vm4, %v2719_v16  ;;  %2741 = vst.msk [vmem:[#allocation16 + $0x13] sm:$0x1] %vm2540_vm4, %v2727_v39  ;;  %v2821_v29 = vrot.slane %v4483_v21, %v4475_v12  ;;  %v2763_v13 = vcombine.high %v2755_v17, %v2755_v17  ;;  %v2764_v50 = vcombine.high %v2762_v0, %v2762_v0  ;;  %s3038_s14 = sshll.u32 %s3845_s8, 4  ;;  %s3039_s14 = int_to_ptr.vmem [resolvable:$true] %s3038_s14 }
0x1775   :  { %2743 = vst.msk [vmem:[#allocation16 + $0x23] sm:$0x1] %vm2540_vm4, %v2712_v38  ;;  %2680 = vst.msk [vmem:[#allocation16 + $0x3a] sm:$0x1] %vm2540_vm4, %v2664_v47  ;;  %v2771_v2 = vrot.slane %v2755_v17, %v4475_v12  ;;  %v2778_v53 = vrot.slane %v2762_v0, %v4475_v12  ;;  %v2730_v54 = vcombine.high %v2726_v48, %v2726_v48  ;;  %s3798_s15 = scalar_lea.vmem %s3039_s14, 1024  ;;  %p3803_p8 = scmp.lt.s32.totalorder %s3039_s14, %s3039_s14 }
0x1776   :  { %2742 = vst.msk [vmem:[#allocation16 + $0x1b] sm:$0x1] %vm2540_vm4, %v2729_v43  ;;  %2744 = vst.msk [vmem:[#allocation16 + $0x2b] sm:$0x1] %vm2540_vm4, %v2726_v48  ;;  %v2828_v5 = vrot.slane %v2814_v19, %v4475_v12  ;;  %v2829_v57 = vcombine.high %v2821_v29, %v2821_v29  ;;  %v2837_v21 = vrot.slane %v2821_v29, %v4475_v12  ;;  %p3799_p7 = scmp.ne.s32.totalorder %s3039_s14, %s3798_s15  ;;  %p3804_p9 = scmp.lt.s32.totalorder %s3798_s15, %s3798_s15 }
0x1777   :  { %2745 = vst.msk [vmem:[#allocation16 + $0x33] sm:$0x1] %vm2540_vm4, %v2728_v49  ;;  %v2785_v8 = vrot.slane %v2763_v13, %v4475_v12  ;;  %v2792_v52 = vrot.slane %v2764_v50, %v4475_v12  ;;  %v2793_v58 = vcombine.high %v2771_v2, %v2771_v2  ;;  %v2794_v11 = vcombine.high %v2778_v53, %v2778_v53 }
0x1778   :  { %2805 = vst.msk [vmem:[#allocation16 + $0x4] sm:$0x1] %vm2540_vm4, %v2771_v2  ;;  %2809 = vst.msk [vmem:[#allocation16 + $0x24] sm:$0x1] %vm2540_vm4, %v2778_v53  ;;  %v2830_v59 = vcombine.high %v2828_v5, %v2828_v5  ;;  %v2844_v62 = vrot.slane %v2828_v5, %v4475_v12  ;;  %v2851_v63 = vrot.slane %v2829_v57, %v4475_v12  ;;  %p3805_p10 = por %p3804_p9, %p3803_p8 }
0x1779   :  { %2746 = vst.msk [vmem:[#allocation16 + $0x3b] sm:$0x1] %vm2540_vm4, %v2730_v54  ;;  %v2859_v3 = vcombine.high %v2837_v21, %v2837_v21  ;;  %2871 = vst.msk [vmem:[#allocation16 + $0x5] sm:$0x1] %vm2540_vm4, %v2837_v21  ;;  %v2795_v4 = vcombine.high %v2785_v8, %v2785_v8  ;;  %v2796_v6 = vcombine.high %v2792_v52, %v2792_v52 }
0x177a   :  { %2806 = vst.msk [vmem:[#allocation16 + $0xc] sm:$0x1] %vm2540_vm4, %v2785_v8  ;;  %2807 = vst.msk [vmem:[#allocation16 + $0x14] sm:$0x1] %vm2540_vm4, %v2793_v58  ;;  %v2946_v56 = vcombine.high %v4485_v42, %v4485_v42  ;;  %v2953_v9 = vrot.slane %v4485_v42, %v4475_v12  ;;  %v2858_v34 = vrot.slane %v2830_v59, %v4475_v12  ;;  %p3806_p11 = pnand %p3805_p10, %p3799_p7 }
0x177b   :  { %2810 = vst.msk [vmem:[#allocation16 + $0x2c] sm:$0x1] %vm2540_vm4, %v2792_v52  ;;  %2811 = vst.msk [vmem:[#allocation16 + $0x34] sm:$0x1] %vm2540_vm4, %v2794_v11  ;;  %v2860_v40 = vcombine.high %v2844_v62, %v2844_v62  ;;  %v2861_v55 = vcombine.high %v2851_v63, %v2851_v63 }
0x177c   :  { %2872 = vst.msk [vmem:[#allocation16 + $0xd] sm:$0x1] %vm2540_vm4, %v2851_v63  ;;  %2873 = vst.msk [vmem:[#allocation16 + $0x15] sm:$0x1] %vm2540_vm4, %v2859_v3  ;;  %v2960_v10 = vrot.slane %v2946_v56, %v4475_v12  ;;  %v2961_v14 = vcombine.high %v2953_v9, %v2953_v9  ;;  %v2969_v51 = vrot.slane %v2953_v9, %v4475_v12 }
0x177d   :  { %2875 = vst.msk [vmem:[#allocation16 + $0x25] sm:$0x1] %vm2540_vm4, %v2844_v62  ;;  %2808 = vst.msk [vmem:[#allocation16 + $0x1c] sm:$0x1] %vm2540_vm4, %v2795_v4  ;;  %v2862_v42 = vcombine.high %v2858_v34, %v2858_v34 }
0x177e   :  { %2812 = vst.msk [vmem:[#allocation16 + $0x3c] sm:$0x1] %vm2540_vm4, %v2796_v6  ;;  %2874 = vst.msk [vmem:[#allocation16 + $0x1d] sm:$0x1] %vm2540_vm4, %v2861_v55  ;;  %v2962_v61 = vcombine.high %v2960_v10, %v2960_v10  ;;  %v2976_v45 = vrot.slane %v2960_v10, %v4475_v12  ;;  %v2983_v20 = vrot.slane %v2961_v14, %v4475_v12 }
0x177f   :  { %2876 = vst.msk [vmem:[#allocation16 + $0x2d] sm:$0x1] %vm2540_vm4, %v2858_v34  ;;  %2877 = vst.msk [vmem:[#allocation16 + $0x35] sm:$0x1] %vm2540_vm4, %v2860_v40  ;;  %v2991_v25 = vcombine.high %v2969_v51, %v2969_v51 }
0x1780   :  { %3003 = vst.msk [vmem:[#allocation16 + $0x7] sm:$0x1] %vm2540_vm4, %v2969_v51  ;;  %2878 = vst.msk [vmem:[#allocation16 + $0x3d] sm:$0x1] %vm2540_vm4, %v2862_v42  ;;  %v2990_v28 = vrot.slane %v2962_v61, %v4475_v12  ;;  %v2992_v22 = vcombine.high %v2976_v45, %v2976_v45  ;;  %v2993_v30 = vcombine.high %v2983_v20, %v2983_v20 }
0x1781   :  { %3004 = vst.msk [vmem:[#allocation16 + $0xf] sm:$0x1] %vm2540_vm4, %v2983_v20  ;;  %3005 = vst.msk [vmem:[#allocation16 + $0x17] sm:$0x1] %vm2540_vm4, %v2991_v25 }
0x1782   :  { %3007 = vst.msk [vmem:[#allocation16 + $0x27] sm:$0x1] %vm2540_vm4, %v2976_v45  ;;  %v2994_v32 = vcombine.high %v2990_v28, %v2990_v28  ;;  %3006 = vst.msk [vmem:[#allocation16 + $0x1f] sm:$0x1] %vm2540_vm4, %v2993_v30 }
0x1783   :  { %3008 = vst.msk [vmem:[#allocation16 + $0x2f] sm:$0x1] %vm2540_vm4, %v2990_v28  ;;  %3009 = vst.msk [vmem:[#allocation16 + $0x37] sm:$0x1] %vm2540_vm4, %v2992_v22 }
0x1784   :  { %3010 = vst.msk [vmem:[#allocation16 + $0x3f] sm:$0x1] %vm2540_vm4, %v2994_v32 }
0x1785   :  { %3809 = shalt.err (!%p3806_p11)
}
0x1786   :  { %3044 = dma.vmem_to_hbm [thread:$0]  %s3039_s14, 1024, %s4655_s10, [#allocation15], %s3833_s25, %s3833_s25, %s3834_s26  }
0x1787   :  { %3824 = dma.done.wait [#allocation6], 128  }
0x1788   :  { %3825 = vsyncadd [#allocation6], 4294967168 }
0x1789   :  { %3826 = dma.done.wait [#allocation15], 1280  }
0x178a   :  { %3827 = vsyncadd [#allocation15], 4294966016 }
0x178b   :  { %3054 = vsyncpa [#allocation5], 1 }
0x178c   :  { %3055 = vsyncpa [#allocation8], 1 }
0x178d   :  { %3056 = vsyncpa [#allocation11], 1 }
0x178e   :  { %3057 = vsyncpa [#allocation6], 1 }
0x178f   :  { %3058 = vsyncpa [#allocation15], 1 }

</bundles_post_ra>
